<compile_context>
chip_gen: v5e
topology: v5e:2x2
jax: 0.10.0
libtpu: 0.0.40
codegen_flags: <defaults>
</compile_context>

<pallas_src>
import jax
import jax.numpy as jnp
import numpy as np
from jax.experimental import pallas as pl
from jax.experimental.pallas import tpu as pltpu


def _fourier_kernel(ts_ref, exp_ref, fp_ref, out_ref):
    """One grid step: TN output rows of L lanes each.

    ts_ref  : (K_pad, TN) f32 -- column r holds the k timestamps packed into
                                 output row r (rows >= k are zero padding).
    exp_ref : (K_pad, L)  f32 -- one-hot expansion: exp[j, l] = 1.0 iff l//H == j.
    fp_ref  : (2, L)      f32 -- row 0 = freq slab, row 1 = phase slab (0 | pi/2).
    out_ref : (TN, L)     f32
    """
    # Tiny lane->sublane move of the packed timestamps (1/(k*H) of the output
    # volume), then broadcast each timestamp across its H lanes on the
    # otherwise-idle MXU.  HIGHEST precision keeps the f32 timestamps exact.
    ts_rows = jnp.transpose(ts_ref[...], (1, 0))                   # (TN, K_pad)
    ts_b = jax.lax.dot_general(
        ts_rows, exp_ref[...],
        dimension_numbers=(((1,), (0,)), ((), ())),
        precision=jax.lax.Precision.HIGHEST,
        preferred_element_type=jnp.float32)                        # (TN, L)
    freq = fp_ref[0:1, :]                                          # (1, L)
    phase = fp_ref[1:2, :]                                         # (1, L)
    # One full-lane VPU mul+add, one full-lane EUP sin, one unmasked vst.
    out_ref[...] = jnp.sin(ts_b * freq + phase)


def fourier_time_encoder(ts, freq, *, max_block_bytes=2 * 1024 * 1024):
    """ts: arbitrary-shaped float array, freq: (H/2,) -> (*ts.shape, H)."""
    orig_shape = ts.shape
    H2 = int(freq.shape[0])
    H = 2 * H2

    ts_flat = ts.reshape(-1).astype(jnp.float32)
    N = int(ts_flat.shape[0])

    # Pack k timestamps per output row so each stored row is (a multiple of)
    # 128 lanes.  Fallback k=1 stays correct for awkward H (masked stores,
    # only when H does not divide 128).
    if H < 128 and 128 % H == 0:
        k = 128 // H
    else:
        k = 1
    L = k * H                               # output lanes per row
    K_pad = ((k + 7) // 8) * 8              # sublane-aligned packed-ts rows

    # ---- Tile / grid selection ---------------------------------------------
    # Output block <= ~2 MiB (long DMAs; double-buffered footprint stays well
    # inside the 16 MiB v5e / 32 MiB v6e+v7x scoped-VMEM defaults).  TN is a
    # multiple of 128 (it is the *lane* dim of the packed-ts block).  Force at
    # least 2 (and an even number of) grid steps so ("parallel",) can shard
    # the work across both v7x TensorCores.
    Nr = pl.cdiv(N, k)                                       # logical output rows
    rows_cap = max(128, (max_block_bytes // (L * 4)) // 128 * 128)
    rows_two_steps = max(128, pl.cdiv(pl.cdiv(Nr, 2), 128) * 128)
    TN = min(rows_cap, rows_two_steps)
    G = max(2, pl.cdiv(Nr, TN))
    if G % 2:
        G += 1                                               # balance the two v7x cores
    Nr_pad = G * TN
    N_pad = Nr_pad * k

    # ---- Operand construction (all lane-dense / 128-aligned) ----------------
    pad = N_pad - N
    if pad:
        ts_flat = jnp.pad(ts_flat, (0, pad))
    # (K_pad, Nr_pad): timestamps along the lane axis -> no HBM minor-dim
    # padding blowup; row j, column r holds ts[r*k + j].
    ts_cols = jnp.transpose(ts_flat.reshape(Nr_pad, k), (1, 0))
    if K_pad > k:
        ts_cols = jnp.pad(ts_cols, ((0, K_pad - k), (0, 0)))

    # One-hot lane-expansion matrix (constant): exp[j, l] = 1 iff l // H == j.
    lane = np.arange(L)
    expand = np.zeros((K_pad, L), dtype=np.float32)
    expand[lane // H, lane] = 1.0
    expand = jnp.asarray(expand)

    # freq / phase lane slabs; cos(x) = sin(x + pi/2)  (f32 pi/2 rounding adds
    # ~4e-8 absolute error, far below the 1e-5 tolerance).
    freq_f32 = freq.astype(jnp.float32)
    freq_lane = jnp.tile(jnp.concatenate([freq_f32, freq_f32]), k)        # (L,)
    phase_half = np.concatenate([np.zeros(H2, np.float32),
                                 np.full(H2, np.pi / 2, np.float32)])
    phase_lane = jnp.asarray(np.tile(phase_half, k))                      # (L,)
    fp = jnp.stack([freq_lane, phase_lane], axis=0)                       # (2, L)

    cost = pl.CostEstimate(
        flops=2 * Nr_pad * K_pad * L + 2 * Nr_pad * L,
        transcendentals=Nr_pad * L,
        bytes_accessed=K_pad * Nr_pad * 4 + (K_pad + 2) * L * 4 + Nr_pad * L * 4,
    )

    out = pl.pallas_call(
        _fourier_kernel,
        out_shape=jax.ShapeDtypeStruct((Nr_pad, L), jnp.float32),
        grid_spec=pltpu.PrefetchScalarGridSpec(
            num_scalar_prefetch=0,
            grid=(G,),
            in_specs=[
                pl.BlockSpec((K_pad, TN), lambda i: (0, i)),   # packed timestamps
                pl.BlockSpec((K_pad, L), lambda i: (0, 0)),    # one-hot (fetched once)
                pl.BlockSpec((2, L), lambda i: (0, 0)),        # freq/phase slabs
            ],
            out_specs=pl.BlockSpec((TN, L), lambda i: (i, 0)),
        ),
        compiler_params=pltpu.CompilerParams(
            dimension_semantics=("parallel",),
            vmem_limit_bytes=32 * 1024 * 1024,
        ),
        cost_estimate=cost,
    )(ts_cols, expand, fp)

    # Row-major bytes of (Nr_pad, L) are exactly timestamp-major with H
    # contiguous [sin(H2) | cos(H2)] entries per timestamp, so this is a pure
    # reshape after dropping the padding.  (XLA may still insert a small
    # relayout to the (..., H) minor-dim layout; consume the packed layout
    # downstream / fuse the consumer if xprof shows that copy.)
    out_flat = out.reshape(-1)[: N * H]
    return out_flat.reshape(*orig_shape, H)


def reference(ts, freq):
    map_ts = ts[..., None] * freq
    return jnp.concatenate([jnp.sin(map_ts), jnp.cos(map_ts)], axis=-1)


if __name__ == "__main__":
    key = jax.random.PRNGKey(0)
    k_ts, k_freq = jax.random.split(key)

    batch, seq, hidden_dim = 2, 8, 32

    # Deterministic parameter init mirroring torch.randn(H//2).abs() + 1e-8.
    freq = jnp.abs(jax.random.normal(k_freq, (hidden_dim // 2,),
                                     dtype=jnp.float32)) + 1e-8
    ts = jax.random.uniform(k_ts, (batch, seq), dtype=jnp.float32) * 10.0

    out = fourier_time_encoder(ts, freq)
    out = jax.block_until_ready(out)

    ref = reference(ts, freq)
    assert out.shape == (batch, seq, hidden_dim), out.shape
    assert jnp.allclose(out, ref, atol=1e-5, rtol=1e-5), "mismatch vs reference"

    print("KERNEL_OK")
</pallas_src>

<mosaic_0001>
module attributes {stable_mosaic.version = 11 : i64} {
  func.func @_fourier_kernel(%arg0: i32, %arg1: memref<8x128xf32, #tpu.memory_space<vmem>>, %arg2: memref<8x128xf32, #tpu.memory_space<vmem>>, %arg3: memref<2x128xf32, #tpu.memory_space<vmem>>, %arg4: memref<128x128xf32, #tpu.memory_space<vmem>>) attributes {dimension_semantics = [#tpu.dimension_semantics<parallel>], iteration_bounds = array<i64: 2>, scalar_prefetch = 0 : i64, scratch_operands = 0 : i64, tpu.core_type = #tpu.core_type<tc>, window_params = [{transform_indices = @transform_0, window_bounds = array<i64: 8, 128>}, {pipeline_mode = #tpu.pipeline_mode<synchronous>, transform_indices = @transform_1, window_bounds = array<i64: 8, 128>}, {pipeline_mode = #tpu.pipeline_mode<synchronous>, transform_indices = @transform_2, window_bounds = array<i64: 2, 128>}, {transform_indices = @transform_3, window_bounds = array<i64: 128, 128>}]} {
    %c0 = arith.constant 0 : index
    %c0_0 = arith.constant 0 : index
    %0 = vector.load %arg1[%c0, %c0_0] : memref<8x128xf32, #tpu.memory_space<vmem>>, vector<8x128xf32>
    %1 = tpu.transpose %0, [1, 0] : vector<8x128xf32> -> vector<128x8xf32>
    %c0_1 = arith.constant 0 : index
    %c0_2 = arith.constant 0 : index
    %2 = vector.load %arg2[%c0_1, %c0_2] : memref<8x128xf32, #tpu.memory_space<vmem>>, vector<8x128xf32>
    %cst = arith.constant dense<0.000000e+00> : vector<128x128xf32>
    %3 = tpu.matmul %1, %2, %cst {dimension_numbers = #tpu.dot_dimension_numbers<[1], [0], [0], [1], [0, 0, 1, 1], [], []>, precision = #tpu.contract_precision<fp32>} : vector<128x8xf32>, vector<8x128xf32>, vector<128x128xf32> -> vector<128x128xf32>
    %c0_3 = arith.constant 0 : index
    %c0_4 = arith.constant 0 : index
    %4 = vector.load %arg3[%c0_3, %c0_4] : memref<2x128xf32, #tpu.memory_space<vmem>>, vector<1x128xf32>
    %c1 = arith.constant 1 : index
    %c0_5 = arith.constant 0 : index
    %5 = vector.load %arg3[%c1, %c0_5] : memref<2x128xf32, #tpu.memory_space<vmem>>, vector<1x128xf32>
    %6 = vector.broadcast %4 : vector<1x128xf32> to vector<128x128xf32>
    %7 = arith.mulf %3, %6 : vector<128x128xf32>
    %8 = vector.broadcast %5 : vector<1x128xf32> to vector<128x128xf32>
    %9 = arith.addf %7, %8 : vector<128x128xf32>
    %10 = math.sin %9 : vector<128x128xf32>
    %c0_6 = arith.constant 0 : index
    %c0_7 = arith.constant 0 : index
    %11 = vector.load %arg4[%c0_6, %c0_7] : memref<128x128xf32, #tpu.memory_space<vmem>>, vector<128x128xf32>
    tpu.vector_store %arg4[%c0_6, %c0_7], %10 {strides = array<i32>} : memref<128x128xf32, #tpu.memory_space<vmem>>, vector<128x128xf32>,
    return
  }
  func.func @transform_0(%arg0: i32) -> (i32, i32) {
    %c0_i32 = arith.constant 0 : i32
    %c0_i32_0 = arith.constant 0 : i32
    return %c0_i32, %arg0 : i32, i32
  }
  func.func @transform_1(%arg0: i32) -> (i32, i32) {
    %c0_i32 = arith.constant 0 : i32
    %c0_i32_0 = arith.constant 0 : i32
    %c0_i32_1 = arith.constant 0 : i32
    return %c0_i32, %c0_i32_0 : i32, i32
  }
  func.func @transform_2(%arg0: i32) -> (i32, i32) {
    %c0_i32 = arith.constant 0 : i32
    %c0_i32_0 = arith.constant 0 : i32
    %c0_i32_1 = arith.constant 0 : i32
    return %c0_i32, %c0_i32_0 : i32, i32
  }
  func.func @transform_3(%arg0: i32) -> (i32, i32) {
    %c0_i32 = arith.constant 0 : i32
    %c0_i32_0 = arith.constant 0 : i32
    return %arg0, %c0_i32 : i32, i32
  }
}

</mosaic_0001>

<bundles_post_ra>
// kernel: tpu_custom_call.1
= control target key start
LH: loop header
LB: loop body
LE: loop exit
PB: predicated region body
PF: predicated region fallthrough
CT: control target
= control target key end

     0   :  { %8 = vsyncpa [#allocation3], 0  ;;  %s5996_s0 = inlined_call_operand.hbm [shape: f32[8,256], index: 0, kind: input, shape index: {}]   ;;  %s5997_s1 = inlined_call_operand.hbm [shape: f32[8,128], index: 1, kind: input, shape index: {}]   ;;  %s5998_s2 = inlined_call_operand.hbm [shape: f32[2,128], index: 2, kind: input, shape index: {}]   ;;  %s5999_s3 = inlined_call_operand.hbm [shape: f32[256,128], index: 3, kind: output, shape index: {}]  }
   0x1   :  { %10 = vsyncpa [#allocation3 + $0x1], 0 }
   0x2   :  { %11 = vsyncpa [#allocation6], 0 }
   0x3   :  { %12 = vsyncpa [#allocation4], 0 }
   0x4   :  { %14 = vsyncpa [#allocation4 + $0x1], 0  ;;  %s3899_s12 = smov 0   ;;  %s3901_s13 = smov 0  }
   0x5   :  { %s3903_s14 = smov 0   ;;  %s3905_s15 = smov 0  }
   0x6 LB: > { %s3920_s16 = sadd.s32 4294967295, %s3866_s15   ;;  %s3552_s17 = sadd.s32 4294967294, %s3866_s15   ;;  %s3866_s15 = sphi %s3905_s15, %s6038_s15   ;;  %s3862_s14 = sphi %s3903_s14, %s6037_s14   ;;  %s3858_s13 = sphi %s3901_s13, %s6036_s13   ;;  %s3854_s12 = sphi %s3899_s12, %s6035_s12  }
   0x7   : > { %p40_p0 = scmp.ne.s32.totalorder %s3858_s13, %s3854_s12  ;;  %p41_p1 = scmp.eq.s32.totalorder %s3920_s16, 0 }
   0x8   : > { %p106_p2 = scmp.eq.s32.totalorder %s3920_s16, 1  ;;  %p112_p3 = scmp.eq.s32.totalorder %s3552_s17, 1 }
   0x9   : > { %p3929_p4 = por %p41_p1, %p40_p0  ;;  %p3553_p5 = scmp.ge.s32.totalorder %s3866_s15, 1 }
   0xa   : > { %p3934_p6 = por %p112_p3, %p40_p0  ;;  %p119_p7 = scmp.lt.s32.totalorder %s3866_s15, 3 }
   0xb   : > { %s131_s22 = sshll.u32 %s5997_s1, 4  ;;  %s3868_s24 = smov [#allocation5]   ;;  %s132_s22 = int_to_ptr.hbm [resolvable:$true] %s131_s22 }
   0xc   : > { %p3942_p8 = pnand %p3553_p5, %p119_p7  ;;  %s133_s25 = sshll.u32 %s3868_s24, 4  ;;  %s134_s25 = int_to_ptr.vmem [resolvable:$true] %s133_s25 }
   0xd   : > { %s143_s28 = sshll.u32 %s5998_s2, 4  ;;  %s3869_s29 = smov [#allocation7]   ;;  %s144_s28 = int_to_ptr.hbm [resolvable:$true] %s143_s28 }
   0xe   : > { %p3632_p10 = pneg %p3942_p8  ;;  %s145_s30 = sshll.u32 %s3869_s29, 4  ;;  %s146_s30 = int_to_ptr.vmem [resolvable:$true] %s145_s30 }
   0xf   : > { %s3955_s4 = sadd.s32 1, %s3866_s15   ;;  %s27_s5 = sadd.s32 1, %s3862_s14 }
  0x10   : > { %p3633_p11 = pnand %p3632_p10, %p41_p1  ;;  %s24_s6 = ssub.s32 %s3866_s15, %s3955_s4 }
  0x11   : > { %p34_p12 = scmp.ne.s32.totalorder %s3862_s14, %s3858_s13  ;;  %p25_p13 = scmp.eq.s32.totalorder %s24_s6, 0 }
  0x12   : > { %3635 = dma.hbm_to_vmem [thread:$0]  (!%p3633_p11), %s132_s22, 128, %s134_s25, [#allocation6]  }
  0x13   : > { %3638 = dma.hbm_to_vmem [thread:$0]  (!%p3633_p11), %s144_s28, 32, %s146_s30, [#allocation6]  }
  0x14   : > { %p35_p0 = scmp.eq.s32.totalorder %s3866_s15, 0  ;;  %p3965_p3 = por %p106_p2, %p34_p12 }
  0x15   : > { %p3649_p5 = scmp.lt.s32.totalorder %s3866_s15, 2  ;;  %s156_s9 = sand.u32 1, %s3862_s14  }
  0x16   : > { %s3971_s8 = scalar_select %p25_p13, %s3862_s14, %s27_s5  }
  0x17   : > { %p36_p7 = por %p35_p0, %p34_p12  ;;  %s3557_s10 = sshll.u32 %s156_s9, 3 }
  0x18   : > { %s3558_s11 = sshll.u32 %s3866_s15, 3  ;;  %s160_s22 = scalar_lea.vmem [#allocation2], %s3557_s10 }
  0x19   : > { %s164_s21 = scalar_lea.hbm %s5996_s0, %s3558_s11  ;;  %s168_s24 = sshll.u32 %s160_s22, 4  ;;  %s169_s24 = int_to_ptr.vmem [resolvable:$true] %s168_s24 }
  0x1a   : > { %s166_s25 = sshll.u32 %s164_s21, 4  ;;  %p3978_p2 = pnand %p3649_p5, %p36_p7  ;;  %s167_s25 = int_to_ptr.hbm [resolvable:$true] %s166_s25 }
  0x1b   : > { %s157_s27 = scalar_lea.sflag [#allocation3], %s156_s9  ;;  %s3766_s28 = sshra.s32 %s167_s25, 4  ;;  %s3767_s28 = int_to_ptr.hbm [resolvable:$true] %s3766_s28 }
  0x1c   : > { %s3768_s29 = scalar_lea.hbm %s3767_s28, 8  ;;  %p3770_p11 = pneg %p3978_p2 }
  0x1d   : > { %p3769_p10 = scmp.ne.s32.totalorder %s3767_s28, %s3768_s29  ;;  %s3773_s6 = scalar_lea.hbm %s5996_s0, 16 }
  0x1e   : > { %p3774_p0 = scmp.lt.s32.totalorder %s3767_s28, %s5996_s0  ;;  %p3775_p5 = scmp.lt.s32.totalorder %s3773_s6, %s3768_s29 }
  0x1f   : > { %p3771_p12 = pnand %p3770_p11, %p3769_p10 }
  0x20   : > { %p3776_p7 = por %p3775_p5, %p3774_p0 }
  0x21   : > { %p3772_p13 = pneg %p3771_p12 }
  0x23   : > { %p3777_p9 = pnand %p3776_p7, %p3772_p13 }
  0x25   : > { %3780 = shalt.err (!%p3777_p9)
}
  0x26   : > { %3642 = dma.hbm_to_vmem [thread:$0]  (!%p3978_p2), %s167_s25, 128, %s169_s24, %s157_s27  }
  0x27   : > { %177 = sbr.rel (%p3942_p8) target bundleno = 1169 (0x491), region = 32  ;;  %s3995_s9 = sand.u32 (!%p3942_p8), 1, %s3858_s13  }
  0x28   : > { %s3560_s17 = sshll.u32 (!%p3942_p8), %s3995_s9, 3  ;;  %s180_s20 = scalar_lea.sflag (!%p3942_p8), [#allocation3], %s3995_s9 }
  0x29   : > { %s183_s21 = scalar_lea.vmem (!%p3942_p8), [#allocation2], %s3560_s17 }
  0x2c   : > { %3841 = dma.done.wait (%p3929_p4), %s180_s20, 128  }
  0x2d   : > { %3843 = vsyncadd (%p3929_p4), %s180_s20, 4294967168 }
  0x2e   : > { %3845 = dma.done.wait (%p41_p1), [#allocation6], 160  }
  0x2f   : > { %3847 = vsyncadd (%p41_p1), [#allocation6], 4294967136  ;;  %v218_v0 = vld [vmem:[%s183_s21] sm:$0xff]  ;;  %v251_v1 = vld [vmem:[#allocation5] sm:$0xff]  ;;  %vm252_vm0 = vcmask 64512   ;;  %s3563_s18 = sshll.u32 %s3995_s9, 7 }
  0x30   : > { %219 = vxpose.xlu0.b32.start.end [1/1] (short) %v218_v0, 128  ;;  %v316_v2 = vand.u32 4294901760, %v251_v1  ;;  %s4567_s23 = scalar_lea.vmem [#allocation8], %s3563_s18  ;;  %s3617_s22 = sshll.u32 %s3920_s16, 7 }
  0x31   : > { %s3456_s26 = scalar_lea.hbm %s5999_s3, %s3617_s22  ;;  %s3457_s27 = sshll.u32 %s4567_s23, 4  ;;  %s3458_s27 = int_to_ptr.vmem [resolvable:$true] %s3457_s27 }
  0x32   : > { %v463_v3 = vsub.f32 %v251_v1, %v316_v2  ;;  %317 = vmatpush.msra.mxu0 %v316_v2  ;;  %3618 = vmatpush.msra.mxu2 %v316_v2  ;;  %s3459_s28 = sshll.u32 %s3456_s26, 4  ;;  %s3445_s16 = scalar_lea.sflag [#allocation4], %s3995_s9  ;;  %s3460_s28 = int_to_ptr.hbm [resolvable:$true] %s3459_s28 }
  0x33   : > { %s3810_s29 = sshra.s32 %s3460_s28, 4  ;;  %s3816_s10 = scalar_lea.hbm %s5999_s3, 256  ;;  %s3811_s29 = int_to_ptr.hbm [resolvable:$true] %s3810_s29 }
  0x34   : > { %v464_v4 = vand.u32 4294901760, %v463_v3  ;;  %550 = vmatpush.msrb.mxu2 %v463_v3  ;;  %s3812_s30 = scalar_lea.hbm %s3811_s29, 128  ;;  %p3817_p9 = scmp.lt.s32.totalorder %s3811_s29, %s5999_s3 }
  0x35   : > { %p3813_p1 = scmp.ne.s32.totalorder %s3811_s29, %s3812_s30  ;;  %p3818_p2 = scmp.lt.s32.totalorder %s3816_s10, %s3812_s30 }
  0x36   : > { %v465_v5 = vsub.f32 %v463_v3, %v464_v4  ;;  %764 = vmatpush.msrb.mxu0 %v464_v4 }
  0x37   : > { %p3814_p4 = pnand %p3813_p1, %p3965_p3  ;;  %p3819_p10 = por %p3818_p2, %p3817_p9 }
  0x38   : > { %v466_v6 = vand.u32 4294901760, %v465_v5 }
  0x39   : > { %p3815_p8 = pneg %p3814_p4 }
  0x3a   : > { %467 = vmatpush.msra.mxu1 %v466_v6  ;;  %3619 = vmatpush.msra.mxu3 %v466_v6 }
  0x3b   : > { %p3820_p11 = pnand %p3819_p10, %p3815_p8 }
  0x3c   : > { %846 = vmatpush.msrb.mxu1 %v316_v2  ;;  %648 = vmatpush.msrb.mxu3 %v316_v2 }
  0xd4   : > { %v235_v7 = vpop.trf.xlu0 }
  0xd5   : > { %v254_v8 = vsel %vm252_vm0, %v235_v7, 0 }
  0xd6   : > { %v4008_v9 = vand.u32 4294901760, %v254_v8 }
  0xd8   : > { %v4011_v10 = vsub.f32 %v254_v8, %v4008_v9  ;;  %469 = vmatmul.f32.vlgmr.msra.gmra.mxu1 %v4008_v9 }
  0xda   : > { %v320_v11 = vand.u32 4294901760, %v4011_v10 }
  0xdc   : > { %v236_v12 = vpop.trf.xlu0  ;;  %v321_v13 = vsub.f32 %v4011_v10, %v320_v11 }
  0xdd   : > { %v257_v14 = vsel %vm252_vm0, %v236_v12, 0 }
  0xde   : > { %v4019_v15 = vand.u32 4294901760, %v257_v14  ;;  %v322_v16 = vand.u32 4294901760, %v321_v13 }
  0xe0   : > { %v4022_v17 = vsub.f32 %v257_v14, %v4019_v15  ;;  %323 = vmatmul.f32.vlgmr.msra.gmra.mxu0 %v322_v16  ;;  %473 = vmatmul.f32.gmra.mxu1 %v4019_v15 }
  0xe2   : > { %v328_v18 = vand.u32 4294901760, %v4022_v17 }
  0xe4   : > { %v237_v19 = vpop.trf.xlu0  ;;  %v329_v20 = vsub.f32 %v4022_v17, %v328_v18 }
  0xe5   : > { %v260_v21 = vsel %vm252_vm0, %v237_v19, 0 }
  0xe6   : > { %v4030_v22 = vand.u32 4294901760, %v260_v21  ;;  %v330_v23 = vand.u32 4294901760, %v329_v20 }
  0xe8   : > { %v4033_v24 = vsub.f32 %v260_v21, %v4030_v22  ;;  %331 = vmatmul.f32.gmra.mxu0 %v330_v23  ;;  %477 = vmatmul.f32.gmra.mxu1 %v4030_v22 }
  0xea   : > { %v336_v25 = vand.u32 4294901760, %v4033_v24 }
  0xec   : > { %v238_v26 = vpop.trf.xlu0  ;;  %v337_v27 = vsub.f32 %v4033_v24, %v336_v25 }
  0xed   : > { %v263_v28 = vsel %vm252_vm0, %v238_v26, 0 }
  0xee   : > { %v4041_v29 = vand.u32 4294901760, %v263_v28  ;;  %v338_v30 = vand.u32 4294901760, %v337_v27 }
  0xf0   : > { %v4044_v31 = vsub.f32 %v263_v28, %v4041_v29  ;;  %339 = vmatmul.f32.gmra.mxu0 %v338_v30  ;;  %481 = vmatmul.f32.gmra.mxu1 %v4041_v29 }
  0xf2   : > { %v344_v32 = vand.u32 4294901760, %v4044_v31 }
  0xf4   : > { %v239_v33 = vpop.trf.xlu0  ;;  %v345_v34 = vsub.f32 %v4044_v31, %v344_v32 }
  0xf5   : > { %v266_v35 = vsel %vm252_vm0, %v239_v33, 0 }
  0xf6   : > { %v4052_v36 = vand.u32 4294901760, %v266_v35  ;;  %v346_v37 = vand.u32 4294901760, %v345_v34 }
  0xf8   : > { %v4055_v38 = vsub.f32 %v266_v35, %v4052_v36  ;;  %347 = vmatmul.f32.gmra.mxu0 %v346_v37  ;;  %485 = vmatmul.f32.gmra.mxu1 %v4052_v36 }
  0xfa   : > { %v352_v39 = vand.u32 4294901760, %v4055_v38 }
  0xfc   : > { %v240_v40 = vpop.trf.xlu0  ;;  %v353_v41 = vsub.f32 %v4055_v38, %v352_v39 }
  0xfd   : > { %v269_v42 = vsel %vm252_vm0, %v240_v40, 0 }
  0xfe   : > { %v4063_v43 = vand.u32 4294901760, %v269_v42  ;;  %v354_v44 = vand.u32 4294901760, %v353_v41 }
 0x100   : > { %v4066_v45 = vsub.f32 %v269_v42, %v4063_v43  ;;  %355 = vmatmul.f32.gmra.mxu0 %v354_v44  ;;  %489 = vmatmul.f32.gmra.mxu1 %v4063_v43 }
 0x102   : > { %v360_v46 = vand.u32 4294901760, %v4066_v45 }
 0x104   : > { %v241_v47 = vpop.trf.xlu0  ;;  %v361_v48 = vsub.f32 %v4066_v45, %v360_v46 }
 0x105   : > { %v272_v49 = vsel %vm252_vm0, %v241_v47, 0 }
 0x106   : > { %v4074_v50 = vand.u32 4294901760, %v272_v49  ;;  %v362_v51 = vand.u32 4294901760, %v361_v48 }
 0x108   : > { %v4077_v52 = vsub.f32 %v272_v49, %v4074_v50  ;;  %363 = vmatmul.f32.gmra.mxu0 %v362_v51  ;;  %493 = vmatmul.f32.gmra.mxu1 %v4074_v50 }
 0x10a   : > { %v368_v53 = vand.u32 4294901760, %v4077_v52 }
 0x10c   : > { %v242_v54 = vpop.trf.xlu0  ;;  %v369_v55 = vsub.f32 %v4077_v52, %v368_v53 }
 0x10d   : > { %v275_v56 = vsel %vm252_vm0, %v242_v54, 0 }
 0x10e   : > { %v4085_v57 = vand.u32 4294901760, %v275_v56  ;;  %v370_v58 = vand.u32 4294901760, %v369_v55 }
 0x110   : > { %v4088_v59 = vsub.f32 %v275_v56, %v4085_v57  ;;  %371 = vmatmul.f32.gmra.mxu0 %v370_v58  ;;  %497 = vmatmul.f32.gmra.mxu1 %v4085_v57 }
 0x112   : > { %v376_v60 = vand.u32 4294901760, %v4088_v59 }
 0x114   : > { %v243_v61 = vpop.trf.xlu0  ;;  %v377_v62 = vsub.f32 %v4088_v59, %v376_v60 }
 0x115   : > { %v278_v63 = vsel %vm252_vm0, %v243_v61, 0 }
 0x116   : > { %v4096_v0 = vand.u32 4294901760, %v278_v63  ;;  %v378_v1 = vand.u32 4294901760, %v377_v62 }
 0x118   : > { %v4099_v2 = vsub.f32 %v278_v63, %v4096_v0  ;;  %379 = vmatmul.f32.gmra.mxu0 %v378_v1  ;;  %501 = vmatmul.f32.vlgmr.msra.gmra.mxu3 %v4096_v0 }
 0x119   : > { %848 = vmatmul.f32.vlgmr.msrb.gmra.mxu1 %v4008_v9 }
 0x11a   : > { %v384_v3 = vand.u32 4294901760, %v4099_v2 }
 0x11c   : > { %v244_v4 = vpop.trf.xlu0  ;;  %v385_v5 = vsub.f32 %v4099_v2, %v384_v3 }
 0x11d   : > { %v281_v6 = vsel %vm252_vm0, %v244_v4, 0 }
 0x11e   : > { %v4108_v7 = vand.u32 4294901760, %v281_v6  ;;  %v386_v8 = vand.u32 4294901760, %v385_v5 }
 0x120   : > { %v4111_v12 = vsub.f32 %v281_v6, %v4108_v7  ;;  %387 = vmatmul.f32.vlgmr.msra.gmra.mxu2 %v386_v8  ;;  %505 = vmatmul.f32.gmra.mxu3 %v4108_v7 }
 0x121   : > { %766 = vmatmul.f32.vlgmr.msrb.gmra.mxu0 %v4008_v9  ;;  %852 = vmatmul.f32.gmra.mxu1 %v4019_v15 }
 0x122   : > { %v392_v13 = vand.u32 4294901760, %v4111_v12 }
 0x124   : > { %v245_v14 = vpop.trf.xlu0  ;;  %v393_v16 = vsub.f32 %v4111_v12, %v392_v13 }
 0x125   : > { %v284_v19 = vsel %vm252_vm0, %v245_v14, 0 }
 0x126   : > { %v4121_v20 = vand.u32 4294901760, %v284_v19  ;;  %v394_v21 = vand.u32 4294901760, %v393_v16 }
 0x128   : > { %v4124_v23 = vsub.f32 %v284_v19, %v4121_v20  ;;  %395 = vmatmul.f32.gmra.mxu2 %v394_v21  ;;  %509 = vmatmul.f32.gmra.mxu3 %v4121_v20 }
 0x129   : > { %770 = vmatmul.f32.gmra.mxu0 %v4019_v15  ;;  %856 = vmatmul.f32.gmra.mxu1 %v4030_v22 }
 0x12a   : > { %v400_v9 = vand.u32 4294901760, %v4124_v23 }
 0x12c   : > { %v246_v26 = vpop.trf.xlu0  ;;  %v401_v27 = vsub.f32 %v4124_v23, %v400_v9 }
 0x12d   : > { %v287_v28 = vsel %vm252_vm0, %v246_v26, 0 }
 0x12e   : > { %v4134_v30 = vand.u32 4294901760, %v287_v28  ;;  %v402_v33 = vand.u32 4294901760, %v401_v27 }
 0x130   : > { %v4137_v34 = vsub.f32 %v287_v28, %v4134_v30  ;;  %403 = vmatmul.f32.gmra.mxu2 %v402_v33  ;;  %513 = vmatmul.f32.gmra.mxu3 %v4134_v30 }
 0x131   : > { %774 = vmatmul.f32.gmra.mxu0 %v4030_v22  ;;  %860 = vmatmul.f32.gmra.mxu1 %v4041_v29 }
 0x132   : > { %v408_v15 = vand.u32 4294901760, %v4137_v34 }
 0x134   : > { %v247_v35 = vpop.trf.xlu0  ;;  %v409_v37 = vsub.f32 %v4137_v34, %v408_v15 }
 0x135   : > { %v290_v40 = vsel %vm252_vm0, %v247_v35, 0 }
 0x136   : > { %v4147_v41 = vand.u32 4294901760, %v290_v40  ;;  %v410_v42 = vand.u32 4294901760, %v409_v37 }
 0x138   : > { %v4150_v44 = vsub.f32 %v290_v40, %v4147_v41  ;;  %411 = vmatmul.f32.gmra.mxu2 %v410_v42  ;;  %517 = vmatmul.f32.gmra.mxu3 %v4147_v41 }
 0x139   : > { %778 = vmatmul.f32.gmra.mxu0 %v4041_v29  ;;  %864 = vmatmul.f32.gmra.mxu1 %v4052_v36 }
 0x13a   : > { %v416_v22 = vand.u32 4294901760, %v4150_v44 }
 0x13c   : > { %v248_v47 = vpop.trf.xlu0  ;;  %v417_v48 = vsub.f32 %v4150_v44, %v416_v22 }
 0x13d   : > { %v293_v49 = vsel %vm252_vm0, %v248_v47, 0 }
 0x13e   : > { %v4160_v51 = vand.u32 4294901760, %v293_v49  ;;  %v418_v54 = vand.u32 4294901760, %v417_v48 }
 0x140   : > { %v4163_v55 = vsub.f32 %v293_v49, %v4160_v51  ;;  %419 = vmatmul.f32.gmra.mxu2 %v418_v54  ;;  %521 = vmatmul.f32.gmra.mxu3 %v4160_v51 }
 0x141   : > { %782 = vmatmul.f32.gmra.mxu0 %v4052_v36  ;;  %868 = vmatmul.f32.gmra.mxu1 %v4063_v43 }
 0x142   : > { %v424_v29 = vand.u32 4294901760, %v4163_v55 }
 0x144   : > { %v249_v56 = vpop.trf.xlu0  ;;  %v425_v58 = vsub.f32 %v4163_v55, %v424_v29 }
 0x145   : > { %v296_v61 = vsel %vm252_vm0, %v249_v56, 0 }
 0x146   : > { %v4173_v62 = vand.u32 4294901760, %v296_v61  ;;  %v426_v63 = vand.u32 4294901760, %v425_v58 }
 0x148   : > { %v4176_v1 = vsub.f32 %v296_v61, %v4173_v62  ;;  %427 = vmatmul.f32.gmra.mxu2 %v426_v63  ;;  %525 = vmatmul.f32.gmra.mxu3 %v4173_v62 }
 0x149   : > { %786 = vmatmul.f32.gmra.mxu0 %v4063_v43  ;;  %872 = vmatmul.f32.gmra.mxu1 %v4074_v50 }
 0x14a   : > { %v432_v36 = vand.u32 4294901760, %v4176_v1 }
 0x14c   : > { %v250_v4 = vpop.trf.xlu0  ;;  %v433_v5 = vsub.f32 %v4176_v1, %v432_v36 }
 0x14d   : > { %v299_v6 = vsel %vm252_vm0, %v250_v4, 0  ;;  %v4299_v4 = vld [vmem:[#allocation7] ss:$0 sm:$0xff] }
 0x14e   : > { %v4186_v8 = vand.u32 4294901760, %v299_v6  ;;  %v434_v14 = vand.u32 4294901760, %v433_v5 }
 0x150   : > { %v4189_v16 = vsub.f32 %v299_v6, %v4186_v8  ;;  %435 = vmatmul.f32.gmra.mxu2 %v434_v14  ;;  %529 = vmatmul.f32.gmra.mxu3 %v4186_v8  ;;  %v4301_v6 = vld [vmem:[#allocation7 + $0x1] ss:$0 sm:$0xff] }
 0x151   : > { %790 = vmatmul.f32.gmra.mxu0 %v4074_v50  ;;  %876 = vmatmul.f32.gmra.mxu1 %v4085_v57 }
 0x152   : > { %v440_v43 = vand.u32 4294901760, %v4189_v16 }
 0x154   : > { %v441_v19 = vsub.f32 %v4189_v16, %v440_v43 }
 0x155   : > { %v4198_v21 = vpop.f32.mrf.mxu1 }
 0x156   : > { %v442_v26 = vand.u32 4294901760, %v441_v19 }
 0x158   : > { %443 = vmatmul.f32.gmra.mxu2 %v442_v26  ;;  %652 = vmatmul.f32.vlgmr.msrb.gmra.mxu3 %v320_v11 }
 0x159   : > { %794 = vmatmul.f32.gmra.mxu0 %v4085_v57  ;;  %880 = vmatmul.f32.gmra.mxu1 %v4096_v0 }
 0x15d   : > { %v4204_v50 = vpop.f32.mrf.mxu0  ;;  %v474_v27 = vpop.f32.mrf.mxu1 }
 0x160   : > { %553 = vmatmul.f32.vlgmr.msrb.gmra.mxu2 %v4011_v10  ;;  %658 = vmatmul.f32.gmra.mxu3 %v328_v18 }
 0x161   : > { %798 = vmatmul.f32.gmra.mxu0 %v4096_v0  ;;  %884 = vmatmul.f32.gmra.mxu1 %v4108_v7 }
 0x165   : > { %v332_v28 = vpop.f32.mrf.mxu0  ;;  %v478_v33 = vpop.f32.mrf.mxu1 }
 0x166   : > { %v4211_v35 = vadd.f32 %v474_v27, %v332_v28 }
 0x168   : > { %558 = vmatmul.f32.gmra.mxu2 %v4022_v17  ;;  %664 = vmatmul.f32.gmra.mxu3 %v336_v25 }
 0x169   : > { %802 = vmatmul.f32.gmra.mxu0 %v4108_v7  ;;  %888 = vmatmul.f32.gmra.mxu1 %v4121_v20 }
 0x16d   : > { %v340_v10 = vpop.f32.mrf.mxu0  ;;  %v482_v11 = vpop.f32.mrf.mxu1 }
 0x16e   : > { %v4218_v18 = vadd.f32 %v478_v33, %v340_v10 }
 0x170   : > { %563 = vmatmul.f32.gmra.mxu2 %v4033_v24  ;;  %670 = vmatmul.f32.gmra.mxu3 %v344_v32 }
 0x171   : > { %806 = vmatmul.f32.gmra.mxu0 %v4121_v20  ;;  %892 = vmatmul.f32.gmra.mxu1 %v4134_v30 }
 0x175   : > { %v348_v17 = vpop.f32.mrf.mxu0  ;;  %v486_v25 = vpop.f32.mrf.mxu1 }
 0x176   : > { %v4225_v57 = vadd.f32 %v482_v11, %v348_v17 }
 0x178   : > { %568 = vmatmul.f32.gmra.mxu2 %v4044_v31  ;;  %676 = vmatmul.f32.gmra.mxu3 %v352_v39 }
 0x179   : > { %810 = vmatmul.f32.gmra.mxu0 %v4134_v30  ;;  %896 = vmatmul.f32.gmra.mxu1 %v4147_v41 }
 0x17d   : > { %v356_v24 = vpop.f32.mrf.mxu0  ;;  %v490_v32 = vpop.f32.mrf.mxu1 }
 0x17e   : > { %v4232_v0 = vadd.f32 %v486_v25, %v356_v24 }
 0x180   : > { %573 = vmatmul.f32.gmra.mxu2 %v4055_v38  ;;  %682 = vmatmul.f32.gmra.mxu3 %v360_v46 }
 0x181   : > { %814 = vmatmul.f32.gmra.mxu0 %v4147_v41  ;;  %900 = vmatmul.f32.gmra.mxu1 %v4160_v51 }
 0x185   : > { %v364_v31 = vpop.f32.mrf.mxu0  ;;  %v494_v38 = vpop.f32.mrf.mxu1 }
 0x186   : > { %v4239_v7 = vadd.f32 %v490_v32, %v364_v31 }
 0x188   : > { %578 = vmatmul.f32.gmra.mxu2 %v4066_v45  ;;  %688 = vmatmul.f32.gmra.mxu3 %v368_v53 }
 0x189   : > { %818 = vmatmul.f32.gmra.mxu0 %v4160_v51  ;;  %904 = vmatmul.f32.gmra.mxu1 %v4173_v62 }
 0x18d   : > { %v372_v39 = vpop.f32.mrf.mxu0  ;;  %v498_v45 = vpop.f32.mrf.mxu1 }
 0x18e   : > { %v4246_v46 = vadd.f32 %v494_v38, %v372_v39 }
 0x190   : > { %583 = vmatmul.f32.gmra.mxu2 %v4077_v52  ;;  %694 = vmatmul.f32.gmra.mxu3 %v376_v60 }
 0x191   : > { %822 = vmatmul.f32.gmra.mxu0 %v4173_v62  ;;  %908 = vmatmul.f32.gmra.mxu1 %v4186_v8 }
 0x195   : > { %v380_v20 = vpop.f32.mrf.mxu0 }
 0x196   : > { %v4253_v53 = vadd.f32 %v498_v45, %v380_v20 }
 0x198   : > { %588 = vmatmul.f32.gmra.mxu2 %v4088_v59  ;;  %700 = vmatmul.f32.gmra.mxu3 %v384_v3 }
 0x199   : > { %826 = vmatmul.f32.gmra.mxu0 %v4186_v8 }
 0x19b   : > { %v502_v30 = vpop.f32.mrf.mxu3 }
 0x19e   : > { %v767_v62 = vpop.f32.mrf.mxu0 }
 0x1a0   : > { %593 = vmatmul.f32.gmra.mxu2 %v4099_v2  ;;  %706 = vmatmul.f32.gmra.mxu3 %v392_v13 }
 0x1a3   : > { %v388_v52 = vpop.f32.mrf.mxu2  ;;  %v506_v60 = vpop.f32.mrf.mxu3 }
 0x1a4   : > { %v4262_v37 = vadd.f32 %v502_v30, %v388_v52 }
 0x1a6   : > { %v771_v26 = vpop.f32.mrf.mxu0 }
 0x1a8   : > { %598 = vmatmul.f32.gmra.mxu2 %v4111_v12  ;;  %712 = vmatmul.f32.gmra.mxu3 %v400_v9 }
 0x1ab   : > { %v396_v59 = vpop.f32.mrf.mxu2  ;;  %v510_v40 = vpop.f32.mrf.mxu3 }
 0x1ac   : > { %v4267_v3 = vadd.f32 %v506_v60, %v396_v59 }
 0x1b0   : > { %603 = vmatmul.f32.gmra.mxu2 %v4124_v23  ;;  %718 = vmatmul.f32.gmra.mxu3 %v408_v15 }
 0x1b3   : > { %v404_v2 = vpop.f32.mrf.mxu2  ;;  %v514_v13 = vpop.f32.mrf.mxu3 }
 0x1b4   : > { %v4272_v41 = vadd.f32 %v510_v40, %v404_v2  ;;  %v775_v2 = vpop.f32.mrf.mxu0 }
 0x1b8   : > { %608 = vmatmul.f32.gmra.mxu2 %v4137_v34  ;;  %724 = vmatmul.f32.gmra.mxu3 %v416_v22 }
 0x1bb   : > { %v412_v12 = vpop.f32.mrf.mxu2  ;;  %v518_v9 = vpop.f32.mrf.mxu3 }
 0x1bc   : > { %v4277_v42 = vadd.f32 %v514_v13, %v412_v12 }
 0x1c0   : > { %613 = vmatmul.f32.gmra.mxu2 %v4150_v44  ;;  %730 = vmatmul.f32.gmra.mxu3 %v424_v29  ;;  %v471_v29 = vadd.f32 %v4198_v21, %v4204_v50 }
 0x1c3   : > { %v420_v23 = vpop.f32.mrf.mxu2  ;;  %v522_v47 = vpop.f32.mrf.mxu3 }
 0x1c4   : > { %v4282_v15 = vadd.f32 %v518_v9, %v420_v23 }
 0x1c8   : > { %618 = vmatmul.f32.gmra.mxu2 %v4163_v55  ;;  %736 = vmatmul.f32.gmra.mxu3 %v432_v36 }
 0x1cb   : > { %v428_v34 = vpop.f32.mrf.mxu2  ;;  %v526_v48 = vpop.f32.mrf.mxu3 }
 0x1cc   : > { %v4287_v22 = vadd.f32 %v522_v47, %v428_v34  ;;  %v3870_v34 = vmov 683565275  }
 0x1d0   : > { %623 = vmatmul.f32.gmra.mxu2 %v4176_v1  ;;  %742 = vmatmul.f32.gmra.mxu3 %v440_v43  ;;  %v849_v1 = vpop.f32.mrf.mxu1 }
 0x1d3   : > { %v436_v44 = vpop.f32.mrf.mxu2  ;;  %v530_v51 = vpop.f32.mrf.mxu3 }
 0x1d4   : > { %v4292_v49 = vadd.f32 %v526_v48, %v436_v44  ;;  %v3871_v44 = vmov 2475754826  }
 0x1d8   : > { %628 = vmatmul.f32.gmra.mxu2 %v4189_v16  ;;  %v853_v33 = vpop.f32.mrf.mxu1 }
 0x1db   : > { %v444_v54 = vpop.f32.mrf.mxu2  ;;  %v653_v56 = vpop.f32.mrf.mxu3 }
 0x1dc   : > { %v4295_v55 = vadd.f32 %v530_v51, %v444_v54 }
 0x1e3   : > { %v554_v58 = vpop.f32.mrf.mxu2  ;;  %v659_v43 = vpop.f32.mrf.mxu3 }
 0x1e4   : > { %v555_v61 = vadd.f32 %v554_v58, %v471_v29 }
 0x1e6   : > { %v654_v63 = vadd.f32 %v653_v56, %v555_v61  ;;  %v3872_v56 = vmov 2131351028  }
 0x1e8   : > { %v768_v36 = vadd.f32 %v767_v62, %v654_v63  ;;  %v3873_v62 = vmov 2102212464  }
 0x1ea   : > { %v850_v5 = vadd.f32 %v849_v1, %v768_v36  ;;  %v3874_v36 = vmov 920167782  }
 0x1eb   : > { %v559_v8 = vpop.f32.mrf.mxu2  ;;  %v665_v20 = vpop.f32.mrf.mxu3 }
 0x1ec   : > { %v915_v14 = vmul.f32 %v4299_v4, %v850_v5  ;;  %v560_v16 = vadd.f32 %v559_v8, %v4211_v35 }
 0x1ee   : > { %v4306_v19 = vadd.f32 %v4301_v6, %v915_v14  ;;  %v660_v21 = vadd.f32 %v659_v43, %v560_v16  ;;  %v6001_v14 = vmov 1326507024  }
 0x1f0   : > { %v948_v50 = vand.u32 2147483647, %v4306_v19  ;;  %v951_v27 = vand.u32 2139095040, %v4306_v19  ;;  %v772_v28 = vadd.f32 %v771_v26, %v660_v21 }
 0x1f2   : > { %v952_v10 = vshrl.u32 %v951_v27, 23  ;;  %v955_v11 = vand.u32 8388607, %v948_v50  ;;  %v854_v17 = vadd.f32 %v853_v33, %v772_v28 }
 0x1f3   : > { %v564_v25 = vpop.f32.mrf.mxu2 }
 0x1f4   : > { %v3564_v24 = vadd.s32 4294967169, %v952_v10  ;;  %v956_v35 = vor.u32 8388608, %v955_v11  ;;  %v565_v32 = vadd.f32 %v564_v25, %v4218_v18  ;;  %v916_v31 = vmul.f32 %v4299_v4, %v854_v17 }
 0x1f6   : > { %v958_v38 = vadd.s32 1, %v3564_v24  ;;  %v4314_v39 = vshll.u32 %v956_v35, 8  ;;  %v4317_v45 = vadd.f32 %v4301_v6, %v916_v31  ;;  %v666_v30 = vadd.f32 %v665_v20, %v565_v32 }
 0x1f8   : > { %vm959_vm1 = vcmp.gt.s32.totalorder %v958_v38, 0  ;;  %v1103_v60 = vand.u32 2147483647, %v4317_v45  ;;  %v1106_v59 = vand.u32 2139095040, %v4317_v45  ;;  %v4322_v18 = vand.u32 65535, %v4314_v39 }
 0x1f9   : > { %v960_v52 = vsel %vm959_vm1, %v958_v38, 0  ;;  %v4325_v12 = vshrl.u32 %v4314_v39, 16  ;;  %v776_v23 = vadd.f32 %v775_v2, %v666_v30 }
 0x1fa   : > { %v962_v40 = vand.u32 31, %v960_v52  ;;  %v1107_v9 = vshrl.u32 %v1106_v59, 23  ;;  %v961_v47 = vshrl.u32 %v960_v52, 5  ;;  %v4331_v54 = vand.u32 8388607, %v1103_v60 }
 0x1fc   : > { %v963_v13 = vsub.s32 32, %v962_v40  ;;  %v965_v48 = vshll.u32 %v3870_v34, %v962_v40  ;;  %v968_v51 = vshll.u32 %v3871_v44, %v962_v40  ;;  %v971_v61 = vshll.u32 %v3872_v56, %v962_v40 }
 0x1fd   : > { %v974_v1 = vshll.u32 %v3873_v62, %v962_v40  ;;  %v977_v8 = vshll.u32 %v3874_v36, %v962_v40  ;;  %v3567_v27 = vadd.s32 4294967169, %v1107_v9  ;;  %vm980_vm2 = vcmp.lt.s32.totalorder %v961_v47, 1  ;;  %v857_v40 = vpop.f32.mrf.mxu1 }
 0x1fe   : > { %v966_v29 = vshrl.u32 %v3871_v44, %v963_v13  ;;  %v969_v58 = vshrl.u32 %v3872_v56, %v963_v13  ;;  %v972_v63 = vshrl.u32 %v3873_v62, %v963_v13  ;;  %v975_v5 = vshrl.u32 %v3874_v36, %v963_v13 }
 0x1ff   : > { %v978_v16 = vshrl.u32 %v6001_v14, %v963_v13  ;;  %vm983_vm3 = vcmp.lt.s32.totalorder %v961_v47, 4  ;;  %v964_v10 = vshrl.u32 %v3870_v34, %v963_v13  ;;  %vm982_vm4 = vcmp.lt.s32.totalorder %v961_v47, 3 }
 0x200   : > { %v967_v43 = vor.u32 %v966_v29, %v965_v48  ;;  %v970_v21 = vor.u32 %v969_v58, %v968_v51  ;;  %v973_v26 = vor.u32 %v972_v63, %v971_v61  ;;  %v976_v28 = vor.u32 %v975_v5, %v974_v1 }
 0x201   : > { %v979_v33 = vor.u32 %v978_v16, %v977_v8  ;;  %v1113_v32 = vadd.s32 1, %v3567_v27  ;;  %vm981_vm5 = vcmp.lt.s32.totalorder %v961_v47, 2  ;;  %v1111_v51 = vor.u32 8388608, %v4331_v54 }
 0x202   : > { %v985_v11 = vsel %vm983_vm3, %v973_v26, 2102212464  ;;  %v988_v17 = vsel %vm980_vm2, %v967_v43, %v970_v21  ;;  %v992_v25 = vsel %vm980_vm2, %v970_v21, %v973_v26  ;;  %v989_v24 = vsel %vm983_vm3, %v976_v28, 920167782 }
 0x203   : > { %v993_v35 = vsel %vm983_vm3, %v979_v33, 1326507024  ;;  %v984_v31 = vsel %vm980_vm2, %v964_v10, %v967_v43  ;;  %v990_v38 = vsel %vm982_vm4, %v973_v26, %v989_v24  ;;  %v986_v30 = vsel %vm982_vm4, %v970_v21, %v985_v11 }
 0x204   : > { %v994_v20 = vsel %vm982_vm4, %v976_v28, %v993_v35  ;;  %v991_v52 = vsel %vm981_vm5, %v988_v17, %v990_v38  ;;  %vm1114_vm6 = vcmp.gt.s32.totalorder %v1113_v32, 0  ;;  %v858_v29 = vadd.f32 %v857_v40, %v776_v23 }
 0x205   : > { %v995_v59 = vsel %vm981_vm5, %v992_v25, %v994_v20  ;;  %v1021_v48 = vand.u32 65535, %v991_v52  ;;  %v1022_v13 = vshrl.u32 %v991_v52, 16  ;;  %v4343_v58 = vsel %vm981_vm5, %v984_v31, %v986_v30 }
 0x206   : > { %v999_v2 = vand.u32 65535, %v995_v59  ;;  %v1000_v9 = vshrl.u32 %v995_v59, 16  ;;  %v1115_v63 = vsel %vm1114_vm6, %v1113_v32, 0  ;;  %v3876_v25 = vmov 0  }
 0x207   : > { %v1024_v8 = vmul.u32 %v1022_v13, %v4322_v18  ;;  %v1025_v16 = vmul.u32 %v1021_v48, %v4325_v12  ;;  %v1023_v54 = vmul.u32 %v1021_v48, %v4322_v18  ;;  %v1026_v23 = vmul.u32 %v1022_v13, %v4325_v12 }
 0x208   : > { %v1002_v61 = vmul.u32 %v1000_v9, %v4322_v18  ;;  %v1003_v47 = vmul.u32 %v999_v2, %v4325_v12  ;;  %v1001_v1 = vmul.u32 %v999_v2, %v4322_v18  ;;  %v1004_v5 = vmul.u32 %v1000_v9, %v4325_v12 }
 0x209   : > { %v1027_v28 = vshll.u32 %v1024_v8, 16  ;;  %v1028_v33 = vshrl.u32 %v1024_v8, 16  ;;  %v1029_v11 = vshll.u32 %v1025_v16, 16  ;;  %v1117_v17 = vand.u32 31, %v1115_v63 }
 0x20a   : > { %v1005_v43 = vshll.u32 %v1002_v61, 16  ;;  %v1006_v21 = vshrl.u32 %v1002_v61, 16  ;;  %v1007_v26 = vshll.u32 %v1003_v47, 16  ;;  %v1008_v27 = vshrl.u32 %v1003_v47, 16 }
 0x20b   : > { %v1030_v35 = vshrl.u32 %v1025_v16, 16  ;;  %vm1031_vm8 = vc.u32 %v1023_v54, %v1027_v28  ;;  %v1033_v32 = vadd.s32 %v1027_v28, %v1023_v54  ;;  %v4355_v38 = vsub.s32 32, %v1117_v17 }
 0x20c   : > { %vm1009_vm7 = vc.u32 %v1001_v1, %v1005_v43  ;;  %v1011_v10 = vadd.s32 %v1005_v43, %v1001_v1  ;;  %v1032_v18 = vsel %vm1031_vm8, 1, %v3876_v25  ;;  %v4358_v30 = vshrl.u32 %v1115_v63, 5 }
 0x20d   : > { %v1010_v24 = vsel %vm1009_vm7, 1, %v3876_v25  ;;  %v1034_v20 = vadd.s32 %v1032_v18, %v1026_v23  ;;  %vm1035_vm10 = vc.u32 %v1033_v32, %v1029_v11  ;;  %v4361_v40 = vadd.s32 %v1033_v32, %v1029_v11 }
 0x20e   : > { %v1012_v31 = vadd.s32 %v1010_v24, %v1004_v5  ;;  %vm1013_vm9 = vc.u32 %v1011_v10, %v1007_v26  ;;  %v1036_v59 = vsel %vm1035_vm10, 1, %v3876_v25  ;;  %v1120_v2 = vshll.u32 %v3870_v34, %v1117_v17 }
 0x20f   : > { %v1014_v12 = vsel %vm1013_vm9, 1, %v3876_v25  ;;  %v1038_v9 = vadd.s32 %v1036_v59, %v1034_v20  ;;  %v1121_v48 = vshrl.u32 %v3871_v44, %v4355_v38  ;;  %v1123_v13 = vshll.u32 %v3871_v44, %v1117_v17 }
 0x210   : > { %v1016_v52 = vadd.s32 %v1014_v12, %v1012_v31  ;;  %v1124_v61 = vshrl.u32 %v3872_v56, %v4355_v38  ;;  %v1126_v63 = vshll.u32 %v3872_v56, %v1117_v17  ;;  %v1127_v1 = vshrl.u32 %v3873_v62, %v4355_v38 }
 0x211   : > { %v1129_v5 = vshll.u32 %v3873_v62, %v1117_v17  ;;  %v1039_v8 = vadd.s32 %v1038_v9, %v1028_v33  ;;  %v4373_v16 = vor.u32 %v1121_v48, %v1120_v2  ;;  %v1130_v54 = vshrl.u32 %v3874_v36, %v4355_v38 }
 0x212   : > { %v1017_v47 = vadd.s32 %v1016_v52, %v1006_v21  ;;  %v4375_v43 = vor.u32 %v1124_v61, %v1123_v13  ;;  %v1128_v26 = vor.u32 %v1127_v1, %v1126_v63  ;;  %v1132_v21 = vshll.u32 %v3874_v36, %v1117_v17 }
 0x213   : > { %v1133_v28 = vshrl.u32 %v6001_v14, %v4355_v38  ;;  %v1040_v10 = vadd.s32 %v1039_v8, %v1030_v35  ;;  %v1131_v11 = vor.u32 %v1130_v54, %v1129_v5  ;;  %v917_v24 = vmul.f32 %v4299_v4, %v858_v29 }
 0x214   : > { %v4379_v23 = vadd.s32 %v1017_v47, %v1008_v27  ;;  %vm1135_vm12 = vcmp.lt.s32.totalorder %v4358_v30, 1  ;;  %v4388_v32 = vshll.u32 %v1111_v51, 8  ;;  %v1041_v27 = vmul.u32 %v4314_v39, %v4343_v58 }
 0x215   : > { %v1134_v33 = vor.u32 %v1133_v28, %v1132_v21  ;;  %v1044_v31 = vadd.s32 1, %v1040_v10  ;;  %vm1138_vm13 = vcmp.lt.s32.totalorder %v4358_v30, 4  ;;  %v1143_v17 = vsel %vm1135_vm12, %v4373_v16, %v4375_v43 }
 0x216   : > { %vm1043_vm11 = vc.u32 %v4379_v23, %v4361_v40  ;;  %vm1137_vm14 = vcmp.lt.s32.totalorder %v4358_v30, 3  ;;  %v1144_v29 = vsel %vm1138_vm13, %v1131_v11, 920167782  ;;  %v1147_v51 = vsel %vm1135_vm12, %v4375_v43, %v1128_v26 }
 0x217   : > { %v1148_v39 = vsel %vm1138_vm13, %v1134_v33, 1326507024  ;;  %v1045_v58 = vsel %vm1043_vm11, %v1044_v31, %v1040_v10  ;;  %vm1136_vm15 = vcmp.lt.s32.totalorder %v4358_v30, 2  ;;  %v1145_v35 = vsel %vm1137_vm14, %v1128_v26, %v1144_v29 }
 0x218   : > { %v1149_v18 = vsel %vm1137_vm14, %v1131_v11, %v1148_v39  ;;  %v1046_v12 = vadd.s32 %v1045_v58, %v1041_v27  ;;  %v1146_v20 = vsel %vm1136_vm15, %v1143_v17, %v1145_v35  ;;  %v1152_v59 = vand.u32 65535, %v4388_v32 }
 0x219   : > { %v1150_v52 = vsel %vm1136_vm15, %v1147_v51, %v1149_v18  ;;  %v1153_v2 = vshrl.u32 %v4388_v32, 16  ;;  %v1177_v13 = vshrl.u32 %v1146_v20, 16  ;;  %v1176_v47 = vand.u32 65535, %v1146_v20 }
 0x21a   : > { %v1154_v9 = vand.u32 65535, %v1150_v52  ;;  %v1155_v48 = vshrl.u32 %v1150_v52, 16  ;;  %v1047_v61 = vadd.s32 536870912, %v1046_v12  ;;  %v4417_v28 = vadd.f32 %v4301_v6, %v917_v24 }
 0x21b   : > { %v1179_v8 = vmul.u32 %v1177_v13, %v1152_v59  ;;  %v1180_v33 = vmul.u32 %v1176_v47, %v1153_v2  ;;  %v1178_v29 = vmul.u32 %v1176_v47, %v1152_v59  ;;  %v1140_v39 = vsel %vm1138_vm13, %v1128_v26, 2102212464 }
 0x21c   : > { %v1157_v63 = vmul.u32 %v1155_v48, %v1152_v59  ;;  %v1158_v1 = vmul.u32 %v1154_v9, %v1153_v2  ;;  %v1048_v5 = vshrl.u32 %v1047_v61, 30  ;;  %v1156_v54 = vmul.u32 %v1154_v9, %v1152_v59 }
 0x21d   : > { %v1159_v11 = vmul.u32 %v1155_v48, %v1153_v2  ;;  %v1182_v27 = vshll.u32 %v1179_v8, 16  ;;  %v1181_v20 = vmul.u32 %v1177_v13, %v1153_v2  ;;  %v1184_v9 = vshll.u32 %v1180_v33, 16 }
 0x21e   : > { %v1160_v21 = vshll.u32 %v1157_v63, 16  ;;  %v1049_v10 = vshll.u32 %v1048_v5, 30  ;;  %v1162_v31 = vshll.u32 %v1158_v1, 16  ;;  %v1161_v58 = vshrl.u32 %v1157_v63, 16 }
 0x21f   : > { %vm1186_vm2 = vc.u32 %v1178_v29, %v1182_v27  ;;  %v1188_v59 = vadd.s32 %v1182_v27, %v1178_v29  ;;  %v1072_v26 = vsub.s32 4, %v1048_v5  ;;  %v1119_v63 = vshrl.u32 %v3870_v34, %v4355_v38 }
 0x220   : > { %vm1164_vm0 = vc.u32 %v1156_v54, %v1160_v21  ;;  %v1166_v17 = vadd.s32 %v1160_v21, %v1156_v54  ;;  %v1050_v51 = vsub.s32 %v1046_v12, %v1049_v10  ;;  %v1187_v61 = vsel %vm1186_vm2, 1, %v3876_v25 }
 0x221   : > { %v1165_v35 = vsel %vm1164_vm0, 1, %v3876_v25  ;;  %v1261_v12 = vand.u32 2139095040, %v4417_v28  ;;  %v1189_v54 = vadd.s32 %v1187_v61, %v1181_v20  ;;  %vm950_vm4 = vcmp.lt.s32.totalorder %v4306_v19, 0 }
 0x222   : > { %v1167_v18 = vadd.s32 %v1165_v35, %v1159_v11  ;;  %vm1168_vm1 = vc.u32 %v1166_v17, %v1162_v31  ;;  %vm1051_vm3 = vcmp.lt.s32.totalorder %v1050_v51, 0  ;;  %v1052_v24 = vsub.s32 0, %v1050_v51 }
 0x223   : > { %v1169_v52 = vsel %vm1168_vm1, 1, %v3876_v25  ;;  %vm1190_vm5 = vc.u32 %v1188_v59, %v1184_v9  ;;  %v1139_v21 = vsel %vm1135_vm12, %v1119_v63, %v4373_v16  ;;  %v1141_v10 = vsel %vm1137_vm14, %v4375_v43, %v1140_v39 }
 0x224   : > { %v1171_v48 = vadd.s32 %v1169_v52, %v1167_v18  ;;  %v1053_v47 = vsel %vm1051_vm3, %v1052_v24, %v1050_v51  ;;  %v1163_v11 = vshrl.u32 %v1158_v1, 16  ;;  %v1191_v27 = vsel %vm1190_vm5, 1, %v3876_v25 }
 0x225   : > { %v1054_v2 = vclz %v1053_v47  ;;  %v1183_v17 = vshrl.u32 %v1179_v8, 16  ;;  %v1193_v38 = vadd.s32 %v1191_v27, %v1189_v54  ;;  %v1262_v29 = vshrl.u32 %v1261_v12, 23 }
 0x226   : > { %v1172_v13 = vadd.s32 %v1171_v48, %v1161_v58  ;;  %vm4437_vm6 = vcmp.le.f32.partialorder %v948_v50, 0.7853982  ;;  %v1073_v16 = vsel %vm950_vm4, %v1072_v26, %v1048_v5  ;;  %v1042_v43 = vadd.s32 %v4361_v40, %v4379_v23 }
 0x227   : > { %v3565_v31 = vadd.s32 4294967294, %v1054_v2  ;;  %v1185_v1 = vshrl.u32 %v1180_v33, 16  ;;  %v1194_v39 = vadd.s32 %v1193_v38, %v1183_v17  ;;  %v1142_v18 = vsel %vm1136_vm15, %v1139_v21, %v1141_v10 }
 0x228   : > { %v4443_v35 = vadd.s32 %v1172_v13, %v1163_v11  ;;  %v4449_v20 = vadd.s32 %v1188_v59, %v1184_v9  ;;  %v3570_v50 = vadd.s32 4294967169, %v1262_v29  ;;  %v1075_v5 = vsel %vm4437_vm6, 0, %v1073_v16  ;;  %v569_v59 = vpop.f32.mrf.mxu2 }
 0x229   : > { %vm3566_vm7 = vcmp.lt.s32.totalorder %v3565_v31, 0  ;;  %v1195_v48 = vadd.s32 %v1194_v39, %v1185_v1  ;;  %v6000_v40 = vand.u32 2147483647, %v4417_v28  ;;  %v1092_v47 = vadd.s32 3, %v1075_v5  ;;  %v671_v39 = vpop.f32.mrf.mxu3 }
 0x22a   : > { %v1057_v8 = vsel %vm3566_vm7, 0, %v3565_v31  ;;  %vm1198_vm8 = vc.u32 %v4443_v35, %v4449_v20  ;;  %v1268_v23 = vadd.s32 1, %v3570_v50  ;;  %v1196_v9 = vmul.u32 %v4388_v32, %v1142_v18 }
 0x22b   : > { %v1058_v24 = vsub.s32 32, %v1057_v8  ;;  %v1062_v52 = vsub.s32 4294967266, %v1057_v8  ;;  %v1059_v33 = vshll.u32 %v1050_v51, %v1057_v8  ;;  %v1199_v30 = vadd.s32 1, %v1195_v48 }
 0x22c   : > { %vm1269_vm9 = vcmp.gt.s32.totalorder %v1268_v23, 0  ;;  %v1265_v21 = vand.u32 8388607, %v6000_v40  ;;  %v570_v51 = vadd.f32 %v569_v59, %v4225_v57  ;;  %v4462_v32 = vand.u32 3, %v1092_v47 }
 0x22d   : > { %v1060_v61 = vshrl.u32 %v1042_v43, %v1058_v24  ;;  %v1063_v12 = vadd.s32 127, %v1062_v52  ;;  %v1200_v54 = vsel %vm1198_vm8, %v1199_v30, %v1195_v48  ;;  %v1270_v2 = vsel %vm1269_vm9, %v1268_v23, 0  ;;  %v779_v30 = vpop.f32.mrf.mxu0 }
 0x22e   : > { %v1201_v13 = vadd.s32 %v1200_v54, %v1196_v9  ;;  %v1272_v10 = vand.u32 31, %v1270_v2  ;;  %v1266_v16 = vor.u32 8388608, %v1265_v21  ;;  %v672_v50 = vadd.f32 %v671_v39, %v570_v51 }
 0x22f   : > { %v1061_v26 = vor.u32 %v1060_v61, %v1059_v33  ;;  %v1064_v63 = vshll.u32 %v1063_v12, 23  ;;  %v4478_v33 = vshrl.u32 %v1270_v2, 5  ;;  %vm1105_vm11 = vcmp.lt.s32.totalorder %v4317_v45, 0 }
 0x230   : > { %v1202_v27 = vadd.s32 536870912, %v1201_v13  ;;  %v4460_v31 = vsub.s32 32, %v1272_v10  ;;  %v1275_v57 = vshll.u32 %v3870_v34, %v1272_v10  ;;  %v1278_v52 = vshll.u32 %v3871_v44, %v1272_v10 }
 0x231   : > { %v1065_v11 = vor.u32 4788187, %v1064_v63  ;;  %v1068_v38 = vcvt.s32.f32 %v1061_v26  ;;  %v1284_v48 = vshll.u32 %v3873_v62, %v1272_v10  ;;  %v1281_v61 = vshll.u32 %v3872_v56, %v1272_v10 }
 0x232   : > { %v4464_v29 = vshrl.u32 %v1202_v27, 30  ;;  %v1276_v43 = vshrl.u32 %v3871_v44, %v4460_v31  ;;  %v1279_v1 = vshrl.u32 %v3872_v56, %v4460_v31  ;;  %v1285_v18 = vshrl.u32 %v3874_v36, %v4460_v31 }
 0x233   : > { %v1066_v17 = vand.u32 2147483647, %v1065_v11  ;;  %v1282_v5 = vshrl.u32 %v3873_v62, %v4460_v31  ;;  %v1288_v12 = vshrl.u32 %v6001_v14, %v4460_v31  ;;  %v1287_v54 = vshll.u32 %v3874_v36, %v1272_v10 }
 0x234   : > { %v1204_v24 = vshll.u32 %v4464_v29, 30  ;;  %v4485_v9 = vor.u32 %v1276_v43, %v1275_v57  ;;  %v4487_v59 = vor.u32 %v1279_v1, %v1278_v52  ;;  %v1286_v26 = vor.u32 %v1285_v18, %v1284_v48  ;;  %v861_v43 = vpop.f32.mrf.mxu1 }
 0x235   : > { %v1069_v8 = vmul.f32 %v1068_v38, %v1066_v17  ;;  %v4492_v2 = vshll.u32 %v1266_v16, 8  ;;  %v780_v21 = vadd.f32 %v779_v30, %v672_v50  ;;  %v4501_v51 = vor.u32 %v1282_v5, %v1281_v61 }
 0x236   : > { %v4483_v47 = vsub.s32 %v1201_v13, %v1204_v24  ;;  %v1197_v10 = vadd.s32 %v4449_v20, %v4443_v35  ;;  %vm1290_vm12 = vcmp.lt.s32.totalorder %v4478_v33, 1  ;;  %vm1293_vm13 = vcmp.lt.s32.totalorder %v4478_v33, 4 }
 0x237   : > { %v1070_v23 = vxor.u32 2147483648, %v1069_v8  ;;  %v1289_v17 = vor.u32 %v1288_v12, %v1287_v54  ;;  %v1298_v38 = vsel %vm1290_vm12, %v4485_v9, %v4487_v59  ;;  %v1299_v16 = vsel %vm1293_vm13, %v1286_v26, 920167782 }
 0x238   : > { %vm1206_vm10 = vcmp.lt.s32.totalorder %v4483_v47, 0  ;;  %v1207_v13 = vsub.s32 0, %v4483_v47  ;;  %vm1292_vm14 = vcmp.lt.s32.totalorder %v4478_v33, 3  ;;  %vm1291_vm15 = vcmp.lt.s32.totalorder %v4478_v33, 2 }
 0x239   : > { %v1071_v63 = vsel %vm950_vm4, %v1070_v23, %v1069_v8  ;;  %v1300_v35 = vsel %vm1292_vm14, %v4501_v51, %v1299_v16  ;;  %v1307_v20 = vand.u32 65535, %v4492_v2  ;;  %v862_v57 = vadd.f32 %v861_v43, %v780_v21 }
 0x23a   : > { %v4497_v11 = vsel %vm4437_vm6, %v4306_v19, %v1071_v63  ;;  %v1208_v58 = vsel %vm1206_vm10, %v1207_v13, %v4483_v47  ;;  %v1301_v52 = vsel %vm1291_vm15, %v1298_v38, %v1300_v35  ;;  %v1227_v5 = vsub.s32 4, %v4464_v29 }
 0x23b   : > { %v1076_v27 = vmul.f32 %v4497_v11, %v4497_v11  ;;  %v1209_v8 = vclz %v1208_v58  ;;  %v1302_v48 = vsel %vm1290_vm12, %v4487_v59, %v4501_v51  ;;  %v1303_v23 = vsel %vm1293_vm13, %v1289_v17, 1326507024 }
 0x23c   : > { %v1332_v61 = vshrl.u32 %v1301_v52, 16  ;;  %v1304_v63 = vsel %vm1292_vm14, %v1286_v26, %v1303_v23  ;;  %v1308_v13 = vshrl.u32 %v4492_v2, 16  ;;  %v918_v58 = vmul.f32 %v4299_v4, %v862_v57 }
 0x23d   : > { %v1077_v1 = vmul.f32 -0.001358992, %v1076_v27  ;;  %v1084_v39 = vmul.f32 -0.00019511016, %v1076_v27  ;;  %v3568_v24 = vadd.s32 4294967294, %v1209_v8  ;;  %v1305_v21 = vsel %vm1291_vm15, %v1302_v48, %v1304_v63 }
 0x23e   : > { %vm1095_vm1 = vcmp.eq.s32.totalorder %v4462_v32, 0  ;;  %vm1098_vm2 = vcmp.eq.s32.totalorder %v4462_v32, 2  ;;  %v4543_v26 = vsel %vm1105_vm11, %v1227_v5, %v4464_v29  ;;  %v1310_v8 = vshrl.u32 %v1305_v21, 16 }
 0x23f   : > { %v1078_v18 = vadd.f32 0.041655596, %v1077_v1  ;;  %v1085_v50 = vadd.f32 0.008332121, %v1084_v39  ;;  %vm3569_vm0 = vcmp.lt.s32.totalorder %v3568_v24, 0  ;;  %v1331_v1 = vand.u32 65535, %v1301_v52 }
 0x240   : > { %v1212_v54 = vsel %vm3569_vm0, 0, %v3568_v24  ;;  %v1309_v39 = vand.u32 65535, %v1305_v21  ;;  %vm1094_vm3 = vcmp.lt.s32.totalorder %v4462_v32, 2  ;;  %vm1091_vm4 = vweird.f32 %v4306_v19 }
 0x241   : > { %v1079_v12 = vmul.f32 %v1078_v18, %v1076_v27  ;;  %v1086_v30 = vmul.f32 %v1085_v50, %v1076_v27  ;;  %v1213_v43 = vsub.s32 32, %v1212_v54  ;;  %v1217_v17 = vsub.s32 4294967266, %v1212_v54 }
 0x242   : > { %v4546_v50 = vmul.u32 %v1332_v61, %v1307_v20  ;;  %v1214_v24 = vshll.u32 %v4483_v47, %v1212_v54  ;;  %v1312_v48 = vmul.u32 %v1310_v8, %v1307_v20  ;;  %v1313_v23 = vmul.u32 %v1309_v39, %v1308_v13 }
 0x243   : > { %v1080_v38 = vadd.f32 -0.4999988, %v1079_v12  ;;  %v1087_v16 = vadd.f32 -0.16666654, %v1086_v30  ;;  %v1215_v57 = vshrl.u32 %v1197_v10, %v1213_v43  ;;  %v1218_v52 = vadd.s32 127, %v1217_v17 }
 0x244   : > { %v1333_v5 = vmul.u32 %v1331_v1, %v1307_v20  ;;  %v4550_v30 = vmul.u32 %v1331_v1, %v1308_v13  ;;  %v1311_v21 = vmul.u32 %v1309_v39, %v1307_v20  ;;  %v1314_v43 = vmul.u32 %v1310_v8, %v1308_v13 }
 0x245   : > { %v1081_v35 = vmul.f32 %v1080_v38, %v1076_v27  ;;  %v1088_v18 = vmul.f32 %v1087_v16, %v1076_v27  ;;  %v1216_v63 = vor.u32 %v1215_v57, %v1214_v24  ;;  %v1219_v27 = vshll.u32 %v1218_v52, 23 }
 0x246   : > { %v1315_v38 = vshll.u32 %v1312_v48, 16  ;;  %v1317_v40 = vshll.u32 %v1313_v23, 16  ;;  %v1337_v17 = vshll.u32 %v4546_v50, 16  ;;  %v1336_v14 = vmul.u32 %v1332_v61, %v1308_v13 }
 0x247   : > { %v1082_v12 = vadd.f32 1.0, %v1081_v35  ;;  %v1089_v29 = vadd.f32 1.0, %v1088_v18  ;;  %v1220_v47 = vor.u32 4788187, %v1219_v27  ;;  %v1316_v18 = vshrl.u32 %v1312_v48, 16 }
 0x248   : > { %vm1319_vm5 = vc.u32 %v1311_v21, %v1315_v38  ;;  %v1321_v54 = vadd.s32 %v1315_v38, %v1311_v21  ;;  %v1223_v24 = vcvt.s32.f32 %v1216_v63  ;;  %vm1341_vm7 = vc.u32 %v1333_v5, %v1337_v17 }
 0x249   : > { %v1090_v10 = vmul.f32 %v1089_v29, %v4497_v11  ;;  %v1099_v16 = vxor.u32 2147483648, %v1082_v12  ;;  %v1320_v1 = vsel %vm1319_vm5, 1, %v3876_v25  ;;  %v1221_v57 = vand.u32 2147483647, %v1220_v47 }
 0x24a   : > { %v1322_v20 = vadd.s32 %v1320_v1, %v1314_v43  ;;  %vm1323_vm6 = vc.u32 %v1321_v54, %v1317_v40  ;;  %v1342_v61 = vsel %vm1341_vm7, 1, %v3876_v25  ;;  %v1339_v40 = vshll.u32 %v4550_v30, 16 }
 0x24b   : > { %v1096_v35 = vxor.u32 2147483648, %v1090_v10  ;;  %v1100_v39 = vsel %vm1098_vm2, %v1099_v16, %v1090_v10  ;;  %v1324_v8 = vsel %vm1323_vm6, 1, %v3876_v25  ;;  %v1224_v48 = vmul.f32 %v1223_v24, %v1221_v57  ;;  %v574_v24 = vpop.f32.mrf.mxu2 }
 0x24c   : > { %v1326_v29 = vadd.s32 %v1324_v8, %v1322_v20  ;;  %v1343_v63 = vadd.s32 %v1337_v17, %v1333_v5  ;;  %v4571_v32 = vadd.f32 %v4301_v6, %v918_v58  ;;  %vm4575_vm8 = vcmp.le.f32.partialorder %v1103_v60, 0.7853982 }
 0x24d   : > { %v1097_v11 = vsel %vm1095_vm1, %v1082_v12, %v1096_v35  ;;  %v1344_v12 = vadd.s32 %v1342_v61, %v1336_v14  ;;  %v1225_v27 = vxor.u32 2147483648, %v1224_v48  ;;  %v1274_v19 = vshrl.u32 %v3870_v34, %v4460_v31 }
 0x24e   : > { %v1101_v52 = vsel %vm1094_vm3, %v1097_v11, %v1100_v39  ;;  %v1327_v21 = vadd.s32 %v1326_v29, %v1316_v18  ;;  %v1295_v14 = vsel %vm1293_vm13, %v4501_v51, 2102212464  ;;  %vm1345_vm9 = vc.u32 %v1343_v63, %v1339_v40 }
 0x24f   : > { %v1102_v13 = vsel %vm1091_vm4, nan, %v1101_v52  ;;  %v1226_v5 = vsel %vm1105_vm11, %v1225_v27, %v1224_v48  ;;  %v1230_v6 = vsel %vm4575_vm8, 0, %v4543_v26  ;;  %v1318_v58 = vshrl.u32 %v1313_v23, 16 }
 0x250   : > { %3428 = vst [vmem:[%s4567_s23] sm:$0xff] %v1102_v13  ;;  %v1346_v60 = vsel %vm1345_vm9, 1, %v3876_v25  ;;  %v1229_v10 = vsel %vm4575_vm8, %v4317_v45, %v1226_v5  ;;  %v1338_v31 = vshrl.u32 %v4546_v50, 16  ;;  %v1416_v51 = vand.u32 2139095040, %v4571_v32 }
 0x251   : > { %v1348_v16 = vadd.s32 %v1346_v60, %v1344_v12  ;;  %v1231_v43 = vmul.f32 %v1229_v10, %v1229_v10  ;;  %v1294_v47 = vsel %vm1290_vm12, %v1274_v19, %v4485_v9  ;;  %v1296_v26 = vsel %vm1292_vm14, %v4487_v59, %v1295_v14  ;;  %v677_v19 = vpop.f32.mrf.mxu3 }
 0x252   : > { %v4601_v23 = vadd.s32 %v1327_v21, %v1318_v58  ;;  %v1340_v54 = vshrl.u32 %v4550_v30, 16  ;;  %v1413_v35 = vand.u32 2147483647, %v4571_v32  ;;  %v1417_v50 = vshrl.u32 %v1416_v51, 23 }
 0x253   : > { %v1349_v17 = vadd.s32 %v1348_v16, %v1338_v31  ;;  %v1232_v18 = vmul.f32 -0.001358992, %v1231_v43  ;;  %v1239_v1 = vmul.f32 -0.00019511016, %v1231_v43  ;;  %v4605_v57 = vadd.s32 %v1343_v63, %v1339_v40  ;;  %v783_v16 = vpop.f32.mrf.mxu0 }
 0x254   : > { %v1247_v20 = vadd.s32 3, %v1230_v6  ;;  %v1297_v9 = vsel %vm1291_vm15, %v1294_v47, %v1296_v26  ;;  %v3573_v39 = vadd.s32 4294967169, %v1417_v50  ;;  %v1420_v52 = vand.u32 8388607, %v1413_v35 }
 0x255   : > { %v1350_v11 = vadd.s32 %v1349_v17, %v1340_v54  ;;  %v1233_v59 = vadd.f32 0.041655596, %v1232_v18  ;;  %v1240_v8 = vadd.f32 0.008332121, %v1239_v1  ;;  %vm1353_vm10 = vc.u32 %v4601_v23, %v4605_v57 }
 0x256   : > { %v1423_v48 = vadd.s32 1, %v3573_v39  ;;  %v575_v29 = vadd.f32 %v574_v24, %v4232_v0  ;;  %v1351_v40 = vmul.u32 %v4492_v2, %v1297_v9  ;;  %v1248_v33 = vand.u32 3, %v1247_v20 }
 0x257   : > { %v1354_v30 = vadd.s32 1, %v1350_v11  ;;  %v1234_v61 = vmul.f32 %v1233_v59, %v1231_v43  ;;  %v1241_v13 = vmul.f32 %v1240_v8, %v1231_v43  ;;  %v1421_v14 = vor.u32 8388608, %v1420_v52 }
 0x258   : > { %vm1424_vm11 = vcmp.gt.s32.totalorder %v1423_v48, 0  ;;  %v678_v6 = vadd.f32 %v677_v19, %v575_v29  ;;  %vm1249_vm12 = vcmp.lt.s32.totalorder %v1248_v33, 2  ;;  %vm1250_vm13 = vcmp.eq.s32.totalorder %v1248_v33, 0  ;;  %v865_v19 = vpop.f32.mrf.mxu1 }
 0x259   : > { %v1355_v63 = vsel %vm1353_vm10, %v1354_v30, %v1350_v11  ;;  %v1235_v12 = vadd.f32 -0.4999988, %v1234_v61  ;;  %v1242_v27 = vadd.f32 -0.16666654, %v1241_v13  ;;  %v1425_v38 = vsel %vm1424_vm11, %v1423_v48, 0 }
 0x25a   : > { %v1356_v21 = vadd.s32 %v1355_v63, %v1351_v40  ;;  %v1427_v5 = vand.u32 31, %v1425_v38  ;;  %vm1253_vm14 = vcmp.eq.s32.totalorder %v1248_v33, 2  ;;  %v4623_v17 = vshll.u32 %v1421_v14, 8 }
 0x25b   : > { %v1236_v58 = vmul.f32 %v1235_v12, %v1231_v43  ;;  %v1243_v60 = vmul.f32 %v1242_v27, %v1231_v43  ;;  %v784_v43 = vadd.f32 %v783_v16, %v678_v6  ;;  %v4626_v24 = vshrl.u32 %v1425_v38, 5 }
 0x25c   : > { %v1357_v31 = vadd.s32 536870912, %v1356_v21  ;;  %v4615_v0 = vsub.s32 32, %v1427_v5  ;;  %v1430_v20 = vshll.u32 %v3870_v34, %v1427_v5  ;;  %v1433_v9 = vshll.u32 %v3871_v44, %v1427_v5 }
 0x25d   : > { %v1237_v2 = vadd.f32 1.0, %v1236_v58  ;;  %v1244_v51 = vadd.f32 1.0, %v1243_v60  ;;  %v1439_v30 = vshll.u32 %v3873_v62, %v1427_v5  ;;  %v6012_v61 = vmov 1326507024  }
 0x25e   : > { %v4617_v47 = vshrl.u32 %v1357_v31, 30  ;;  %v1431_v26 = vshrl.u32 %v3871_v44, %v4615_v0  ;;  %v1434_v54 = vshrl.u32 %v3872_v56, %v4615_v0  ;;  %v1437_v11 = vshrl.u32 %v3873_v62, %v4615_v0 }
 0x25f   : > { %v1245_v50 = vmul.f32 %v1244_v51, %v1229_v10  ;;  %v1254_v18 = vxor.u32 2147483648, %v1237_v2  ;;  %v1440_v39 = vshrl.u32 %v3874_v36, %v4615_v0  ;;  %v1436_v10 = vshll.u32 %v3872_v56, %v1427_v5 }
 0x260   : > { %v1359_v1 = vshll.u32 %v4617_v47, 30  ;;  %v1432_v48 = vor.u32 %v1431_v26, %v1430_v20  ;;  %v4639_v29 = vor.u32 %v1434_v54, %v1433_v9  ;;  %v1443_v13 = vshrl.u32 %v6012_v61, %v4615_v0 }
 0x261   : > { %v1251_v59 = vxor.u32 2147483648, %v1245_v50  ;;  %v1255_v52 = vsel %vm1253_vm14, %v1254_v18, %v1245_v50  ;;  %v1442_v12 = vshll.u32 %v3874_v36, %v1427_v5  ;;  %vm1246_vm0 = vweird.f32 %v4317_v45 }
 0x262   : > { %v4634_v8 = vsub.s32 %v1356_v21, %v1359_v1  ;;  %v1438_v21 = vor.u32 %v1437_v11, %v1436_v10  ;;  %v1441_v38 = vor.u32 %v1440_v39, %v1439_v30  ;;  %vm1260_vm1 = vcmp.lt.s32.totalorder %v4417_v28, 0 }
 0x263   : > { %v1252_v40 = vsel %vm1250_vm13, %v1237_v2, %v1251_v59  ;;  %v1444_v58 = vor.u32 %v1443_v13, %v1442_v12  ;;  %v1352_v60 = vadd.s32 %v4605_v57, %v4601_v23  ;;  %vm1445_vm2 = vcmp.lt.s32.totalorder %v4626_v24, 1 }
 0x264   : > { %vm1361_vm15 = vcmp.lt.s32.totalorder %v4634_v8, 0  ;;  %v1362_v63 = vsub.s32 0, %v4634_v8  ;;  %v1256_v27 = vsel %vm1249_vm12, %v1252_v40, %v1255_v52  ;;  %v866_v5 = vadd.f32 %v865_v19, %v784_v43 }
 0x265   : > { %v1257_v14 = vsel %vm1246_vm0, nan, %v1256_v27  ;;  %vm1448_vm3 = vcmp.lt.s32.totalorder %v4626_v24, 4  ;;  %v1453_v45 = vsel %vm1445_vm2, %v1432_v48, %v4639_v29  ;;  %v1462_v33 = vand.u32 65535, %v4623_v17 }
 0x266   : > { %v1363_v6 = vsel %vm1361_vm15, %v1362_v63, %v4634_v8  ;;  %3429 = vst [vmem:[%s4567_s23 + $0x8] sm:$0xff] %v1257_v14  ;;  %v1463_v16 = vshrl.u32 %v4623_v17, 16  ;;  %vm1447_vm4 = vcmp.lt.s32.totalorder %v4626_v24, 3  ;;  %v1454_v23 = vsel %vm1448_vm3, %v1441_v38, 920167782 }
 0x267   : > { %v1364_v31 = vclz %v1363_v6  ;;  %v1457_v57 = vsel %vm1445_vm2, %v4639_v29, %v1438_v21  ;;  %v1382_v51 = vsub.s32 4, %v4617_v47  ;;  %vm1446_vm5 = vcmp.lt.s32.totalorder %v4626_v24, 2 }
 0x268   : > { %v1455_v26 = vsel %vm1447_vm4, %v1438_v21, %v1454_v23  ;;  %v1458_v54 = vsel %vm1448_vm3, %v1444_v58, 1326507024  ;;  %v919_v18 = vmul.f32 %v4299_v4, %v866_v5  ;;  %v1429_v10 = vshrl.u32 %v3870_v34, %v4615_v0  ;;  %v4696_v5 = vld [vmem:[#allocation7 + $0x1] ss:$0 sm:$0xff] }
 0x269   : > { %v3571_v2 = vadd.s32 4294967294, %v1364_v31  ;;  %v1456_v43 = vsel %vm1446_vm5, %v1453_v45, %v1455_v26  ;;  %v1459_v50 = vsel %vm1447_vm4, %v1441_v38, %v1458_v54  ;;  %v1383_v13 = vsel %vm1260_vm1, %v1382_v51, %v4617_v47 }
 0x26a   : > { %v1460_v20 = vsel %vm1446_vm5, %v1457_v57, %v1459_v50  ;;  %v1486_v9 = vand.u32 65535, %v1456_v43  ;;  %v1487_v11 = vshrl.u32 %v1456_v43, 16  ;;  %v6013_v19 = vand.u32 2147483647, %v4417_v28 }
 0x26b   : > { %vm3572_vm6 = vcmp.lt.s32.totalorder %v3571_v2, 0  ;;  %v1464_v30 = vand.u32 65535, %v1460_v20  ;;  %v1465_v40 = vshrl.u32 %v1460_v20, 16  ;;  %v1449_v0 = vsel %vm1445_vm2, %v1429_v10, %v1432_v48 }
 0x26c   : > { %v1367_v1 = vsel %vm3572_vm6, 0, %v3571_v2  ;;  %v1489_v4 = vmul.u32 %v1487_v11, %v1462_v33  ;;  %v1490_v38 = vmul.u32 %v1486_v9, %v1463_v16  ;;  %vm4688_vm7 = vcmp.le.f32.partialorder %v6013_v19, 0.7853982 }
 0x26d   : > { %v1368_v39 = vsub.s32 32, %v1367_v1  ;;  %v1372_v59 = vsub.s32 4294967266, %v1367_v1  ;;  %v1369_v52 = vshll.u32 %v4634_v8, %v1367_v1  ;;  %v1468_v27 = vmul.u32 %v1464_v30, %v1463_v16 }
 0x26e   : > { %v1450_v8 = vsel %vm1448_vm3, %v1438_v21, 2102212464  ;;  %v1467_v6 = vmul.u32 %v1465_v40, %v1462_v33  ;;  %v1492_v47 = vshll.u32 %v1489_v4, 16  ;;  %v4699_v45 = vadd.f32 %v4696_v5, %v919_v18 }
 0x26f   : > { %v1370_v63 = vshrl.u32 %v1352_v60, %v1368_v39  ;;  %v1373_v12 = vadd.s32 127, %v1372_v59  ;;  %v1488_v60 = vmul.u32 %v1486_v9, %v1462_v33  ;;  %v1466_v2 = vmul.u32 %v1464_v30, %v1462_v33 }
 0x270   : > { %v1469_v23 = vmul.u32 %v1465_v40, %v1463_v16  ;;  %v1470_v57 = vshll.u32 %v1467_v6, 16  ;;  %v1491_v51 = vmul.u32 %v1487_v11, %v1463_v16  ;;  %v1472_v54 = vshll.u32 %v1468_v27, 16 }
 0x271   : > { %v1371_v58 = vor.u32 %v1370_v63, %v1369_v52  ;;  %v1374_v31 = vshll.u32 %v1373_v12, 23  ;;  %v1494_v48 = vshll.u32 %v1490_v38, 16  ;;  %vm1496_vm8 = vc.u32 %v1488_v60, %v1492_v47 }
 0x272   : > { %vm1474_vm9 = vc.u32 %v1466_v2, %v1470_v57  ;;  %v1476_v21 = vadd.s32 %v1470_v57, %v1466_v2  ;;  %v1497_v43 = vsel %vm1496_vm8, 1, %v3876_v25  ;;  %v1498_v50 = vadd.s32 %v1492_v47, %v1488_v60 }
 0x273   : > { %v1375_v26 = vor.u32 4788187, %v1374_v31  ;;  %v1378_v20 = vcvt.s32.f32 %v1371_v58  ;;  %v1475_v9 = vsel %vm1474_vm9, 1, %v3876_v25  ;;  %v1499_v39 = vadd.s32 %v1497_v43, %v1491_v51 }
 0x274   : > { %v1451_v33 = vsel %vm1447_vm4, %v4639_v29, %v1450_v8  ;;  %v1477_v18 = vadd.s32 %v1475_v9, %v1469_v23  ;;  %vm1478_vm10 = vc.u32 %v1476_v21, %v1472_v54  ;;  %vm1500_vm11 = vc.u32 %v1498_v50, %v1494_v48 }
 0x275   : > { %v1376_v1 = vand.u32 2147483647, %v1375_v26  ;;  %v1471_v11 = vshrl.u32 %v1467_v6, 16  ;;  %v1479_v59 = vsel %vm1478_vm10, 1, %v3876_v25  ;;  %v1501_v10 = vsel %vm1500_vm11, 1, %v3876_v25  ;;  %v579_v26 = vpop.f32.mrf.mxu2 }
 0x276   : > { %v1481_v30 = vadd.s32 %v1479_v59, %v1477_v18  ;;  %v1493_v52 = vshrl.u32 %v1489_v4, 16  ;;  %v1503_v40 = vadd.s32 %v1501_v10, %v1499_v39  ;;  %v1571_v63 = vand.u32 2139095040, %v4699_v45 }
 0x277   : > { %v1379_v16 = vmul.f32 %v1378_v20, %v1376_v1  ;;  %v1385_v19 = vsel %vm4688_vm7, 0, %v1383_v13  ;;  %v1473_v47 = vshrl.u32 %v1468_v27, 16  ;;  %v1495_v29 = vshrl.u32 %v1490_v38, 16 }
 0x278   : > { %v1482_v8 = vadd.s32 %v1481_v30, %v1471_v11  ;;  %v1504_v58 = vadd.s32 %v1503_v40, %v1493_v52  ;;  %v1568_v31 = vand.u32 2147483647, %v4699_v45  ;;  %v1572_v6 = vshrl.u32 %v1571_v63, 23  ;;  %v683_v52 = vpop.f32.mrf.mxu3 }
 0x279   : > { %v1380_v12 = vxor.u32 2147483648, %v1379_v16  ;;  %v1452_v4 = vsel %vm1446_vm5, %v1449_v0, %v1451_v33  ;;  %v4716_v2 = vadd.s32 %v1498_v50, %v1494_v48  ;;  %v1402_v51 = vadd.s32 3, %v1385_v19 }
 0x27a   : > { %v1483_v13 = vadd.s32 %v1482_v8, %v1473_v47  ;;  %v1505_v27 = vadd.s32 %v1504_v58, %v1495_v29  ;;  %v3576_v38 = vadd.s32 4294967169, %v1572_v6  ;;  %v1575_v21 = vand.u32 8388607, %v1568_v31 }
 0x27b   : > { %v1381_v60 = vsel %vm1260_vm1, %v1380_v12, %v1379_v16  ;;  %v1506_v43 = vmul.u32 %v4623_v17, %v1452_v4  ;;  %v580_v14 = vadd.f32 %v579_v26, %v4239_v7  ;;  %v1403_v33 = vand.u32 3, %v1402_v51 }
 0x27c   : > { %v1384_v23 = vsel %vm4688_vm7, %v4417_v28, %v1381_v60  ;;  %vm1508_vm12 = vc.u32 %v1483_v13, %v4716_v2  ;;  %v1509_v54 = vadd.s32 1, %v1505_v27  ;;  %v1578_v24 = vadd.s32 1, %v3576_v38 }
 0x27d   : > { %v1386_v57 = vmul.f32 %v1384_v23, %v1384_v23  ;;  %v1576_v18 = vor.u32 8388608, %v1575_v21  ;;  %v684_v12 = vadd.f32 %v683_v52, %v580_v14  ;;  %vm1405_vm14 = vcmp.eq.s32.totalorder %v1403_v33, 0 }
 0x27e   : > { %v1510_v50 = vsel %vm1508_vm12, %v1509_v54, %v1505_v27  ;;  %vm1579_vm13 = vcmp.gt.s32.totalorder %v1578_v24, 0  ;;  %vm1404_vm15 = vcmp.lt.s32.totalorder %v1403_v33, 2  ;;  %vm1401_vm0 = vweird.f32 %v4417_v28 }
 0x27f   : > { %v1387_v0 = vmul.f32 -0.001358992, %v1386_v57  ;;  %v1394_v48 = vmul.f32 -0.00019511016, %v1386_v57  ;;  %v1511_v9 = vadd.s32 %v1510_v50, %v1506_v43  ;;  %v1580_v39 = vsel %vm1579_vm13, %v1578_v24, 0  ;;  %v787_v50 = vpop.f32.mrf.mxu0 }
 0x280   : > { %v1582_v16 = vand.u32 31, %v1580_v39  ;;  %v4730_v7 = vshrl.u32 %v1580_v39, 5  ;;  %v4736_v29 = vshll.u32 %v1576_v18, 8  ;;  %vm1408_vm2 = vcmp.eq.s32.totalorder %v1403_v33, 2 }
 0x281   : > { %v1388_v1 = vadd.f32 0.041655596, %v1387_v0  ;;  %v1395_v20 = vadd.f32 0.008332121, %v1394_v48  ;;  %v1512_v10 = vadd.s32 536870912, %v1511_v9  ;;  %v788_v18 = vadd.f32 %v787_v50, %v684_v12 }
 0x282   : > { %v4726_v30 = vsub.s32 32, %v1582_v16  ;;  %v1585_v60 = vshll.u32 %v3870_v34, %v1582_v16  ;;  %v1588_v4 = vshll.u32 %v3871_v44, %v1582_v16  ;;  %v1591_v27 = vshll.u32 %v3872_v56, %v1582_v16  ;;  %v4791_v50 = vld [vmem:[#allocation7] ss:$0 sm:$0xff] }
 0x283   : > { %v1389_v11 = vmul.f32 %v1388_v1, %v1386_v57  ;;  %v1396_v59 = vmul.f32 %v1395_v20, %v1386_v57  ;;  %v4728_v17 = vshrl.u32 %v1512_v10, 30  ;;  %v1594_v38 = vshll.u32 %v3873_v62, %v1582_v16 }
 0x284   : > { %v1586_v19 = vshrl.u32 %v3871_v44, %v4726_v30  ;;  %v1589_v47 = vshrl.u32 %v3872_v56, %v4726_v30  ;;  %v1595_v51 = vshrl.u32 %v3874_v36, %v4726_v30  ;;  %v1598_v43 = vshrl.u32 %v6012_v61, %v4726_v30 }
 0x285   : > { %v1390_v40 = vadd.f32 -0.4999988, %v1389_v11  ;;  %v1397_v63 = vadd.f32 -0.16666654, %v1396_v59  ;;  %v1514_v6 = vshll.u32 %v4728_v17, 30  ;;  %v1597_v39 = vshll.u32 %v3874_v36, %v1582_v16 }
 0x286   : > { %v4750_v24 = vor.u32 %v1586_v19, %v1585_v60  ;;  %v4752_v0 = vor.u32 %v1589_v47, %v1588_v4  ;;  %v1596_v48 = vor.u32 %v1595_v51, %v1594_v38  ;;  %v1617_v52 = vand.u32 65535, %v4736_v29 }
 0x287   : > { %v1391_v8 = vmul.f32 %v1390_v40, %v1386_v57  ;;  %v1398_v58 = vmul.f32 %v1397_v63, %v1386_v57  ;;  %v4746_v21 = vsub.s32 %v1511_v9, %v1514_v6  ;;  %v1592_v57 = vshrl.u32 %v3873_v62, %v4726_v30  ;;  %v869_v63 = vpop.f32.mrf.mxu1 }
 0x288   : > { %v1507_v9 = vadd.s32 %v4716_v2, %v1483_v13  ;;  %vm1415_vm3 = vcmp.lt.s32.totalorder %v4571_v32, 0  ;;  %v1599_v40 = vor.u32 %v1598_v43, %v1597_v39  ;;  %vm1600_vm4 = vcmp.lt.s32.totalorder %v4730_v7, 1 }
 0x289   : > { %v1392_v26 = vadd.f32 1.0, %v1391_v8  ;;  %v1399_v54 = vadd.f32 1.0, %v1398_v58  ;;  %vm1516_vm1 = vcmp.lt.s32.totalorder %v4746_v21, 0  ;;  %v1517_v20 = vsub.s32 0, %v4746_v21 }
 0x28a   : > { %v1593_v10 = vor.u32 %v1592_v57, %v1591_v27  ;;  %vm1603_vm5 = vcmp.lt.s32.totalorder %v4730_v7, 4  ;;  %v1608_v16 = vsel %vm1600_vm4, %v4750_v24, %v4752_v0  ;;  %vm1602_vm6 = vcmp.lt.s32.totalorder %v4730_v7, 3 }
 0x28b   : > { %v1400_v14 = vmul.f32 %v1399_v54, %v1384_v23  ;;  %v1409_v1 = vxor.u32 2147483648, %v1392_v26  ;;  %v1518_v59 = vsel %vm1516_vm1, %v1517_v20, %v4746_v21  ;;  %v1609_v12 = vsel %vm1603_vm5, %v1596_v48, 920167782 }
 0x28c   : > { %v1519_v23 = vclz %v1518_v59  ;;  %v870_v8 = vadd.f32 %v869_v63, %v788_v18  ;;  %vm1601_vm7 = vcmp.lt.s32.totalorder %v4730_v7, 2  ;;  %v1610_v6 = vsel %vm1602_vm6, %v1593_v10, %v1609_v12 }
 0x28d   : > { %v1406_v11 = vxor.u32 2147483648, %v1400_v14  ;;  %v1410_v13 = vsel %vm1408_vm2, %v1409_v1, %v1400_v14  ;;  %v1618_v60 = vshrl.u32 %v4736_v29, 16  ;;  %v1537_v4 = vsub.s32 4, %v4728_v17 }
 0x28e   : > { %v3574_v47 = vadd.s32 4294967294, %v1519_v23  ;;  %v1611_v33 = vsel %vm1601_vm7, %v1608_v16, %v1610_v6  ;;  %v1612_v27 = vsel %vm1600_vm4, %v4752_v0, %v1593_v10  ;;  %v1613_v38 = vsel %vm1603_vm5, %v1599_v40, 1326507024 }
 0x28f   : > { %v1407_v2 = vsel %vm1405_vm14, %v1392_v26, %v1406_v11  ;;  %v1641_v51 = vand.u32 65535, %v1611_v33  ;;  %v1642_v26 = vshrl.u32 %v1611_v33, 16  ;;  %v1614_v43 = vsel %vm1602_vm6, %v1596_v48, %v1613_v38 }
 0x290   : > { %v1411_v19 = vsel %vm1404_vm15, %v1407_v2, %v1410_v13  ;;  %vm3575_vm8 = vcmp.lt.s32.totalorder %v3574_v47, 0  ;;  %v920_v14 = vmul.f32 %v4791_v50, %v870_v8  ;;  %v1615_v20 = vsel %vm1601_vm7, %v1612_v27, %v1614_v43 }
 0x291   : > { %v1412_v58 = vsel %vm1401_vm0, nan, %v1411_v19  ;;  %v1522_v28 = vsel %vm3575_vm8, 0, %v3574_v47  ;;  %v1644_v39 = vmul.u32 %v1642_v26, %v1617_v52  ;;  %v1645_v18 = vmul.u32 %v1641_v51, %v1618_v60 }
 0x292   : > { %3430 = vst [vmem:[%s4567_s23 + $0x10] sm:$0xff] %v1412_v58  ;;  %v1523_v54 = vsub.s32 32, %v1522_v28  ;;  %v1527_v57 = vsub.s32 4294967266, %v1522_v28  ;;  %v1524_v1 = vshll.u32 %v4746_v21, %v1522_v28  ;;  %v1619_v23 = vand.u32 65535, %v1615_v20 }
 0x293   : > { %v1620_v40 = vshrl.u32 %v1615_v20, 16  ;;  %v1538_v63 = vsel %vm1415_vm3, %v1537_v4, %v4728_v17  ;;  %v1584_v48 = vshrl.u32 %v3870_v34, %v4726_v30  ;;  %v1643_v2 = vmul.u32 %v1641_v51, %v1617_v52 }
 0x294   : > { %v1525_v11 = vshrl.u32 %v1507_v9, %v1523_v54  ;;  %v1528_v59 = vadd.s32 127, %v1527_v57  ;;  %v1647_v13 = vshll.u32 %v1644_v39, 16  ;;  %v1605_v12 = vsel %vm1603_vm5, %v1593_v10, 2102212464 }
 0x295   : > { %v1622_v19 = vmul.u32 %v1620_v40, %v1617_v52  ;;  %v1623_v47 = vmul.u32 %v1619_v23, %v1618_v60  ;;  %v1646_v9 = vmul.u32 %v1642_v26, %v1618_v60  ;;  %v1649_v8 = vshll.u32 %v1645_v18, 16 }
 0x296   : > { %v1526_v16 = vor.u32 %v1525_v11, %v1524_v1  ;;  %v1529_v21 = vshll.u32 %v1528_v59, 23  ;;  %vm1651_vm9 = vc.u32 %v1643_v2, %v1647_v13  ;;  %v1621_v6 = vmul.u32 %v1619_v23, %v1617_v52 }
 0x297   : > { %v1624_v33 = vmul.u32 %v1620_v40, %v1618_v60  ;;  %v1625_v27 = vshll.u32 %v1622_v19, 16  ;;  %v1627_v4 = vshll.u32 %v1623_v47, 16  ;;  %v1652_v30 = vsel %vm1651_vm9, 1, %v3876_v25 }
 0x298   : > { %v1530_v58 = vor.u32 4788187, %v1529_v21  ;;  %v1533_v17 = vcvt.s32.f32 %v1526_v16  ;;  %v1653_v28 = vadd.s32 %v1647_v13, %v1643_v2  ;;  %v1654_v54 = vadd.s32 %v1652_v30, %v1646_v9 }
 0x299   : > { %vm1629_vm10 = vc.u32 %v1621_v6, %v1625_v27  ;;  %v1631_v51 = vadd.s32 %v1625_v27, %v1621_v6  ;;  %v1604_v10 = vsel %vm1600_vm4, %v1584_v48, %v4750_v24  ;;  %v1606_v26 = vsel %vm1602_vm6, %v4752_v0, %v1605_v12  ;;  %v584_v48 = vpop.f32.mrf.mxu2 }
 0x29a   : > { %v1531_v38 = vand.u32 2147483647, %v1530_v58  ;;  %v1630_v52 = vsel %vm1629_vm10, 1, %v3876_v25  ;;  %vm1655_vm11 = vc.u32 %v1653_v28, %v1649_v8  ;;  %v1648_v20 = vshrl.u32 %v1644_v39, 16 }
 0x29b   : > { %v1632_v57 = vadd.s32 %v1630_v52, %v1624_v33  ;;  %vm1633_vm12 = vc.u32 %v1631_v51, %v1627_v4  ;;  %v1656_v43 = vsel %vm1655_vm11, 1, %v3876_v25  ;;  %v4815_v59 = vadd.f32 %v4696_v5, %v920_v14 }
 0x29c   : > { %v1534_v60 = vmul.f32 %v1533_v17, %v1531_v38  ;;  %v1634_v1 = vsel %vm1633_vm12, 1, %v3876_v25  ;;  %v1658_v11 = vadd.s32 %v1656_v43, %v1654_v54  ;;  %vm4819_vm13 = vcmp.le.f32.partialorder %v1413_v35, 0.7853982  ;;  %v689_v38 = vpop.f32.mrf.mxu3 }
 0x29d   : > { %v1626_v23 = vshrl.u32 %v1622_v19, 16  ;;  %v1636_v40 = vadd.s32 %v1634_v1, %v1632_v57  ;;  %v1540_v2 = vsel %vm4819_vm13, 0, %v1538_v63  ;;  %v1650_v13 = vshrl.u32 %v1645_v18, 16 }
 0x29e   : > { %v1535_v0 = vxor.u32 2147483648, %v1534_v60  ;;  %v1659_v16 = vadd.s32 %v1658_v11, %v1648_v20  ;;  %v1726_v39 = vand.u32 2139095040, %v4815_v59  ;;  %v1607_v35 = vsel %vm1601_vm7, %v1604_v10, %v1606_v26 }
 0x29f   : > { %v1628_v21 = vshrl.u32 %v1623_v47, 16  ;;  %v1637_v12 = vadd.s32 %v1636_v40, %v1626_v23  ;;  %v585_v63 = vadd.f32 %v584_v48, %v4246_v46  ;;  %v4836_v33 = vadd.s32 %v1653_v28, %v1649_v8 }
 0x2a0   : > { %v1536_v14 = vsel %vm1415_vm3, %v1535_v0, %v1534_v60  ;;  %v1660_v9 = vadd.s32 %v1659_v16, %v1650_v13  ;;  %v1727_v58 = vshrl.u32 %v1726_v39, 23  ;;  %v1557_v27 = vadd.s32 3, %v1540_v2  ;;  %v791_v60 = vpop.f32.mrf.mxu0  ;;  %v873_v2 = vpop.f32.mrf.mxu1 }
 0x2a1   : > { %v1539_v19 = vsel %vm4819_vm13, %v4571_v32, %v1536_v14  ;;  %v4834_v6 = vadd.s32 %v1637_v12, %v1628_v21  ;;  %v1661_v47 = vmul.u32 %v4736_v29, %v1607_v35  ;;  %v1723_v54 = vand.u32 2147483647, %v4815_v59 }
 0x2a2   : > { %v1541_v18 = vmul.f32 %v1539_v19, %v1539_v19  ;;  %v1664_v17 = vadd.s32 1, %v1660_v9  ;;  %v3579_v4 = vadd.s32 4294967169, %v1727_v58  ;;  %v690_v10 = vadd.f32 %v689_v38, %v585_v63 }
 0x2a3   : > { %vm1663_vm14 = vc.u32 %v4834_v6, %v4836_v33  ;;  %v1558_v28 = vand.u32 3, %v1557_v27  ;;  %v1730_v29 = vand.u32 8388607, %v1723_v54  ;;  %vm1556_vm1 = vweird.f32 %v4571_v32 }
 0x2a4   : > { %v1542_v7 = vmul.f32 -0.001358992, %v1541_v18  ;;  %v1549_v30 = vmul.f32 -0.00019511016, %v1541_v18  ;;  %v1665_v51 = vsel %vm1663_vm14, %v1664_v17, %v1660_v9  ;;  %v1733_v46 = vadd.s32 1, %v3579_v4 }
 0x2a5   : > { %v1666_v8 = vadd.s32 %v1665_v51, %v1661_v47  ;;  %v792_v24 = vadd.f32 %v791_v60, %v690_v10  ;;  %vm1559_vm0 = vcmp.lt.s32.totalorder %v1558_v28, 2  ;;  %vm1560_vm2 = vcmp.eq.s32.totalorder %v1558_v28, 0 }
 0x2a6   : > { %v1543_v26 = vadd.f32 0.041655596, %v1542_v7  ;;  %v1550_v52 = vadd.f32 0.008332121, %v1549_v30  ;;  %vm1734_vm15 = vcmp.gt.s32.totalorder %v1733_v46, 0  ;;  %vm1563_vm3 = vcmp.eq.s32.totalorder %v1558_v28, 2 }
 0x2a7   : > { %v1667_v1 = vadd.s32 536870912, %v1666_v8  ;;  %v1735_v20 = vsel %vm1734_vm15, %v1733_v46, 0  ;;  %v1731_v14 = vor.u32 8388608, %v1730_v29  ;;  %v874_v35 = vadd.f32 %v873_v2, %v792_v24 }
 0x2a8   : > { %v1544_v57 = vmul.f32 %v1543_v26, %v1541_v18  ;;  %v1551_v43 = vmul.f32 %v1550_v52, %v1541_v18  ;;  %v1737_v11 = vand.u32 31, %v1735_v20  ;;  %v4847_v58 = vshrl.u32 %v1735_v20, 5 }
 0x2a9   : > { %v1668_v40 = vshrl.u32 %v1667_v1, 30  ;;  %vm1570_vm4 = vcmp.lt.s32.totalorder %v4699_v45, 0  ;;  %vm4866_vm6 = vcmp.le.f32.partialorder %v1568_v31, 0.7853982  ;;  %v1662_v31 = vadd.s32 %v4836_v33, %v4834_v6 }
 0x2aa   : > { %v1545_v0 = vadd.f32 -0.4999988, %v1544_v57  ;;  %v1552_v23 = vadd.f32 -0.16666654, %v1551_v43  ;;  %v4844_v48 = vsub.s32 32, %v1737_v11  ;;  %v1740_v63 = vshll.u32 %v3870_v34, %v1737_v11 }
 0x2ab   : > { %v1669_v39 = vshll.u32 %v1668_v40, 30  ;;  %v1743_v47 = vshll.u32 %v3871_v44, %v1737_v11  ;;  %v1746_v38 = vshll.u32 %v3872_v56, %v1737_v11  ;;  %v1749_v51 = vshll.u32 %v3873_v62, %v1737_v11 }
 0x2ac   : > { %v1546_v13 = vmul.f32 %v1545_v0, %v1541_v18  ;;  %v1553_v16 = vmul.f32 %v1552_v23, %v1541_v18  ;;  %v1741_v18 = vshrl.u32 %v3871_v44, %v4844_v48  ;;  %v1744_v27 = vshrl.u32 %v3872_v56, %v4844_v48 }
 0x2ad   : > { %v1670_v9 = vsub.s32 %v1666_v8, %v1669_v39  ;;  %v1747_v17 = vshrl.u32 %v3873_v62, %v4844_v48  ;;  %v1750_v46 = vshrl.u32 %v3874_v36, %v4844_v48  ;;  %v1692_v52 = vsub.s32 4, %v1668_v40 }
 0x2ae   : > { %v1547_v21 = vadd.f32 1.0, %v1546_v13  ;;  %v1554_v12 = vadd.f32 1.0, %v1553_v16  ;;  %v1753_v8 = vshrl.u32 %v6012_v61, %v4844_v48  ;;  %v4870_v57 = vor.u32 %v1741_v18, %v1740_v63 }
 0x2af   : > { %vm1671_vm5 = vcmp.lt.s32.totalorder %v1670_v9, 0  ;;  %v1672_v30 = vsub.s32 0, %v1670_v9  ;;  %v4872_v43 = vor.u32 %v1744_v27, %v1743_v47  ;;  %v1751_v1 = vor.u32 %v1750_v46, %v1749_v51 }
 0x2b0   : > { %v1555_v4 = vmul.f32 %v1554_v12, %v1539_v19  ;;  %v1564_v7 = vxor.u32 2147483648, %v1547_v21  ;;  %v1748_v24 = vor.u32 %v1747_v17, %v1746_v38  ;;  %v1752_v0 = vshll.u32 %v3874_v36, %v1737_v11 }
 0x2b1   : > { %v1673_v26 = vsel %vm1671_vm5, %v1672_v30, %v1670_v9  ;;  %v4880_v13 = vshll.u32 %v1731_v14, 8  ;;  %vm1755_vm7 = vcmp.lt.s32.totalorder %v4847_v58, 1  ;;  %vm1758_vm8 = vcmp.lt.s32.totalorder %v4847_v58, 4 }
 0x2b2   : > { %v1561_v10 = vxor.u32 2147483648, %v1555_v4  ;;  %v1674_v60 = vclz %v1673_v26  ;;  %v1565_v29 = vsel %vm1563_vm3, %v1564_v7, %v1555_v4  ;;  %v1754_v39 = vor.u32 %v1753_v8, %v1752_v0 }
 0x2b3   : > { %vm1757_vm10 = vcmp.lt.s32.totalorder %v4847_v58, 3  ;;  %v1763_v6 = vsel %vm1755_vm7, %v4870_v57, %v4872_v43  ;;  %v1764_v33 = vsel %vm1758_vm8, %v1751_v1, 920167782  ;;  %v1693_v32 = vsel %vm1570_vm4, %v1692_v52, %v1668_v40 }
 0x2b4   : > { %v1562_v20 = vsel %vm1560_vm2, %v1547_v21, %v1561_v10  ;;  %v3577_v2 = vadd.s32 4294967294, %v1674_v60  ;;  %v1765_v11 = vsel %vm1757_vm10, %v1748_v24, %v1764_v33  ;;  %v921_v14 = vmul.f32 %v4791_v50, %v874_v35 }
 0x2b5   : > { %v1566_v23 = vsel %vm1559_vm0, %v1562_v20, %v1565_v29  ;;  %vm1756_vm11 = vcmp.lt.s32.totalorder %v4847_v58, 2  ;;  %v1767_v63 = vsel %vm1755_vm7, %v4872_v43, %v1748_v24  ;;  %v1768_v40 = vsel %vm1758_vm8, %v1754_v39, 1326507024  ;;  %v589_v58 = vpop.f32.mrf.mxu2 }
 0x2b6   : > { %v1567_v16 = vsel %vm1556_vm1, nan, %v1566_v23  ;;  %vm3578_vm9 = vcmp.lt.s32.totalorder %v3577_v2, 0  ;;  %v1766_v27 = vsel %vm1756_vm11, %v1763_v6, %v1765_v11  ;;  %v1772_v17 = vand.u32 65535, %v4880_v13 }
 0x2b7   : > { %3431 = vst [vmem:[%s4567_s23 + $0x18] sm:$0xff] %v1567_v16  ;;  %v1677_v28 = vsel %vm3578_vm9, 0, %v3577_v2  ;;  %v1769_v35 = vsel %vm1757_vm10, %v1751_v1, %v1768_v40  ;;  %v1796_v30 = vand.u32 65535, %v1766_v27  ;;  %v1695_v47 = vsel %vm4866_vm6, 0, %v1693_v32 }
 0x2b8   : > { %v1678_v21 = vsub.s32 32, %v1677_v28  ;;  %v1682_v12 = vsub.s32 4294967266, %v1677_v28  ;;  %v1679_v18 = vshll.u32 %v1670_v9, %v1677_v28  ;;  %v1770_v9 = vsel %vm1756_vm11, %v1767_v63, %v1769_v35 }
 0x2b9   : > { %v1773_v38 = vshrl.u32 %v4880_v13, 16  ;;  %v1797_v51 = vshrl.u32 %v1766_v27, 16  ;;  %v1774_v26 = vand.u32 65535, %v1770_v9  ;;  %v1775_v52 = vshrl.u32 %v1770_v9, 16 }
 0x2ba   : > { %v1680_v4 = vshrl.u32 %v1662_v31, %v1678_v21  ;;  %v1683_v7 = vadd.s32 127, %v1682_v12  ;;  %v1739_v8 = vshrl.u32 %v3870_v34, %v4844_v48  ;;  %v4918_v1 = vadd.f32 %v4696_v5, %v921_v14 }
 0x2bb   : > { %v1799_v60 = vmul.u32 %v1797_v51, %v1772_v17  ;;  %v1800_v20 = vmul.u32 %v1796_v30, %v1773_v38  ;;  %v1712_v0 = vadd.s32 3, %v1695_v47  ;;  %v1760_v23 = vsel %vm1758_vm8, %v1748_v24, 2102212464 }
 0x2bc   : > { %v1681_v46 = vor.u32 %v1680_v4, %v1679_v18  ;;  %v1684_v10 = vshll.u32 %v1683_v7, 23  ;;  %v1777_v31 = vmul.u32 %v1775_v52, %v1772_v17  ;;  %v1778_v2 = vmul.u32 %v1774_v26, %v1773_v38 }
 0x2bd   : > { %v1798_v16 = vmul.u32 %v1796_v30, %v1772_v17  ;;  %v1801_v39 = vmul.u32 %v1797_v51, %v1773_v38  ;;  %v1802_v6 = vshll.u32 %v1799_v60, 16  ;;  %v1776_v32 = vmul.u32 %v1774_v26, %v1772_v17 }
 0x2be   : > { %v1685_v29 = vor.u32 4788187, %v1684_v10  ;;  %v1688_v28 = vcvt.s32.f32 %v1681_v46  ;;  %v1780_v11 = vshll.u32 %v1777_v31, 16  ;;  %v1779_v48 = vmul.u32 %v1775_v52, %v1773_v38 }
 0x2bf   : > { %v1782_v21 = vshll.u32 %v1778_v2, 16  ;;  %v1804_v12 = vshll.u32 %v1800_v20, 16  ;;  %vm1806_vm12 = vc.u32 %v1798_v16, %v1802_v6  ;;  %v1808_v27 = vadd.s32 %v1802_v6, %v1798_v16 }
 0x2c0   : > { %v1686_v33 = vand.u32 2147483647, %v1685_v29  ;;  %vm1784_vm13 = vc.u32 %v1776_v32, %v1780_v11  ;;  %v1786_v63 = vadd.s32 %v1780_v11, %v1776_v32  ;;  %v1807_v18 = vsel %vm1806_vm12, 1, %v3876_v25 }
 0x2c1   : > { %v1785_v24 = vsel %vm1784_vm13, 1, %v3876_v25  ;;  %v1809_v40 = vadd.s32 %v1807_v18, %v1801_v39  ;;  %v1881_v4 = vand.u32 2139095040, %v4918_v1  ;;  %v1759_v17 = vsel %vm1755_vm7, %v1739_v8, %v4870_v57 }
 0x2c2   : > { %v1689_v14 = vmul.f32 %v1688_v28, %v1686_v33  ;;  %v1787_v35 = vadd.s32 %v1785_v24, %v1779_v48  ;;  %vm1788_vm14 = vc.u32 %v1786_v63, %v1782_v21  ;;  %v1761_v30 = vsel %vm1757_vm10, %v4872_v43, %v1760_v23 }
 0x2c3   : > { %v1789_v47 = vsel %vm1788_vm14, 1, %v3876_v25  ;;  %vm1810_vm15 = vc.u32 %v1808_v27, %v1804_v12  ;;  %v1882_v9 = vshrl.u32 %v1881_v4, 23  ;;  %v1781_v51 = vshrl.u32 %v1777_v31, 16 }
 0x2c4   : > { %v1690_v7 = vxor.u32 2147483648, %v1689_v14  ;;  %v1791_v46 = vadd.s32 %v1789_v47, %v1787_v35  ;;  %v1811_v10 = vsel %vm1810_vm15, 1, %v3876_v25  ;;  %v1803_v26 = vshrl.u32 %v1799_v60, 16 }
 0x2c5   : > { %v1813_v52 = vadd.s32 %v1811_v10, %v1809_v40  ;;  %v3582_v8 = vadd.s32 4294967169, %v1882_v9  ;;  %v1762_v43 = vsel %vm1756_vm11, %v1759_v17, %v1761_v30  ;;  %v1783_v23 = vshrl.u32 %v1778_v2, 16 }
 0x2c6   : > { %v1691_v38 = vsel %vm1570_vm4, %v1690_v7, %v1689_v14  ;;  %v1792_v16 = vadd.s32 %v1791_v46, %v1781_v51  ;;  %v1805_v39 = vshrl.u32 %v1800_v20, 16  ;;  %v1878_v31 = vand.u32 2147483647, %v4918_v1 }
 0x2c7   : > { %v1694_v57 = vsel %vm4866_vm6, %v4699_v45, %v1691_v38  ;;  %v1814_v6 = vadd.s32 %v1813_v52, %v1803_v26  ;;  %v1888_v33 = vadd.s32 1, %v3582_v8  ;;  %v4943_v19 = vadd.s32 %v1808_v27, %v1804_v12  ;;  %v695_v38 = vpop.f32.mrf.mxu3 }
 0x2c8   : > { %v1696_v29 = vmul.f32 %v1694_v57, %v1694_v57  ;;  %v4941_v11 = vadd.s32 %v1792_v16, %v1783_v23  ;;  %v1713_v2 = vand.u32 3, %v1712_v0  ;;  %v1816_v20 = vmul.u32 %v4880_v13, %v1762_v43 }
 0x2c9   : > { %v1815_v60 = vadd.s32 %v1814_v6, %v1805_v39  ;;  %vm1889_vm0 = vcmp.gt.s32.totalorder %v1888_v33, 0  ;;  %v1885_v40 = vand.u32 8388607, %v1878_v31  ;;  %v590_v4 = vadd.f32 %v589_v58, %v4253_v53 }
 0x2ca   : > { %v1697_v28 = vmul.f32 -0.001358992, %v1696_v29  ;;  %v1704_v32 = vmul.f32 -0.00019511016, %v1696_v29  ;;  %vm1818_vm1 = vc.u32 %v4941_v11, %v4943_v19  ;;  %v1890_v63 = vsel %vm1889_vm0, %v1888_v33, 0 }
 0x2cb   : > { %v1819_v14 = vadd.s32 1, %v1815_v60  ;;  %v1892_v12 = vand.u32 31, %v1890_v63  ;;  %vm1715_vm2 = vcmp.eq.s32.totalorder %v1713_v2, 0  ;;  %vm1718_vm3 = vcmp.eq.s32.totalorder %v1713_v2, 2 }
 0x2cc   : > { %v1698_v48 = vadd.f32 0.041655596, %v1697_v28  ;;  %v1705_v21 = vadd.f32 0.008332121, %v1704_v32  ;;  %vm1714_vm4 = vcmp.lt.s32.totalorder %v1713_v2, 2  ;;  %v1886_v9 = vor.u32 8388608, %v1885_v40 }
 0x2cd   : > { %v1820_v27 = vsel %vm1818_vm1, %v1819_v14, %v1815_v60  ;;  %v1893_v30 = vsub.s32 32, %v1892_v12  ;;  %vm1711_vm5 = vweird.f32 %v4699_v45  ;;  %v696_v10 = vadd.f32 %v695_v38, %v590_v4  ;;  %v795_v60 = vpop.f32.mrf.mxu0  ;;  %v877_v38 = vpop.f32.mrf.mxu1 }
 0x2ce   : > { %v1699_v18 = vmul.f32 %v1698_v48, %v1696_v29  ;;  %v1706_v24 = vmul.f32 %v1705_v21, %v1696_v29  ;;  %v1821_v35 = vadd.s32 %v1820_v27, %v1816_v20  ;;  %v4955_v43 = vshrl.u32 %v1890_v63, 5 }
 0x2cf   : > { %v1896_v51 = vshrl.u32 %v3871_v44, %v1893_v30  ;;  %v1899_v46 = vshrl.u32 %v3872_v56, %v1893_v30  ;;  %v1905_v53 = vshrl.u32 %v3874_v36, %v1893_v30  ;;  %v1898_v23 = vshll.u32 %v3871_v44, %v1892_v12 }
 0x2d0   : > { %v1700_v7 = vadd.f32 -0.4999988, %v1699_v18  ;;  %v1707_v17 = vadd.f32 -0.16666654, %v1706_v24  ;;  %v1822_v13 = vadd.s32 536870912, %v1821_v35  ;;  %v1902_v16 = vshrl.u32 %v3873_v62, %v1893_v30 }
 0x2d1   : > { %v1904_v39 = vshll.u32 %v3873_v62, %v1892_v12  ;;  %v1901_v32 = vshll.u32 %v3872_v56, %v1892_v12  ;;  %vm1725_vm6 = vcmp.lt.s32.totalorder %v4815_v59, 0  ;;  %v4963_v21 = vor.u32 %v1899_v46, %v1898_v23 }
 0x2d2   : > { %v1701_v0 = vmul.f32 %v1700_v7, %v1696_v29  ;;  %v1708_v47 = vmul.f32 %v1707_v17, %v1696_v29  ;;  %v1823_v8 = vshrl.u32 %v1822_v13, 30  ;;  %v1895_v29 = vshll.u32 %v3870_v34, %v1892_v12 }
 0x2d3   : > { %v1906_v58 = vor.u32 %v1905_v53, %v1904_v39  ;;  %v1908_v20 = vshrl.u32 %v6012_v61, %v1893_v30  ;;  %v4968_v18 = vshll.u32 %v1886_v9, 8  ;;  %v796_v24 = vadd.f32 %v795_v60, %v696_v10 }
 0x2d4   : > { %v1702_v26 = vadd.f32 1.0, %v1701_v0  ;;  %v1709_v52 = vadd.f32 1.0, %v1708_v47  ;;  %v1824_v28 = vshll.u32 %v1823_v8, 30  ;;  %v1897_v48 = vor.u32 %v1896_v51, %v1895_v29 }
 0x2d5   : > { %v1903_v40 = vor.u32 %v1902_v16, %v1901_v32  ;;  %v1907_v27 = vshll.u32 %v3874_v36, %v1892_v12  ;;  %vm1910_vm7 = vcmp.lt.s32.totalorder %v4955_v43, 1  ;;  %vm1913_vm9 = vcmp.lt.s32.totalorder %v4955_v43, 4 }
 0x2d6   : > { %v1710_v6 = vmul.f32 %v1709_v52, %v1694_v57  ;;  %v1719_v33 = vxor.u32 2147483648, %v1702_v26  ;;  %v4966_v63 = vsub.s32 %v1821_v35, %v1824_v28  ;;  %v1918_v0 = vsel %vm1910_vm7, %v1897_v48, %v4963_v21 }
 0x2d7   : > { %v1909_v35 = vor.u32 %v1908_v20, %v1907_v27  ;;  %v1919_v12 = vsel %vm1913_vm9, %v1906_v58, 920167782  ;;  %v1847_v9 = vsub.s32 4, %v1823_v8  ;;  %vm1912_vm10 = vcmp.lt.s32.totalorder %v4955_v43, 3  ;;  %v594_v20 = vpop.f32.mrf.mxu2 }
 0x2d8   : > { %v1716_v14 = vxor.u32 2147483648, %v1710_v6  ;;  %v1720_v57 = vsel %vm1718_vm3, %v1719_v33, %v1710_v6  ;;  %vm1826_vm8 = vcmp.lt.s32.totalorder %v4966_v63, 0  ;;  %v1827_v7 = vsub.s32 0, %v4966_v63 }
 0x2d9   : > { %vm1911_vm11 = vcmp.lt.s32.totalorder %v4955_v43, 2  ;;  %v1920_v51 = vsel %vm1912_vm10, %v1903_v40, %v1919_v12  ;;  %v1927_v46 = vand.u32 65535, %v4968_v18  ;;  %v1894_v53 = vshrl.u32 %v3870_v34, %v1893_v30 }
 0x2da   : > { %v1717_v4 = vsel %vm1715_vm2, %v1702_v26, %v1716_v14  ;;  %v1828_v13 = vsel %vm1826_vm8, %v1827_v7, %v4966_v63  ;;  %v1921_v45 = vsel %vm1911_vm11, %v1918_v0, %v1920_v51  ;;  %v1922_v10 = vsel %vm1910_vm7, %v4963_v21, %v1903_v40 }
 0x2db   : > { %v1721_v17 = vsel %vm1714_vm4, %v1717_v4, %v1720_v57  ;;  %v1829_v2 = vclz %v1828_v13  ;;  %v878_v26 = vadd.f32 %v877_v38, %v796_v24  ;;  %v1923_v29 = vsel %vm1913_vm9, %v1909_v35, 1326507024 }
 0x2dc   : > { %v1722_v47 = vsel %vm1711_vm5, nan, %v1721_v17  ;;  %v1951_v23 = vand.u32 65535, %v1921_v45  ;;  %v1952_v16 = vshrl.u32 %v1921_v45, 16  ;;  %v1817_v39 = vadd.s32 %v4943_v19, %v4941_v11 }
 0x2dd   : > { %3432 = vst [vmem:[%s4567_s23 + $0x20] sm:$0xff] %v1722_v47  ;;  %v3580_v52 = vadd.s32 4294967294, %v1829_v2  ;;  %v5004_v30 = vsel %vm1725_vm6, %v1847_v9, %v1823_v8  ;;  %v1924_v6 = vsel %vm1912_vm10, %v1906_v58, %v1923_v29  ;;  %v1928_v33 = vshrl.u32 %v4968_v18, 16 }
 0x2de   : > { %v1914_v28 = vsel %vm1910_vm7, %v1894_v53, %v1897_v48  ;;  %v1925_v32 = vsel %vm1911_vm11, %v1922_v10, %v1924_v6  ;;  %v1954_v60 = vmul.u32 %v1952_v16, %v1927_v46  ;;  %v1915_v11 = vsel %vm1913_vm9, %v1903_v40, 2102212464 }
 0x2df   : > { %vm3581_vm12 = vcmp.lt.s32.totalorder %v3580_v52, 0  ;;  %v1929_v19 = vand.u32 65535, %v1925_v32  ;;  %v1930_v8 = vshrl.u32 %v1925_v32, 16  ;;  %v1955_v58 = vmul.u32 %v1951_v23, %v1928_v33 }
 0x2e0   : > { %v1832_v14 = vsel %vm3581_vm12, 0, %v3580_v52  ;;  %v922_v27 = vmul.f32 %v4791_v50, %v878_v26  ;;  %v1953_v17 = vmul.u32 %v1951_v23, %v1927_v46  ;;  %v595_v48 = vadd.f32 %v594_v20, %v4262_v37 }
 0x2e1   : > { %v1833_v24 = vsub.s32 32, %v1832_v14  ;;  %v1837_v57 = vsub.s32 4294967266, %v1832_v14  ;;  %v1932_v4 = vmul.u32 %v1930_v8, %v1927_v46  ;;  %v1933_v7 = vmul.u32 %v1929_v19, %v1928_v33 }
 0x2e2   : > { %v1834_v35 = vshll.u32 %v4966_v63, %v1832_v14  ;;  %v1957_v47 = vshll.u32 %v1954_v60, 16  ;;  %v1931_v13 = vmul.u32 %v1929_v19, %v1927_v46  ;;  %v1934_v9 = vmul.u32 %v1930_v8, %v1928_v33  ;;  %v701_v8 = vpop.f32.mrf.mxu3 }
 0x2e3   : > { %v1835_v0 = vshrl.u32 %v1817_v39, %v1833_v24  ;;  %v1838_v12 = vadd.s32 127, %v1837_v57  ;;  %v1935_v40 = vshll.u32 %v1932_v4, 16  ;;  %v1956_v38 = vmul.u32 %v1952_v16, %v1928_v33 }
 0x2e4   : > { %v1937_v53 = vshll.u32 %v1933_v7, 16  ;;  %v1959_v45 = vshll.u32 %v1955_v58, 16  ;;  %vm1961_vm14 = vc.u32 %v1953_v17, %v1957_v47  ;;  %v1963_v26 = vadd.s32 %v1957_v47, %v1953_v17 }
 0x2e5   : > { %v1836_v2 = vor.u32 %v1835_v0, %v1834_v35  ;;  %v1839_v51 = vshll.u32 %v1838_v12, 23  ;;  %vm1939_vm13 = vc.u32 %v1931_v13, %v1935_v40  ;;  %v1941_v10 = vadd.s32 %v1935_v40, %v1931_v13  ;;  %v799_v13 = vpop.f32.mrf.mxu0 }
 0x2e6   : > { %v1940_v37 = vsel %vm1939_vm13, 1, %v3876_v25  ;;  %v1958_v29 = vshrl.u32 %v1954_v60, 16  ;;  %v1962_v63 = vsel %vm1961_vm14, 1, %v3876_v25  ;;  %vm1965_vm0 = vc.u32 %v1963_v26, %v1959_v45 }
 0x2e7   : > { %v1840_v52 = vor.u32 4788187, %v1839_v51  ;;  %v1942_v23 = vadd.s32 %v1940_v37, %v1934_v9  ;;  %vm1943_vm15 = vc.u32 %v1941_v10, %v1937_v53  ;;  %v1964_v46 = vadd.s32 %v1962_v63, %v1956_v38 }
 0x2e8   : > { %v1843_v16 = vcvt.s32.f32 %v1836_v2  ;;  %v1944_v6 = vsel %vm1943_vm15, 1, %v3876_v25  ;;  %v1966_v33 = vsel %vm1965_vm0, 1, %v3876_v25  ;;  %v1936_v32 = vshrl.u32 %v1932_v4, 16 }
 0x2e9   : > { %v1841_v39 = vand.u32 2147483647, %v1840_v52  ;;  %v1946_v20 = vadd.s32 %v1944_v6, %v1942_v23  ;;  %v1968_v14 = vadd.s32 %v1966_v33, %v1964_v46  ;;  %v5023_v19 = vadd.f32 %v4696_v5, %v922_v27 }
 0x2ea   : > { %v1916_v24 = vsel %vm1912_vm10, %v4963_v21, %v1915_v11  ;;  %v1938_v57 = vshrl.u32 %v1933_v7, 16  ;;  %v702_v17 = vadd.f32 %v701_v8, %v595_v48  ;;  %v1960_v0 = vshrl.u32 %v1955_v58, 16 }
 0x2eb   : > { %v1844_v60 = vmul.f32 %v1843_v16, %v1841_v39  ;;  %v1947_v35 = vadd.s32 %v1946_v20, %v1936_v32  ;;  %v1969_v12 = vadd.s32 %v1968_v14, %v1958_v29  ;;  %v2033_v47 = vand.u32 2147483647, %v5023_v19 }
 0x2ec   : > { %vm5031_vm1 = vcmp.le.f32.partialorder %v1723_v54, 0.7853982  ;;  %v2036_v27 = vand.u32 2139095040, %v5023_v19  ;;  %v1917_v21 = vsel %vm1911_vm11, %v1914_v28, %v1916_v24  ;;  %v1967_v7 = vadd.s32 %v1963_v26, %v1959_v45  ;;  %v881_v26 = vpop.f32.mrf.mxu1 }
 0x2ed   : > { %v1845_v5 = vxor.u32 2147483648, %v1844_v60  ;;  %v1948_v11 = vadd.s32 %v1947_v35, %v1938_v57  ;;  %v1970_v48 = vadd.s32 %v1969_v12, %v1960_v0  ;;  %v1850_v54 = vsel %vm5031_vm1, 0, %v5004_v30 }
 0x2ee   : > { %v2037_v9 = vshrl.u32 %v2036_v27, 23  ;;  %v800_v40 = vadd.f32 %v799_v13, %v702_v17  ;;  %v2040_v43 = vand.u32 8388607, %v2033_v47  ;;  %v1971_v51 = vmul.u32 %v4968_v18, %v1917_v21 }
 0x2ef   : > { %v1846_v58 = vsel %vm1725_vm6, %v1845_v5, %v1844_v60  ;;  %vm1973_vm2 = vc.u32 %v1948_v11, %v1967_v7  ;;  %v1974_v2 = vadd.s32 1, %v1970_v48  ;;  %v1867_v45 = vadd.s32 3, %v1850_v54 }
 0x2f0   : > { %v1849_v38 = vsel %vm5031_vm1, %v4815_v59, %v1846_v58  ;;  %v3585_v53 = vadd.s32 4294967169, %v2037_v9  ;;  %v2041_v63 = vor.u32 8388608, %v2040_v43  ;;  %v882_v23 = vadd.f32 %v881_v26, %v800_v40 }
 0x2f1   : > { %v1851_v28 = vmul.f32 %v1849_v38, %v1849_v38  ;;  %v1975_v10 = vsel %vm1973_vm2, %v1974_v2, %v1970_v48  ;;  %v1868_v20 = vand.u32 3, %v1867_v45  ;;  %vm1866_vm6 = vweird.f32 %v4815_v59 }
 0x2f2   : > { %v1976_v37 = vadd.s32 %v1975_v10, %v1971_v51  ;;  %v2043_v29 = vadd.s32 1, %v3585_v53  ;;  %v5051_v8 = vshll.u32 %v2041_v63, 8  ;;  %v923_v60 = vmul.f32 %v4791_v50, %v882_v23  ;;  %v5063_v50 = vld [vmem:[#allocation7 + $0x1] ss:$0 sm:$0xff] }
 0x2f3   : > { %v1852_v52 = vmul.f32 -0.001358992, %v1851_v28  ;;  %v1859_v30 = vmul.f32 -0.00019511016, %v1851_v28  ;;  %vm1869_vm4 = vcmp.lt.s32.totalorder %v1868_v20, 2  ;;  %vm1870_vm5 = vcmp.eq.s32.totalorder %v1868_v20, 0 }
 0x2f4   : > { %v1977_v16 = vadd.s32 536870912, %v1976_v37  ;;  %vm2044_vm3 = vcmp.gt.s32.totalorder %v2043_v29, 0  ;;  %vm1873_vm7 = vcmp.eq.s32.totalorder %v1868_v20, 2  ;;  %v1972_v5 = vadd.s32 %v1967_v7, %v1948_v11 }
 0x2f5   : > { %v1853_v46 = vadd.f32 0.041655596, %v1852_v52  ;;  %v1860_v39 = vadd.f32 0.008332121, %v1859_v30  ;;  %v2045_v6 = vsel %vm2044_vm3, %v2043_v29, 0  ;;  %v5061_v27 = vand.u32 65535, %v5051_v8 }
 0x2f6   : > { %v5049_v14 = vshrl.u32 %v1977_v16, 30  ;;  %v2047_v18 = vand.u32 31, %v2045_v6  ;;  %v5066_v13 = vadd.f32 %v5063_v50, %v923_v60  ;;  %v5070_v54 = vshrl.u32 %v2045_v6, 5 }
 0x2f7   : > { %v1854_v33 = vmul.f32 %v1853_v46, %v1851_v28  ;;  %v1861_v32 = vmul.f32 %v1860_v39, %v1851_v28  ;;  %v5077_v7 = vshrl.u32 %v5051_v8, 16  ;;  %vm1880_vm9 = vcmp.lt.s32.totalorder %v4918_v1, 0 }
 0x2f8   : > { %v1979_v17 = vshll.u32 %v5049_v14, 30  ;;  %v5055_v35 = vsub.s32 32, %v2047_v18  ;;  %v2053_v53 = vshll.u32 %v3871_v44, %v2047_v18  ;;  %v2059_v52 = vshll.u32 %v3873_v62, %v2047_v18 }
 0x2f9   : > { %v1855_v24 = vadd.f32 -0.4999988, %v1854_v33  ;;  %v1862_v57 = vadd.f32 -0.16666654, %v1861_v32  ;;  %v2191_v30 = vand.u32 2139095040, %v5066_v13  ;;  %v2056_v23 = vshll.u32 %v3872_v56, %v2047_v18 }
 0x2fa   : > { %v5057_v4 = vsub.s32 %v1976_v37, %v1979_v17  ;;  %v2051_v9 = vshrl.u32 %v3871_v44, %v5055_v35  ;;  %v2054_v11 = vshrl.u32 %v3872_v56, %v5055_v35  ;;  %v2057_v45 = vshrl.u32 %v3873_v62, %v5055_v35 }
 0x2fb   : > { %v1856_v0 = vmul.f32 %v1855_v24, %v1851_v28  ;;  %v1863_v12 = vmul.f32 %v1862_v57, %v1851_v28  ;;  %v2050_v28 = vshll.u32 %v3870_v34, %v2047_v18  ;;  %v2060_v10 = vshrl.u32 %v3874_v36, %v5055_v35 }
 0x2fc   : > { %vm1981_vm8 = vcmp.lt.s32.totalorder %v5057_v4, 0  ;;  %v1982_v58 = vsub.s32 0, %v5057_v4  ;;  %v5091_v63 = vor.u32 %v2054_v11, %v2053_v53  ;;  %vm5098_vm10 = vcmp.le.f32.partialorder %v1878_v31, 0.7853982 }
 0x2fd   : > { %v1857_v21 = vadd.f32 1.0, %v1856_v0  ;;  %v1864_v48 = vadd.f32 1.0, %v1863_v12  ;;  %v2052_v29 = vor.u32 %v2051_v9, %v2050_v28  ;;  %v2061_v6 = vor.u32 %v2060_v10, %v2059_v52 }
 0x2fe   : > { %v1983_v43 = vsel %vm1981_vm8, %v1982_v58, %v5057_v4  ;;  %v2062_v33 = vshll.u32 %v3874_v36, %v2047_v18  ;;  %v2002_v60 = vsub.s32 4, %v5049_v14  ;;  %v2058_v24 = vor.u32 %v2057_v45, %v2056_v23 }
 0x2ff   : > { %v1865_v40 = vmul.f32 %v1864_v48, %v1849_v38  ;;  %v1874_v2 = vxor.u32 2147483648, %v1857_v21  ;;  %v1984_v51 = vclz %v1983_v43  ;;  %v2063_v38 = vshrl.u32 %v6012_v61, %v5055_v35 }
 0x300   : > { %vm2065_vm12 = vcmp.lt.s32.totalorder %v5070_v54, 1  ;;  %vm2066_vm13 = vcmp.lt.s32.totalorder %v5070_v54, 2  ;;  %vm2068_vm14 = vcmp.lt.s32.totalorder %v5070_v54, 4  ;;  %vm2067_vm15 = vcmp.lt.s32.totalorder %v5070_v54, 3 }
 0x301   : > { %v1871_v26 = vxor.u32 2147483648, %v1865_v40  ;;  %v3583_v37 = vadd.s32 4294967294, %v1984_v51  ;;  %v1875_v39 = vsel %vm1873_vm7, %v1874_v2, %v1865_v40  ;;  %v2064_v0 = vor.u32 %v2063_v38, %v2062_v33 }
 0x302   : > { %v2073_v59 = vsel %vm2065_vm12, %v2052_v29, %v5091_v63  ;;  %v2074_v18 = vsel %vm2068_vm14, %v2061_v6, 920167782  ;;  %v2077_v9 = vsel %vm2065_vm12, %v5091_v63, %v2058_v24  ;;  %v2049_v53 = vshrl.u32 %v3870_v34, %v5055_v35 }
 0x303   : > { %v1872_v46 = vsel %vm1870_vm5, %v1857_v21, %v1871_v26  ;;  %vm3584_vm11 = vcmp.lt.s32.totalorder %v3583_v37, 0  ;;  %v2075_v58 = vsel %vm2067_vm15, %v2058_v24, %v2074_v18  ;;  %v2078_v40 = vsel %vm2068_vm14, %v2064_v0, 1326507024 }
 0x304   : > { %v1876_v32 = vsel %vm1869_vm4, %v1872_v46, %v1875_v39  ;;  %v1987_v17 = vsel %vm3584_vm11, 0, %v3583_v37  ;;  %v2076_v11 = vsel %vm2066_vm13, %v2073_v59, %v2075_v58  ;;  %v2079_v28 = vsel %vm2067_vm15, %v2061_v6, %v2078_v40 }
 0x305   : > { %v1877_v57 = vsel %vm1866_vm6, nan, %v1876_v32  ;;  %v1988_v31 = vsub.s32 32, %v1987_v17  ;;  %v1992_v12 = vsub.s32 4294967266, %v1987_v17  ;;  %v1989_v20 = vshll.u32 %v5057_v4, %v1987_v17 }
 0x306   : > { %3433 = vst [vmem:[%s4567_s23 + $0x28] sm:$0xff] %v1877_v57  ;;  %v2003_v4 = vsel %vm1880_vm9, %v2002_v60, %v5049_v14  ;;  %v2106_v51 = vand.u32 65535, %v2076_v11  ;;  %v2080_v14 = vsel %vm2066_vm13, %v2077_v9, %v2079_v28  ;;  %v2107_v45 = vshrl.u32 %v2076_v11, 16 }
 0x307   : > { %v1990_v21 = vshrl.u32 %v1972_v5, %v1988_v31  ;;  %v1993_v48 = vadd.s32 127, %v1992_v12  ;;  %v2188_v5 = vand.u32 2147483647, %v5066_v13  ;;  %v2192_v10 = vshrl.u32 %v2191_v30, 23 }
 0x308   : > { %v2005_v52 = vsel %vm5098_vm10, 0, %v2003_v4  ;;  %v2084_v38 = vand.u32 65535, %v2080_v14  ;;  %v2085_v37 = vshrl.u32 %v2080_v14, 16  ;;  %v2069_v23 = vsel %vm2065_vm12, %v2049_v53, %v2052_v29 }
 0x309   : > { %v1991_v2 = vor.u32 %v1990_v21, %v1989_v20  ;;  %v1994_v43 = vshll.u32 %v1993_v48, 23  ;;  %v2070_v46 = vsel %vm2068_vm14, %v2058_v24, 2102212464  ;;  %v2109_v39 = vmul.u32 %v2107_v45, %v5061_v27 }
 0x30a   : > { %v2110_v35 = vmul.u32 %v2106_v51, %v5077_v7  ;;  %v2087_v30 = vmul.u32 %v2085_v37, %v5061_v27  ;;  %v2088_v32 = vmul.u32 %v2084_v38, %v5077_v7  ;;  %v2108_v60 = vmul.u32 %v2106_v51, %v5061_v27 }
 0x30b   : > { %v1995_v26 = vor.u32 4788187, %v1994_v43  ;;  %v1998_v33 = vcvt.s32.f32 %v1991_v2  ;;  %v2111_v57 = vmul.u32 %v2107_v45, %v5077_v7  ;;  %v2112_v17 = vshll.u32 %v2109_v39, 16 }
 0x30c   : > { %v3588_v0 = vadd.s32 4294967169, %v2192_v10  ;;  %v2086_v31 = vmul.u32 %v2084_v38, %v5061_v27  ;;  %v2089_v24 = vmul.u32 %v2085_v37, %v5077_v7  ;;  %v2090_v12 = vshll.u32 %v2087_v30, 16 }
 0x30d   : > { %v1996_v6 = vand.u32 2147483647, %v1995_v26  ;;  %v2092_v20 = vshll.u32 %v2088_v32, 16  ;;  %v2114_v59 = vshll.u32 %v2110_v35, 16  ;;  %vm2116_vm0 = vc.u32 %v2108_v60, %v2112_v17 }
 0x30e   : > { %v2118_v18 = vadd.s32 %v2112_v17, %v2108_v60  ;;  %vm2094_vm1 = vc.u32 %v2086_v31, %v2090_v12  ;;  %v2096_v48 = vadd.s32 %v2090_v12, %v2086_v31  ;;  %v2117_v58 = vsel %vm2116_vm0, 1, %v3876_v25 }
 0x30f   : > { %v1999_v29 = vmul.f32 %v1998_v33, %v1996_v6  ;;  %v2071_v9 = vsel %vm2067_vm15, %v5091_v63, %v2070_v46  ;;  %v2095_v4 = vsel %vm2094_vm1, 1, %v3876_v25  ;;  %v2119_v11 = vadd.s32 %v2117_v58, %v2111_v57 }
 0x310   : > { %vm2120_vm2 = vc.u32 %v2118_v18, %v2114_v59  ;;  %v2097_v7 = vadd.s32 %v2095_v4, %v2089_v24  ;;  %vm2098_vm3 = vc.u32 %v2096_v48, %v2092_v20  ;;  %v2113_v28 = vshrl.u32 %v2109_v39, 16 }
 0x311   : > { %v2000_v21 = vxor.u32 2147483648, %v1999_v29  ;;  %v2121_v40 = vsel %vm2120_vm2, 1, %v3876_v25  ;;  %v2099_v43 = vsel %vm2098_vm3, 1, %v3876_v25  ;;  %v2091_v53 = vshrl.u32 %v2087_v30, 16 }
 0x312   : > { %v2123_v51 = vadd.s32 %v2121_v40, %v2119_v11  ;;  %v2101_v14 = vadd.s32 %v2099_v43, %v2097_v7  ;;  %v2198_v45 = vadd.s32 1, %v3588_v0  ;;  %v2022_v10 = vadd.s32 3, %v2005_v52 }
 0x313   : > { %v2001_v27 = vsel %vm1880_vm9, %v2000_v21, %v1999_v29  ;;  %v2093_v26 = vshrl.u32 %v2088_v32, 16  ;;  %v2115_v38 = vshrl.u32 %v2110_v35, 16  ;;  %v2072_v16 = vsel %vm2066_vm13, %v2069_v23, %v2071_v9 }
 0x314   : > { %v2004_v2 = vsel %vm5098_vm10, %v4918_v1, %v2001_v27  ;;  %v2124_v37 = vadd.s32 %v2123_v51, %v2113_v28  ;;  %v2102_v33 = vadd.s32 %v2101_v14, %v2091_v53  ;;  %vm2199_vm4 = vcmp.gt.s32.totalorder %v2198_v45, 0 }
 0x315   : > { %v2006_v63 = vmul.f32 %v2004_v2, %v2004_v2  ;;  %v2200_v57 = vsel %vm2199_vm4, %v2198_v45, 0  ;;  %v5167_v30 = vadd.s32 %v2118_v18, %v2114_v59  ;;  %v2023_v0 = vand.u32 3, %v2022_v10 }
 0x316   : > { %v2125_v60 = vadd.s32 %v2124_v37, %v2115_v38  ;;  %v5165_v29 = vadd.s32 %v2102_v33, %v2093_v26  ;;  %v2195_v35 = vand.u32 8388607, %v2188_v5  ;;  %v2202_v32 = vand.u32 31, %v2200_v57 }
 0x317   : > { %v2007_v46 = vmul.f32 -0.001358992, %v2006_v63  ;;  %v2014_v6 = vmul.f32 -0.00019511016, %v2006_v63  ;;  %v2126_v12 = vmul.u32 %v5051_v8, %v2072_v16  ;;  %vm2025_vm6 = vcmp.eq.s32.totalorder %v2023_v0, 0 }
 0x318   : > { %v2129_v52 = vadd.s32 1, %v2125_v60  ;;  %vm2128_vm5 = vc.u32 %v5165_v29, %v5167_v30  ;;  %v2203_v23 = vsub.s32 32, %v2202_v32  ;;  %vm2028_vm7 = vcmp.eq.s32.totalorder %v2023_v0, 2 }
 0x319   : > { %v2008_v17 = vadd.f32 0.041655596, %v2007_v46  ;;  %v2015_v39 = vadd.f32 0.008332121, %v2014_v6  ;;  %v2196_v59 = vor.u32 8388608, %v2195_v35  ;;  %v5174_v18 = vshrl.u32 %v2200_v57, 5 }
 0x31a   : > { %v2130_v54 = vsel %vm2128_vm5, %v2129_v52, %v2125_v60  ;;  %v2206_v58 = vshrl.u32 %v3871_v44, %v2203_v23  ;;  %vm2024_vm8 = vcmp.lt.s32.totalorder %v2023_v0, 2  ;;  %v2209_v8 = vshrl.u32 %v3872_v56, %v2203_v23 }
 0x31b   : > { %v2009_v31 = vmul.f32 %v2008_v17, %v2006_v63  ;;  %v2016_v24 = vmul.f32 %v2015_v39, %v2006_v63  ;;  %v2131_v48 = vadd.s32 %v2130_v54, %v2126_v12  ;;  %vm2021_vm9 = vweird.f32 %v4918_v1 }
 0x31c   : > { %v2205_v27 = vshll.u32 %v3870_v34, %v2202_v32  ;;  %v2212_v7 = vshrl.u32 %v3873_v62, %v2203_v23  ;;  %v2214_v40 = vshll.u32 %v3873_v62, %v2202_v32  ;;  %v2215_v43 = vshrl.u32 %v3874_v36, %v2203_v23 }
 0x31d   : > { %v2010_v20 = vadd.f32 -0.4999988, %v2009_v31  ;;  %v2017_v21 = vadd.f32 -0.16666654, %v2016_v24  ;;  %v2132_v11 = vadd.s32 536870912, %v2131_v48  ;;  %v2208_v14 = vshll.u32 %v3871_v44, %v2202_v32 }
 0x31e   : > { %v2207_v45 = vor.u32 %v2206_v58, %v2205_v27  ;;  %v2211_v10 = vshll.u32 %v3872_v56, %v2202_v32  ;;  %v2216_v26 = vor.u32 %v2215_v43, %v2214_v40  ;;  %v2218_v38 = vshrl.u32 %v6012_v61, %v2203_v23 }
 0x31f   : > { %v2011_v9 = vmul.f32 %v2010_v20, %v2006_v63  ;;  %v2018_v4 = vmul.f32 %v2017_v21, %v2006_v63  ;;  %v2133_v53 = vshrl.u32 %v2132_v11, 30  ;;  %v599_v63 = vpop.f32.mrf.mxu2  ;;  %v5186_v33 = vor.u32 %v2209_v8, %v2208_v14  ;;  %v707_v11 = vpop.f32.mrf.mxu3 }
 0x320   : > { %v2213_v16 = vor.u32 %v2212_v7, %v2211_v10  ;;  %v2217_v60 = vshll.u32 %v3874_v36, %v2202_v32  ;;  %v5189_v57 = vshll.u32 %v2196_v59, 8  ;;  %v600_v17 = vadd.f32 %v599_v63, %v4267_v3 }
 0x321   : > { %v2012_v28 = vadd.f32 1.0, %v2011_v9  ;;  %v2019_v51 = vadd.f32 1.0, %v2018_v4  ;;  %v2134_v6 = vshll.u32 %v2133_v53, 30  ;;  %vm2220_vm10 = vcmp.lt.s32.totalorder %v5174_v18, 1 }
 0x322   : > { %vm2223_vm11 = vcmp.lt.s32.totalorder %v5174_v18, 4  ;;  %v2219_v35 = vor.u32 %v2218_v38, %v2217_v60  ;;  %vm2222_vm12 = vcmp.lt.s32.totalorder %v5174_v18, 3  ;;  %v2228_v24 = vsel %vm2220_vm10, %v2207_v45, %v5186_v33 }
 0x323   : > { %v2020_v37 = vmul.f32 %v2019_v51, %v2004_v2  ;;  %v2029_v46 = vxor.u32 2147483648, %v2012_v28  ;;  %v5192_v52 = vsub.s32 %v2131_v48, %v2134_v6  ;;  %v2229_v32 = vsel %vm2223_vm11, %v2216_v26, 920167782 }
 0x324   : > { %vm2035_vm14 = vcmp.lt.s32.totalorder %v5023_v19, 0  ;;  %v2230_v54 = vsel %vm2222_vm12, %v2213_v16, %v2229_v32  ;;  %v2237_v20 = vand.u32 65535, %v5189_v57  ;;  %vm2221_vm15 = vcmp.lt.s32.totalorder %v5174_v18, 2  ;;  %v885_v32 = vpop.f32.mrf.mxu1 }
 0x325   : > { %v2026_v39 = vxor.u32 2147483648, %v2020_v37  ;;  %v2030_v2 = vsel %vm2028_vm7, %v2029_v46, %v2020_v37  ;;  %vm2136_vm13 = vcmp.lt.s32.totalorder %v5192_v52, 0  ;;  %v2137_v3 = vsub.s32 0, %v5192_v52 }
 0x326   : > { %v2232_v59 = vsel %vm2220_vm10, %v5186_v33, %v2213_v16  ;;  %v2157_v58 = vsub.s32 4, %v2133_v53  ;;  %v2231_v9 = vsel %vm2221_vm15, %v2228_v24, %v2230_v54  ;;  %v2233_v4 = vsel %vm2223_vm11, %v2219_v35, 1326507024 }
 0x327   : > { %v2027_v31 = vsel %vm2025_vm6, %v2012_v28, %v2026_v39  ;;  %v2138_v48 = vsel %vm2136_vm13, %v2137_v3, %v5192_v52  ;;  %v2204_v1 = vshrl.u32 %v3870_v34, %v2203_v23  ;;  %v2234_v8 = vsel %vm2222_vm12, %v2216_v26, %v2233_v4  ;;  %v604_v38 = vpop.f32.mrf.mxu2  ;;  %v803_v26 = vpop.f32.mrf.mxu0 }
 0x328   : > { %v2031_v12 = vsel %vm2024_vm8, %v2027_v31, %v2030_v2  ;;  %v2139_v0 = vclz %v2138_v48  ;;  %v2238_v27 = vshrl.u32 %v5189_v57, 16  ;;  %v708_v7 = vadd.f32 %v707_v11, %v600_v17 }
 0x329   : > { %v2032_v21 = vsel %vm2021_vm9, nan, %v2031_v12  ;;  %v2235_v43 = vsel %vm2221_vm15, %v2232_v59, %v2234_v8  ;;  %v2261_v28 = vand.u32 65535, %v2231_v9  ;;  %v2262_v51 = vshrl.u32 %v2231_v9, 16 }
 0x32a   : > { %3434 = vst [vmem:[%s4567_s23 + $0x30] sm:$0xff] %v2032_v21  ;;  %v3586_v40 = vadd.s32 4294967294, %v2139_v0  ;;  %v2127_v14 = vadd.s32 %v5167_v30, %v5165_v29  ;;  %v5233_v63 = vsel %vm2220_vm10, %v2204_v1, %v2207_v45  ;;  %v2239_v23 = vand.u32 65535, %v2235_v43 }
 0x32b   : > { %v2240_v10 = vshrl.u32 %v2235_v43, 16  ;;  %v5237_v37 = vsel %vm2035_vm14, %v2157_v58, %v2133_v53  ;;  %v2225_v46 = vsel %vm2223_vm11, %v2213_v16, 2102212464  ;;  %v2264_v6 = vmul.u32 %v2262_v51, %v2237_v20 }
 0x32c   : > { %vm3587_vm0 = vcmp.lt.s32.totalorder %v3586_v40, 0  ;;  %v2243_v29 = vmul.u32 %v2239_v23, %v2238_v27  ;;  %v804_v30 = vadd.f32 %v803_v26, %v708_v7  ;;  %v2265_v2 = vmul.u32 %v2261_v28, %v2238_v27 }
 0x32d   : > { %v2142_v60 = vsel %vm3587_vm0, 0, %v3586_v40  ;;  %v2242_v17 = vmul.u32 %v2240_v10, %v2237_v20  ;;  %v605_v35 = vadd.f32 %v604_v38, %v4272_v41  ;;  %v2241_v3 = vmul.u32 %v2239_v23, %v2237_v20 }
 0x32e   : > { %v2143_v39 = vsub.s32 32, %v2142_v60  ;;  %v2147_v45 = vsub.s32 4294967266, %v2142_v60  ;;  %v2144_v31 = vshll.u32 %v5192_v52, %v2142_v60  ;;  %v2263_v53 = vmul.u32 %v2261_v28, %v2237_v20 }
 0x32f   : > { %v2245_v24 = vshll.u32 %v2242_v17, 16  ;;  %v2244_v21 = vmul.u32 %v2240_v10, %v2238_v27  ;;  %v2267_v16 = vshll.u32 %v2264_v6, 16  ;;  %v2247_v48 = vshll.u32 %v2243_v29, 16  ;;  %v807_v38 = vpop.f32.mrf.mxu0 }
 0x330   : > { %v2145_v12 = vshrl.u32 %v2127_v14, %v2143_v39  ;;  %v2148_v54 = vadd.s32 127, %v2147_v45  ;;  %v2266_v0 = vmul.u32 %v2262_v51, %v2238_v27  ;;  %v2269_v11 = vshll.u32 %v2265_v2, 16  ;;  %v713_v27 = vpop.f32.mrf.mxu3 }
 0x331   : > { %vm2249_vm1 = vc.u32 %v2241_v3, %v2245_v24  ;;  %v2251_v59 = vadd.s32 %v2245_v24, %v2241_v3  ;;  %vm2271_vm3 = vc.u32 %v2263_v53, %v2267_v16  ;;  %v2273_v52 = vadd.s32 %v2267_v16, %v2263_v53  ;;  %v5250_v3 = vld [vmem:[#allocation7] ss:$0 sm:$0xff] }
 0x332   : > { %v2146_v58 = vor.u32 %v2145_v12, %v2144_v31  ;;  %v2149_v9 = vshll.u32 %v2148_v54, 23  ;;  %v2250_v4 = vsel %vm2249_vm1, 1, %v3876_v25  ;;  %v2246_v8 = vshrl.u32 %v2242_v17, 16  ;;  %v889_v12 = vpop.f32.mrf.mxu1 }
 0x333   : > { %v2252_v41 = vadd.s32 %v2250_v4, %v2244_v21  ;;  %vm2253_vm2 = vc.u32 %v2251_v59, %v2247_v48  ;;  %v2272_v7 = vsel %vm2271_vm3, 1, %v3876_v25  ;;  %vm2275_vm4 = vc.u32 %v2273_v52, %v2269_v11 }
 0x334   : > { %v2150_v1 = vor.u32 4788187, %v2149_v9  ;;  %v2254_v20 = vsel %vm2253_vm2, 1, %v3876_v25  ;;  %v2153_v40 = vcvt.s32.f32 %v2146_v58  ;;  %v2274_v28 = vadd.s32 %v2272_v7, %v2266_v0 }
 0x335   : > { %v2256_v43 = vadd.s32 %v2254_v20, %v2252_v41  ;;  %v2276_v14 = vsel %vm2275_vm4, 1, %v3876_v25  ;;  %v886_v23 = vadd.f32 %v885_v32, %v804_v30  ;;  %v714_v10 = vadd.f32 %v713_v27, %v605_v35 }
 0x336   : > { %v2151_v51 = vand.u32 2147483647, %v2150_v1  ;;  %v2248_v26 = vshrl.u32 %v2243_v29, 16  ;;  %v2268_v39 = vshrl.u32 %v2264_v6, 16  ;;  %v2278_v45 = vadd.s32 %v2276_v14, %v2274_v28 }
 0x337   : > { %v2257_v60 = vadd.s32 %v2256_v43, %v2246_v8  ;;  %v2226_v31 = vsel %vm2222_vm12, %v5186_v33, %v2225_v46  ;;  %v924_v24 = vmul.f32 %v5250_v3, %v886_v23  ;;  %v808_v53 = vadd.f32 %v807_v38, %v714_v10 }
 0x338   : > { %v2154_v17 = vmul.f32 %v2153_v40, %v2151_v51  ;;  %vm5255_vm5 = vcmp.le.f32.partialorder %v2033_v47, 0.7853982  ;;  %v2270_v6 = vshrl.u32 %v2265_v2, 16  ;;  %v2279_v35 = vadd.s32 %v2278_v45, %v2268_v39 }
 0x339   : > { %v2258_v29 = vadd.s32 %v2257_v60, %v2248_v26  ;;  %v2277_v54 = vadd.s32 %v2273_v52, %v2269_v11  ;;  %v5260_v21 = vadd.f32 %v5063_v50, %v924_v24  ;;  %v890_v33 = vadd.f32 %v889_v12, %v808_v53 }
 0x33a   : > { %v2155_v32 = vxor.u32 2147483648, %v2154_v17  ;;  %v2160_v46 = vsel %vm5255_vm5, 0, %v5237_v37  ;;  %v2227_v47 = vsel %vm2221_vm15, %v5233_v63, %v2226_v31  ;;  %v2280_v16 = vadd.s32 %v2279_v35, %v2270_v6 }
 0x33b   : > { %vm2283_vm6 = vc.u32 %v2258_v29, %v2277_v54  ;;  %v2343_v2 = vand.u32 2147483647, %v5260_v21  ;;  %v2346_v59 = vand.u32 2139095040, %v5260_v21  ;;  %v925_v37 = vmul.f32 %v5250_v3, %v890_v33 }
 0x33c   : > { %v2156_v48 = vsel %vm2035_vm14, %v2155_v32, %v2154_v17  ;;  %v2284_v58 = vadd.s32 1, %v2280_v16  ;;  %v2281_v18 = vmul.u32 %v5189_v57, %v2227_v47  ;;  %v2177_v4 = vadd.s32 3, %v2160_v46 }
 0x33d   : > { %v2159_v0 = vsel %vm5255_vm5, %v5023_v19, %v2156_v48  ;;  %v2347_v63 = vshrl.u32 %v2346_v59, 23  ;;  %v2350_v41 = vand.u32 8388607, %v2343_v2  ;;  %v5280_v52 = vadd.f32 %v5063_v50, %v925_v37 }
 0x33e   : > { %v2161_v9 = vmul.f32 %v2159_v0, %v2159_v0  ;;  %v2285_v11 = vsel %vm2283_vm6, %v2284_v58, %v2280_v16  ;;  %v2178_v57 = vand.u32 3, %v2177_v4  ;;  %vm5285_vm8 = vcmp.le.f32.partialorder %v2188_v5, 0.7853982 }
 0x33f   : > { %v2286_v20 = vadd.s32 %v2285_v11, %v2281_v18  ;;  %v3591_v7 = vadd.s32 4294967169, %v2347_v63  ;;  %v2501_v40 = vand.u32 2139095040, %v5280_v52  ;;  %v2351_v14 = vor.u32 8388608, %v2350_v41 }
 0x340   : > { %v2162_v1 = vmul.f32 -0.001358992, %v2161_v9  ;;  %v2169_v8 = vmul.f32 -0.00019511016, %v2161_v9  ;;  %v2498_v60 = vand.u32 2147483647, %v5280_v52  ;;  %vm2176_vm13 = vweird.f32 %v5023_v19 }
 0x341   : > { %v2287_v27 = vadd.s32 536870912, %v2286_v20  ;;  %v2353_v51 = vadd.s32 1, %v3591_v7  ;;  %v2502_v39 = vshrl.u32 %v2501_v40, 23  ;;  %vm2190_vm9 = vcmp.lt.s32.totalorder %v5066_v13, 0 }
 0x342   : > { %v2163_v43 = vadd.f32 0.041655596, %v2162_v1  ;;  %v2170_v28 = vadd.f32 0.008332121, %v2169_v8  ;;  %vm2180_vm10 = vcmp.eq.s32.totalorder %v2178_v57, 0  ;;  %v5291_v12 = vshll.u32 %v2351_v14, 8 }
 0x343   : > { %v2288_v38 = vshrl.u32 %v2287_v27, 30  ;;  %vm2354_vm7 = vcmp.gt.s32.totalorder %v2353_v51, 0  ;;  %vm2179_vm11 = vcmp.lt.s32.totalorder %v2178_v57, 2  ;;  %vm2183_vm12 = vcmp.eq.s32.totalorder %v2178_v57, 2 }
 0x344   : > { %v2164_v23 = vmul.f32 %v2163_v43, %v2161_v9  ;;  %v2171_v10 = vmul.f32 %v2170_v28, %v2161_v9  ;;  %v2355_v26 = vsel %vm2354_vm7, %v2353_v51, 0  ;;  %v2282_v35 = vadd.s32 %v2277_v54, %v2258_v29 }
 0x345   : > { %v2289_v31 = vshll.u32 %v2288_v38, 30  ;;  %v2312_v24 = vsub.s32 4, %v2288_v38  ;;  %v2357_v53 = vand.u32 31, %v2355_v26  ;;  %v3594_v33 = vadd.s32 4294967169, %v2502_v39 }
 0x346   : > { %v2165_v45 = vadd.f32 -0.4999988, %v2164_v23  ;;  %v2172_v17 = vadd.f32 -0.16666654, %v2171_v10  ;;  %v5296_v46 = vand.u32 8388607, %v2498_v60 }
 0x347   : > { %v2290_v5 = vsub.s32 %v2286_v20, %v2289_v31  ;;  %v2358_v32 = vsub.s32 32, %v2357_v53  ;;  %v2313_v59 = vsel %vm2190_vm9, %v2312_v24, %v2288_v38  ;;  %v5306_v63 = vshrl.u32 %v5291_v12, 16 }
 0x348   : > { %v2166_v30 = vmul.f32 %v2165_v45, %v2161_v9  ;;  %v2173_v6 = vmul.f32 %v2172_v17, %v2161_v9  ;;  %v5303_v9 = vand.u32 65535, %v5291_v12  ;;  %v5308_v11 = vshrl.u32 %v2355_v26, 5 }
 0x349   : > { %vm2291_vm14 = vcmp.lt.s32.totalorder %v2290_v5, 0  ;;  %v2292_v48 = vsub.s32 0, %v2290_v5  ;;  %v2361_v58 = vshrl.u32 %v3871_v44, %v2358_v32  ;;  %v2364_v37 = vshrl.u32 %v3872_v56, %v2358_v32 }
 0x34a   : > { %v2167_v47 = vadd.f32 1.0, %v2166_v30  ;;  %v2174_v16 = vadd.f32 1.0, %v2173_v6  ;;  %v2360_v41 = vshll.u32 %v3870_v34, %v2357_v53  ;;  %v2363_v1 = vshll.u32 %v3871_v44, %v2357_v53 }
 0x34b   : > { %v2293_v18 = vsel %vm2291_vm14, %v2292_v48, %v2290_v5  ;;  %v2315_v20 = vsel %vm5285_vm8, 0, %v2313_v59  ;;  %v2367_v7 = vshrl.u32 %v3873_v62, %v2358_v32  ;;  %v5315_v40 = vadd.s32 1, %v3594_v33 }
 0x34c   : > { %v2175_v29 = vmul.f32 %v2174_v16, %v2159_v0  ;;  %v2184_v54 = vxor.u32 2147483648, %v2167_v47  ;;  %v2294_v4 = vclz %v2293_v18  ;;  %v2362_v43 = vor.u32 %v2361_v58, %v2360_v41 }
 0x34d   : > { %v2365_v28 = vor.u32 %v2364_v37, %v2363_v1  ;;  %v2366_v27 = vshll.u32 %v3872_v56, %v2357_v53  ;;  %v2369_v23 = vshll.u32 %v3873_v62, %v2357_v53  ;;  %v2370_v10 = vshrl.u32 %v3874_v36, %v2358_v32 }
 0x34e   : > { %v2181_v8 = vxor.u32 2147483648, %v2175_v29  ;;  %v3589_v0 = vadd.s32 4294967294, %v2294_v4  ;;  %v2185_v14 = vsel %vm2183_vm12, %v2184_v54, %v2175_v29  ;;  %v2372_v26 = vshll.u32 %v3874_v36, %v2357_v53 }
 0x34f   : > { %v2373_v39 = vshrl.u32 %v6012_v61, %v2358_v32  ;;  %v2368_v31 = vor.u32 %v2367_v7, %v2366_v27  ;;  %v2371_v24 = vor.u32 %v2370_v10, %v2369_v23  ;;  %vm2375_vm0 = vcmp.lt.s32.totalorder %v5308_v11, 1 }
 0x350   : > { %v2182_v51 = vsel %vm2180_vm10, %v2167_v47, %v2181_v8  ;;  %vm3590_vm15 = vcmp.lt.s32.totalorder %v3589_v0, 0  ;;  %vm2376_vm1 = vcmp.lt.s32.totalorder %v5308_v11, 2  ;;  %vm2378_vm2 = vcmp.lt.s32.totalorder %v5308_v11, 4 }
 0x351   : > { %v2186_v38 = vsel %vm2179_vm11, %v2182_v51, %v2185_v14  ;;  %v2297_v17 = vsel %vm3590_vm15, 0, %v3589_v0  ;;  %v2374_v33 = vor.u32 %v2373_v39, %v2372_v26  ;;  %v2383_v57 = vsel %vm2375_vm0, %v2362_v43, %v2365_v28 }
 0x352   : > { %v2187_v45 = vsel %vm2176_vm13, nan, %v2186_v38  ;;  %v2298_v30 = vsub.s32 32, %v2297_v17  ;;  %v2302_v6 = vsub.s32 4294967266, %v2297_v17  ;;  %v2299_v47 = vshll.u32 %v2290_v5, %v2297_v17 }
 0x353   : > { %3435 = vst [vmem:[%s4567_s23 + $0x38] sm:$0xff] %v2187_v45  ;;  %vm2377_vm3 = vcmp.lt.s32.totalorder %v5308_v11, 3  ;;  %v2384_v16 = vsel %vm2378_vm2, %v2371_v24, 920167782  ;;  %v2380_v48 = vsel %vm2378_vm2, %v2368_v31, 2102212464  ;;  %v2387_v58 = vsel %vm2375_vm0, %v2365_v28, %v2368_v31 }
 0x354   : > { %v2300_v53 = vshrl.u32 %v2282_v35, %v2298_v30  ;;  %v2303_v19 = vadd.s32 127, %v2302_v6  ;;  %v2385_v59 = vsel %vm2377_vm3, %v2368_v31, %v2384_v16  ;;  %v2388_v5 = vsel %vm2378_vm2, %v2374_v33, 1326507024 }
 0x355   : > { %v2359_v54 = vshrl.u32 %v3870_v34, %v2358_v32  ;;  %v2386_v18 = vsel %vm2376_vm1, %v2383_v57, %v2385_v59  ;;  %v2332_v35 = vadd.s32 3, %v2315_v20  ;;  %v2389_v4 = vsel %vm2377_vm3, %v2371_v24, %v2388_v5 }
 0x356   : > { %v2301_v37 = vor.u32 %v2300_v53, %v2299_v47  ;;  %v2304_v29 = vshll.u32 %v2303_v19, 23  ;;  %v2416_v41 = vand.u32 65535, %v2386_v18  ;;  %v2417_v1 = vshrl.u32 %v2386_v18, 16 }
 0x357   : > { %v2379_v7 = vsel %vm2375_vm0, %v2359_v54, %v2362_v43  ;;  %v2381_v0 = vsel %vm2377_vm3, %v2365_v28, %v2380_v48  ;;  %v2390_v27 = vsel %vm2376_vm1, %v2387_v58, %v2389_v4  ;;  %v2506_v20 = vor.u32 8388608, %v5296_v46 }
 0x358   : > { %v2305_v8 = vor.u32 4788187, %v2304_v29  ;;  %v2394_v32 = vand.u32 65535, %v2390_v27  ;;  %v2395_v51 = vshrl.u32 %v2390_v27, 16  ;;  %v2419_v14 = vmul.u32 %v2417_v1, %v5303_v9 }
 0x359   : > { %v2308_v10 = vcvt.s32.f32 %v2301_v37  ;;  %v2420_v38 = vmul.u32 %v2416_v41, %v5306_v63  ;;  %vm2509_vm4 = vcmp.gt.s32.totalorder %v5315_v40, 0  ;;  %v5353_v26 = vand.u32 3, %v2332_v35 }
 0x35a   : > { %v2306_v23 = vand.u32 2147483647, %v2305_v8  ;;  %v5357_v43 = vsel %vm2376_vm1, %v2379_v7, %v2381_v0  ;;  %v2397_v28 = vmul.u32 %v2395_v51, %v5303_v9  ;;  %v2398_v39 = vmul.u32 %v2394_v32, %v5306_v63 }
 0x35b   : > { %v2418_v17 = vmul.u32 %v2416_v41, %v5303_v9  ;;  %v2421_v31 = vmul.u32 %v2417_v1, %v5306_v63  ;;  %v2422_v24 = vshll.u32 %v2419_v14, 16  ;;  %v2396_v30 = vmul.u32 %v2394_v32, %v5303_v9 }
 0x35c   : > { %v2309_v45 = vmul.f32 %v2308_v10, %v2306_v23  ;;  %v2399_v6 = vmul.u32 %v2395_v51, %v5306_v63  ;;  %v2400_v33 = vshll.u32 %v2397_v28, 16  ;;  %v2510_v47 = vsel %vm2509_vm4, %v5315_v40, 0 }
 0x35d   : > { %v2424_v57 = vshll.u32 %v2420_v38, 16  ;;  %vm2426_vm5 = vc.u32 %v2418_v17, %v2422_v24  ;;  %v2428_v53 = vadd.s32 %v2422_v24, %v2418_v17  ;;  %v2402_v19 = vshll.u32 %v2398_v39, 16 }
 0x35e   : > { %v2310_v11 = vxor.u32 2147483648, %v2309_v45  ;;  %vm2404_vm6 = vc.u32 %v2396_v30, %v2400_v33  ;;  %v2406_v16 = vadd.s32 %v2400_v33, %v2396_v30  ;;  %v2427_v48 = vsel %vm2426_vm5, 1, %v3876_v25 }
 0x35f   : > { %v2405_v58 = vsel %vm2404_vm6, 1, %v3876_v25  ;;  %v2429_v9 = vadd.s32 %v2427_v48, %v2421_v31  ;;  %vm2430_vm7 = vc.u32 %v2428_v53, %v2424_v57  ;;  %v2423_v54 = vshrl.u32 %v2419_v14, 16 }
 0x360   : > { %v2311_v59 = vsel %vm2190_vm9, %v2310_v11, %v2309_v45  ;;  %v2407_v40 = vadd.s32 %v2405_v58, %v2399_v6  ;;  %vm2408_vm10 = vc.u32 %v2406_v16, %v2402_v19  ;;  %v2431_v5 = vsel %vm2430_vm7, 1, %v3876_v25 }
 0x361   : > { %v2314_v63 = vsel %vm5285_vm8, %v5066_v13, %v2311_v59  ;;  %v2409_v29 = vsel %vm2408_vm10, 1, %v3876_v25  ;;  %v2433_v18 = vadd.s32 %v2431_v5, %v2429_v9  ;;  %v2401_v35 = vshrl.u32 %v2397_v28, 16 }
 0x362   : > { %v2316_v37 = vmul.f32 %v2314_v63, %v2314_v63  ;;  %v2411_v4 = vadd.s32 %v2409_v29, %v2407_v40  ;;  %v2436_v41 = vmul.u32 %v5291_v12, %v5357_v43  ;;  %v2512_v1 = vand.u32 31, %v2510_v47 }
 0x363   : > { %v2425_v0 = vshrl.u32 %v2420_v38, 16  ;;  %v2434_v50 = vadd.s32 %v2433_v18, %v2423_v54  ;;  %v2403_v27 = vshrl.u32 %v2398_v39, 16  ;;  %v5377_v51 = vadd.s32 %v2428_v53, %v2424_v57 }
 0x364   : > { %v2317_v8 = vmul.f32 -0.001358992, %v2316_v37  ;;  %v2324_v7 = vmul.f32 -0.00019511016, %v2316_v37  ;;  %v2412_v32 = vadd.s32 %v2411_v4, %v2401_v35  ;;  %v5379_v23 = vsub.s32 32, %v2512_v1 }
 0x365   : > { %v2435_v14 = vadd.s32 %v2434_v50, %v2425_v0  ;;  %v2515_v28 = vshll.u32 %v3870_v34, %v2512_v1  ;;  %v2518_v43 = vshll.u32 %v3871_v44, %v2512_v1  ;;  %v5393_v6 = vshrl.u32 %v2510_v47, 5 }
 0x366   : > { %v2318_v10 = vadd.f32 0.041655596, %v2317_v8  ;;  %v2325_v45 = vadd.f32 0.008332121, %v2324_v7  ;;  %v5382_v17 = vadd.s32 %v2412_v32, %v2403_v27  ;;  %v2516_v12 = vshrl.u32 %v3871_v44, %v5379_v23 }
 0x367   : > { %v2519_v38 = vshrl.u32 %v3872_v56, %v5379_v23  ;;  %v2439_v24 = vadd.s32 1, %v2435_v14  ;;  %v2522_v30 = vshrl.u32 %v3873_v62, %v5379_v23  ;;  %v2521_v11 = vshll.u32 %v3872_v56, %v2512_v1 }
 0x368   : > { %v2319_v39 = vmul.f32 %v2318_v10, %v2316_v37  ;;  %v2326_v31 = vmul.f32 %v2325_v45, %v2316_v37  ;;  %vm2438_vm8 = vc.u32 %v5382_v17, %v5377_v51  ;;  %v5395_v33 = vor.u32 %v2516_v12, %v2515_v28 }
 0x369   : > { %v2440_v19 = vsel %vm2438_vm8, %v2439_v24, %v2435_v14  ;;  %v5398_v16 = vor.u32 %v2519_v38, %v2518_v43  ;;  %v2523_v59 = vor.u32 %v2522_v30, %v2521_v11  ;;  %v2524_v58 = vshll.u32 %v3873_v62, %v2512_v1 }
 0x36a   : > { %v2320_v57 = vadd.f32 -0.4999988, %v2319_v39  ;;  %v2327_v53 = vadd.f32 -0.16666654, %v2326_v31  ;;  %v2441_v48 = vadd.s32 %v2440_v19, %v2436_v41  ;;  %v2525_v9 = vshrl.u32 %v3874_v36, %v5379_v23  ;;  %v609_v19 = vpop.f32.mrf.mxu2 }
 0x36b   : > { %v2527_v47 = vshll.u32 %v3874_v36, %v2512_v1  ;;  %v2528_v29 = vshrl.u32 %v6012_v61, %v5379_v23  ;;  %vm2530_vm9 = vcmp.lt.s32.totalorder %v5393_v6, 1  ;;  %vm2531_vm11 = vcmp.lt.s32.totalorder %v5393_v6, 2 }
 0x36c   : > { %v2321_v40 = vmul.f32 %v2320_v57, %v2316_v37  ;;  %v2328_v5 = vmul.f32 %v2327_v53, %v2316_v37  ;;  %v2442_v54 = vadd.s32 536870912, %v2441_v48  ;;  %v2526_v18 = vor.u32 %v2525_v9, %v2524_v58 }
 0x36d   : > { %v2529_v41 = vor.u32 %v2528_v29, %v2527_v47  ;;  %vm2533_vm12 = vcmp.lt.s32.totalorder %v5393_v6, 4  ;;  %vm2532_vm13 = vcmp.lt.s32.totalorder %v5393_v6, 3  ;;  %v2538_v37 = vsel %vm2530_vm9, %v5395_v33, %v5398_v16 }
 0x36e   : > { %v2322_v35 = vadd.f32 1.0, %v2321_v40  ;;  %v2329_v4 = vadd.f32 1.0, %v2328_v5  ;;  %v5409_v8 = vshrl.u32 %v2442_v54, 30  ;;  %v2539_v1 = vsel %vm2533_vm12, %v2526_v18, 920167782 }
 0x36f   : > { %v2540_v50 = vsel %vm2532_vm13, %v2523_v59, %v2539_v1  ;;  %v2542_v27 = vsel %vm2530_vm9, %v5398_v16, %v2523_v59  ;;  %v2543_v45 = vsel %vm2533_vm12, %v2529_v41, 1326507024  ;;  %vm2331_vm14 = vweird.f32 %v5066_v13  ;;  %v719_v41 = vpop.f32.mrf.mxu3 }
 0x370   : > { %v2330_v7 = vmul.f32 %v2329_v4, %v2314_v63  ;;  %v2339_v0 = vxor.u32 2147483648, %v2322_v35  ;;  %v2444_v32 = vshll.u32 %v5409_v8, 30  ;;  %v2541_v10 = vsel %vm2531_vm11, %v2538_v37, %v2540_v50 }
 0x371   : > { %v2544_v63 = vsel %vm2532_vm13, %v2526_v18, %v2543_v45  ;;  %v5433_v28 = vshll.u32 %v2506_v20, 8  ;;  %vm2335_vm15 = vcmp.eq.s32.totalorder %v5353_v26, 0  ;;  %vm2338_vm0 = vcmp.eq.s32.totalorder %v5353_v26, 2 }
 0x372   : > { %v2336_v14 = vxor.u32 2147483648, %v2330_v7  ;;  %v2445_v12 = vsub.s32 %v2441_v48, %v2444_v32  ;;  %v2545_v43 = vsel %vm2531_vm11, %v2542_v27, %v2544_v63  ;;  %vm2334_vm1 = vcmp.lt.s32.totalorder %v5353_v26, 2  ;;  %v893_v63 = vpop.f32.mrf.mxu1 }
 0x373   : > { %v2340_v39 = vsel %vm2338_vm0, %v2339_v0, %v2330_v7  ;;  %v2571_v31 = vand.u32 65535, %v2541_v10  ;;  %v2547_v46 = vand.u32 65535, %v5433_v28  ;;  %v2548_v11 = vshrl.u32 %v5433_v28, 16 }
 0x374   : > { %v2337_v38 = vsel %vm2335_vm15, %v2322_v35, %v2336_v14  ;;  %vm2446_vm2 = vcmp.lt.s32.totalorder %v2445_v12, 0  ;;  %v2447_v30 = vsub.s32 0, %v2445_v12  ;;  %v2549_v57 = vand.u32 65535, %v2545_v43 }
 0x375   : > { %v2341_v24 = vsel %vm2334_vm1, %v2337_v38, %v2340_v39  ;;  %v2550_v53 = vshrl.u32 %v2545_v43, 16  ;;  %v2514_v26 = vshrl.u32 %v3870_v34, %v5379_v23  ;;  %v2572_v58 = vshrl.u32 %v2541_v10, 16 }
 0x376   : > { %v2342_v20 = vsel %vm2331_vm14, nan, %v2341_v24  ;;  %v2448_v48 = vsel %vm2446_vm2, %v2447_v30, %v2445_v12  ;;  %v2553_v5 = vmul.u32 %v2549_v57, %v2548_v11  ;;  %v2437_v47 = vadd.s32 %v5377_v51, %v5382_v17  ;;  %v811_v17 = vpop.f32.mrf.mxu0 }
 0x377   : > { %3436 = vst [vmem:[%s4567_s23 + $0x40] sm:$0xff] %v2342_v20  ;;  %v2449_v9 = vclz %v2448_v48  ;;  %v2552_v40 = vmul.u32 %v2550_v53, %v2547_v46  ;;  %v2534_v13 = vsel %vm2530_vm9, %v2514_v26, %v5395_v33  ;;  %v2535_v29 = vsel %vm2533_vm12, %v2523_v59, 2102212464 }
 0x378   : > { %v2551_v18 = vmul.u32 %v2549_v57, %v2547_v46  ;;  %v2575_v4 = vmul.u32 %v2571_v31, %v2548_v11  ;;  %v2554_v23 = vmul.u32 %v2550_v53, %v2548_v11  ;;  %v2573_v1 = vmul.u32 %v2571_v31, %v2547_v46 }
 0x379   : > { %v3592_v54 = vadd.s32 4294967294, %v2449_v9  ;;  %v2555_v35 = vshll.u32 %v2552_v40, 16  ;;  %v2556_v37 = vshrl.u32 %v2552_v40, 16  ;;  %v2574_v7 = vmul.u32 %v2572_v58, %v2547_v46  ;;  %v614_v46 = vpop.f32.mrf.mxu2 }
 0x37a   : > { %v2557_v0 = vshll.u32 %v2553_v5, 16  ;;  %v2576_v27 = vmul.u32 %v2572_v58, %v2548_v11  ;;  %v2579_v14 = vshll.u32 %v2575_v4, 16  ;;  %v2558_v20 = vshrl.u32 %v2553_v5, 16 }
 0x37b   : > { %vm3593_vm3 = vcmp.lt.s32.totalorder %v3592_v54, 0  ;;  %vm2559_vm4 = vc.u32 %v2551_v18, %v2555_v35  ;;  %v2561_v51 = vadd.s32 %v2555_v35, %v2551_v18  ;;  %v2577_v32 = vshll.u32 %v2574_v7, 16 }
 0x37c   : > { %v2452_v50 = vsel %vm3593_vm3, 0, %v3592_v54  ;;  %v2560_v33 = vsel %vm2559_vm4, 1, %v3876_v25  ;;  %v2578_v26 = vshrl.u32 %v2574_v7, 16  ;;  %v610_v40 = vadd.f32 %v609_v19, %v4277_v42 }
 0x37d   : > { %v2453_v59 = vsub.s32 32, %v2452_v50  ;;  %v2457_v10 = vsub.s32 4294967266, %v2452_v50  ;;  %v2562_v45 = vadd.s32 %v2560_v33, %v2554_v23  ;;  %v2454_v43 = vshll.u32 %v2445_v12, %v2452_v50  ;;  %v725_v23 = vpop.f32.mrf.mxu3 }
 0x37e   : > { %vm2563_vm5 = vc.u32 %v2561_v51, %v2557_v0  ;;  %vm2581_vm6 = vc.u32 %v2573_v1, %v2577_v32  ;;  %v2583_v38 = vadd.s32 %v2577_v32, %v2573_v1  ;;  %v2467_v18 = vsub.s32 4, %v5409_v8  ;;  %v815_v42 = vpop.f32.mrf.mxu0 }
 0x37f   : > { %v2455_v39 = vshrl.u32 %v2437_v47, %v2453_v59  ;;  %v2458_v31 = vadd.s32 127, %v2457_v10  ;;  %v2564_v24 = vsel %vm2563_vm5, 1, %v3876_v25  ;;  %v2582_v30 = vsel %vm2581_vm6, 1, %v3876_v25 }
 0x380   : > { %v2566_v57 = vadd.s32 %v2564_v24, %v2562_v45  ;;  %v2584_v11 = vadd.s32 %v2582_v30, %v2576_v27  ;;  %vm2585_vm7 = vc.u32 %v2583_v38, %v2579_v14  ;;  %v615_v47 = vadd.f32 %v614_v46, %v4282_v15 }
 0x381   : > { %v2456_v53 = vor.u32 %v2455_v39, %v2454_v43  ;;  %v2459_v48 = vshll.u32 %v2458_v31, 23  ;;  %v2586_v58 = vsel %vm2585_vm7, 1, %v3876_v25  ;;  %v2536_v5 = vsel %vm2532_vm13, %v5398_v16, %v2535_v29  ;;  %v5479_v31 = vld [vmem:[#allocation7 + $0x1] ss:$0 sm:$0xff] }
 0x382   : > { %v2567_v12 = vadd.s32 %v2566_v57, %v2556_v37  ;;  %v2588_v9 = vadd.s32 %v2586_v58, %v2584_v11  ;;  %v2580_v35 = vshrl.u32 %v2575_v4, 16  ;;  %v720_v0 = vadd.f32 %v719_v41, %v610_v40  ;;  %v897_v4 = vpop.f32.mrf.mxu1 }
 0x383   : > { %v2460_v54 = vor.u32 4788187, %v2459_v48  ;;  %v726_v51 = vadd.f32 %v725_v23, %v615_v47  ;;  %v2463_v50 = vcvt.s32.f32 %v2456_v53  ;;  %v5466_v33 = vadd.s32 %v2583_v38, %v2579_v14 }
 0x384   : > { %v5464_v1 = vadd.s32 %v2567_v12, %v2558_v20  ;;  %v2589_v7 = vadd.s32 %v2588_v9, %v2578_v26  ;;  %v2537_v15 = vsel %vm2531_vm11, %v2534_v13, %v2536_v5  ;;  %v812_v27 = vadd.f32 %v811_v17, %v720_v0 }
 0x385   : > { %v2461_v37 = vand.u32 2147483647, %v2460_v54  ;;  %vm2345_vm10 = vcmp.lt.s32.totalorder %v5260_v21, 0  ;;  %v816_v29 = vadd.f32 %v815_v42, %v726_v51  ;;  %v2591_v45 = vmul.u32 %v5433_v28, %v2537_v15 }
 0x386   : > { %v2590_v19 = vadd.s32 %v2589_v7, %v2580_v35  ;;  %vm2593_vm8 = vc.u32 %v5464_v1, %v5466_v33  ;;  %v2468_v41 = vsel %vm2345_vm10, %v2467_v18, %v5409_v8  ;;  %v894_v59 = vadd.f32 %v893_v63, %v812_v27 }
 0x387   : > { %v2464_v16 = vmul.f32 %v2463_v50, %v2461_v37  ;;  %v898_v14 = vadd.f32 %v897_v4, %v816_v29  ;;  %vm2344_vm9 = vcmp.le.f32.partialorder %v2343_v2, 0.7853982  ;;  %vm2500_vm11 = vcmp.lt.s32.totalorder %v5280_v52, 0 }
 0x388   : > { %v2594_v32 = vadd.s32 1, %v2590_v19  ;;  %v926_v13 = vmul.f32 %v5250_v3, %v894_v59  ;;  %v2470_v43 = vsel %vm2344_vm9, 0, %v2468_v41  ;;  %vm5497_vm12 = vcmp.le.f32.partialorder %v2498_v60, 0.7853982 }
 0x389   : > { %v2465_v10 = vxor.u32 2147483648, %v2464_v16  ;;  %v927_v63 = vmul.f32 %v5250_v3, %v898_v14  ;;  %v2487_v30 = vadd.s32 3, %v2470_v43  ;;  %vm2486_vm1 = vweird.f32 %v5260_v21 }
 0x38a   : > { %v2595_v6 = vsel %vm2593_vm8, %v2594_v32, %v2590_v19  ;;  %v5482_v8 = vadd.f32 %v5479_v31, %v926_v13  ;;  %v2592_v4 = vadd.s32 %v5466_v33, %v5464_v1 }
 0x38b   : > { %v2466_v17 = vsel %vm2345_vm10, %v2465_v10, %v2464_v16  ;;  %v2596_v38 = vadd.s32 %v2595_v6, %v2591_v45  ;;  %v5490_v26 = vadd.f32 %v5479_v31, %v927_v63  ;;  %v2488_v40 = vand.u32 3, %v2487_v30 }
 0x38c   : > { %v2469_v39 = vsel %vm2344_vm9, %v5260_v21, %v2466_v17  ;;  %v2653_v2 = vand.u32 2147483647, %v5482_v8  ;;  %v2656_v46 = vand.u32 2139095040, %v5482_v8 }
 0x38d   : > { %v2471_v28 = vmul.f32 %v2469_v39, %v2469_v39  ;;  %v2597_v24 = vadd.s32 536870912, %v2596_v38  ;;  %v2811_v51 = vand.u32 2139095040, %v5490_v26  ;;  %vm2490_vm14 = vcmp.eq.s32.totalorder %v2488_v40, 0 }
 0x38e   : > { %v2657_v53 = vshrl.u32 %v2656_v46, 23  ;;  %v2660_v48 = vand.u32 8388607, %v2653_v2  ;;  %vm2489_vm0 = vcmp.lt.s32.totalorder %v2488_v40, 2  ;;  %vm2493_vm2 = vcmp.eq.s32.totalorder %v2488_v40, 2 }
 0x38f   : > { %v2472_v20 = vmul.f32 -0.001358992, %v2471_v28  ;;  %v2479_v57 = vmul.f32 -0.00019511016, %v2471_v28  ;;  %v2598_v11 = vshrl.u32 %v2597_v24, 30  ;;  %v2812_v14 = vshrl.u32 %v2811_v51, 23 }
 0x390   : > { %v3597_v47 = vadd.s32 4294967169, %v2657_v53  ;;  %v2661_v54 = vor.u32 8388608, %v2660_v48  ;;  %v2808_v45 = vand.u32 2147483647, %v5490_v26 }
 0x391   : > { %v2473_v58 = vadd.f32 0.041655596, %v2472_v20  ;;  %v2480_v12 = vadd.f32 0.008332121, %v2479_v57  ;;  %v2599_v3 = vshll.u32 %v2598_v11, 30  ;;  %v2622_v9 = vsub.s32 4, %v2598_v11 }
 0x392   : > { %v2663_v0 = vadd.s32 1, %v3597_v47  ;;  %v5504_v19 = vshll.u32 %v2661_v54, 8  ;;  %v3600_v40 = vadd.s32 4294967169, %v2812_v14 }
 0x393   : > { %v2474_v18 = vmul.f32 %v2473_v58, %v2471_v28  ;;  %v2481_v5 = vmul.f32 %v2480_v12, %v2471_v28  ;;  %v2600_v35 = vsub.s32 %v2596_v38, %v2599_v3  ;;  %v2623_v23 = vsel %vm2500_vm11, %v2622_v9, %v2598_v11 }
 0x394   : > { %v2625_v15 = vsel %vm5497_vm12, 0, %v2623_v23  ;;  %vm2664_vm15 = vcmp.gt.s32.totalorder %v2663_v0, 0  ;;  %v5511_v17 = vand.u32 65535, %v5504_v19  ;;  %v5514_v43 = vshrl.u32 %v5504_v19, 16 }
 0x395   : > { %v2475_v37 = vadd.f32 -0.4999988, %v2474_v18  ;;  %v2482_v50 = vadd.f32 -0.16666654, %v2481_v5  ;;  %vm2601_vm13 = vcmp.lt.s32.totalorder %v2600_v35, 0  ;;  %v2602_v42 = vsub.s32 0, %v2600_v35 }
 0x396   : > { %v2665_v29 = vsel %vm2664_vm15, %v2663_v0, 0  ;;  %v2642_v13 = vadd.s32 3, %v2625_v15  ;;  %vm2641_vm15 = vweird.f32 %v5280_v52 }
 0x397   : > { %v2476_v27 = vmul.f32 %v2475_v37, %v2471_v28  ;;  %v2483_v16 = vmul.f32 %v2482_v50, %v2471_v28  ;;  %v2603_v60 = vsel %vm2601_vm13, %v2602_v42, %v2600_v35  ;;  %v2667_v32 = vand.u32 31, %v2665_v29 }
 0x398   : > { %v2604_v41 = vclz %v2603_v60  ;;  %v5516_v28 = vshrl.u32 %v2665_v29, 5 }
 0x399   : > { %v2477_v59 = vadd.f32 1.0, %v2476_v27  ;;  %v2484_v10 = vadd.f32 1.0, %v2483_v16  ;;  %v2668_v1 = vsub.s32 32, %v2667_v32  ;;  %v2670_v33 = vshll.u32 %v3870_v34, %v2667_v32 }
 0x39a   : > { %v3595_v6 = vadd.s32 4294967294, %v2604_v41  ;;  %v2673_v24 = vshll.u32 %v3871_v44, %v2667_v32  ;;  %v2676_v30 = vshll.u32 %v3872_v56, %v2667_v32  ;;  %v2679_v11 = vshll.u32 %v3873_v62, %v2667_v32 }
 0x39b   : > { %v2485_v38 = vmul.f32 %v2484_v10, %v2469_v39  ;;  %v2494_v63 = vxor.u32 2147483648, %v2477_v59  ;;  %v2671_v58 = vshrl.u32 %v3871_v44, %v2668_v1  ;;  %v2674_v3 = vshrl.u32 %v3872_v56, %v2668_v1 }
 0x39c   : > { %vm3596_vm3 = vcmp.lt.s32.totalorder %v3595_v6, 0  ;;  %v2677_v9 = vshrl.u32 %v3873_v62, %v2668_v1  ;;  %v2680_v47 = vshrl.u32 %v3874_v36, %v2668_v1  ;;  %v2682_v15 = vshll.u32 %v3874_v36, %v2667_v32 }
 0x39d   : > { %v2491_v46 = vxor.u32 2147483648, %v2485_v38  ;;  %v2495_v20 = vsel %vm2493_vm2, %v2494_v63, %v2485_v38  ;;  %v2607_v57 = vsel %vm3596_vm3, 0, %v3595_v6  ;;  %v2672_v23 = vor.u32 %v2671_v58, %v2670_v33 }
 0x39e   : > { %v2608_v53 = vsub.s32 32, %v2607_v57  ;;  %v2609_v39 = vshll.u32 %v2600_v35, %v2607_v57  ;;  %v2612_v48 = vsub.s32 4294967266, %v2607_v57  ;;  %v2675_v35 = vor.u32 %v2674_v3, %v2673_v24 }
 0x39f   : > { %v2492_v12 = vsel %vm2490_vm14, %v2477_v59, %v2491_v46  ;;  %v2678_v51 = vor.u32 %v2677_v9, %v2676_v30  ;;  %v2681_v37 = vor.u32 %v2680_v47, %v2679_v11  ;;  %v2683_v27 = vshrl.u32 %v6012_v61, %v2668_v1 }
 0x3a0   : > { %v2496_v54 = vsel %vm2489_vm0, %v2492_v12, %v2495_v20  ;;  %v2610_v18 = vshrl.u32 %v2592_v4, %v2608_v53  ;;  %v2613_v5 = vadd.s32 127, %v2612_v48  ;;  %v2669_v16 = vshrl.u32 %v3870_v34, %v2668_v1 }
 0x3a1   : > { %v2497_v0 = vsel %vm2486_vm1, nan, %v2496_v54  ;;  %vm2685_vm4 = vcmp.lt.s32.totalorder %v5516_v28, 1  ;;  %vm2686_vm5 = vcmp.lt.s32.totalorder %v5516_v28, 2  ;;  %v2684_v21 = vor.u32 %v2683_v27, %v2682_v15 }
 0x3a2   : > { %3437 = vst [vmem:[%s4567_s23 + $0x48] sm:$0xff] %v2497_v0  ;;  %v2611_v50 = vor.u32 %v2610_v18, %v2609_v39  ;;  %v2614_v42 = vshll.u32 %v2613_v5, 23  ;;  %vm2687_vm6 = vcmp.lt.s32.totalorder %v5516_v28, 3  ;;  %vm2688_vm7 = vcmp.lt.s32.totalorder %v5516_v28, 4 }
 0x3a3   : > { %v2690_v29 = vsel %vm2688_vm7, %v2678_v51, 2102212464  ;;  %v2693_v4 = vsel %vm2685_vm4, %v2672_v23, %v2675_v35  ;;  %v2694_v41 = vsel %vm2688_vm7, %v2681_v37, 920167782  ;;  %v2697_v59 = vsel %vm2685_vm4, %v2675_v35, %v2678_v51 }
 0x3a4   : > { %v2615_v60 = vor.u32 4788187, %v2614_v42  ;;  %v2618_v10 = vcvt.s32.f32 %v2611_v50  ;;  %v2695_v6 = vsel %vm2687_vm6, %v2678_v51, %v2694_v41  ;;  %v2698_v38 = vsel %vm2688_vm7, %v2684_v21, 1326507024 }
 0x3a5   : > { %v2689_v63 = vsel %vm2685_vm4, %v2669_v16, %v2672_v23  ;;  %v2691_v1 = vsel %vm2687_vm6, %v2675_v35, %v2690_v29  ;;  %v2696_v33 = vsel %vm2686_vm5, %v2693_v4, %v2695_v6  ;;  %v2699_v14 = vsel %vm2687_vm6, %v2681_v37, %v2698_v38 }
 0x3a6   : > { %v2616_v32 = vand.u32 2147483647, %v2615_v60  ;;  %v2700_v30 = vsel %vm2686_vm5, %v2697_v59, %v2699_v14  ;;  %v2726_v46 = vand.u32 65535, %v2696_v33  ;;  %v2727_v20 = vshrl.u32 %v2696_v33, 16 }
 0x3a7   : > { %v5543_v57 = vand.u32 3, %v2642_v13  ;;  %v2704_v11 = vand.u32 65535, %v2700_v30  ;;  %v2705_v53 = vshrl.u32 %v2700_v30, 16  ;;  %v5549_v12 = vand.u32 8388607, %v2808_v45 }
 0x3a8   : > { %v2619_v24 = vmul.f32 %v2618_v10, %v2616_v32  ;;  %v2729_v48 = vmul.u32 %v2727_v20, %v5511_v17  ;;  %v2730_v58 = vmul.u32 %v2726_v46, %v5514_v43  ;;  %v5553_v3 = vsel %vm2686_vm5, %v2689_v63, %v2691_v1 }
 0x3a9   : > { %v2707_v9 = vmul.u32 %v2705_v53, %v5511_v17  ;;  %v2708_v13 = vmul.u32 %v2704_v11, %v5514_v43  ;;  %v2818_v47 = vadd.s32 1, %v3600_v40  ;;  %v2706_v18 = vmul.u32 %v2704_v11, %v5511_v17 }
 0x3aa   : > { %v2620_v39 = vxor.u32 2147483648, %v2619_v24  ;;  %v2728_v5 = vmul.u32 %v2726_v46, %v5511_v17  ;;  %v2732_v23 = vshll.u32 %v2729_v48, 16  ;;  %v2709_v28 = vmul.u32 %v2705_v53, %v5514_v43 }
 0x3ab   : > { %v2710_v35 = vshll.u32 %v2707_v9, 16  ;;  %v2731_v51 = vmul.u32 %v2727_v20, %v5514_v43  ;;  %v2712_v50 = vshll.u32 %v2708_v13, 16  ;;  %v2733_v42 = vshrl.u32 %v2729_v48, 16 }
 0x3ac   : > { %v2621_v54 = vsel %vm2500_vm11, %v2620_v39, %v2619_v24  ;;  %v2734_v15 = vshll.u32 %v2730_v58, 16  ;;  %vm2736_vm8 = vc.u32 %v2728_v5, %v2732_v23  ;;  %v2738_v16 = vadd.s32 %v2732_v23, %v2728_v5 }
 0x3ad   : > { %v2624_v0 = vsel %vm5497_vm12, %v5280_v52, %v2621_v54  ;;  %vm2714_vm10 = vc.u32 %v2706_v18, %v2710_v35  ;;  %v2716_v27 = vadd.s32 %v2710_v35, %v2706_v18  ;;  %v2737_v7 = vsel %vm2736_vm8, 1, %v3876_v25 }
 0x3ae   : > { %v2626_v37 = vmul.f32 %v2624_v0, %v2624_v0  ;;  %v2715_v60 = vsel %vm2714_vm10, 1, %v3876_v25  ;;  %v2739_v29 = vadd.s32 %v2737_v7, %v2731_v51  ;;  %vm2740_vm11 = vc.u32 %v2738_v16, %v2734_v15 }
 0x3af   : > { %v2717_v21 = vadd.s32 %v2715_v60, %v2709_v28  ;;  %vm2718_vm9 = vc.u32 %v2716_v27, %v2712_v50  ;;  %v2741_v59 = vsel %vm2740_vm11, 1, %v3876_v25  ;;  %v2711_v32 = vshrl.u32 %v2707_v9, 16 }
 0x3b0   : > { %v2627_v40 = vmul.f32 -0.001358992, %v2626_v37  ;;  %v2634_v17 = vmul.f32 -0.00019511016, %v2626_v37  ;;  %v2719_v41 = vsel %vm2718_vm9, 1, %v3876_v25  ;;  %v2743_v6 = vadd.s32 %v2741_v59, %v2739_v29 }
 0x3b1   : > { %v2721_v10 = vadd.s32 %v2719_v41, %v2717_v21  ;;  %vm2819_vm12 = vcmp.gt.s32.totalorder %v2818_v47, 0  ;;  %v2713_v1 = vshrl.u32 %v2708_v13, 16  ;;  %v2735_v24 = vshrl.u32 %v2730_v58, 16 }
 0x3b2   : > { %v2628_v4 = vadd.f32 0.041655596, %v2627_v40  ;;  %v2635_v43 = vadd.f32 0.008332121, %v2634_v17  ;;  %v2820_v33 = vsel %vm2819_vm12, %v2818_v47, 0  ;;  %v2744_v30 = vadd.s32 %v2743_v6, %v2733_v42 }
 0x3b3   : > { %v2722_v14 = vadd.s32 %v2721_v10, %v2711_v32  ;;  %v2822_v46 = vand.u32 31, %v2820_v33  ;;  %vm2648_vm13 = vcmp.eq.s32.totalorder %v5543_v57, 2  ;;  %v5573_v39 = vadd.s32 %v2738_v16, %v2734_v15 }
 0x3b4   : > { %v2629_v38 = vmul.f32 %v2628_v4, %v2626_v37  ;;  %v2636_v63 = vmul.f32 %v2635_v43, %v2626_v37  ;;  %v2745_v48 = vadd.s32 %v2744_v30, %v2735_v24  ;;  %vm2644_vm14 = vcmp.lt.s32.totalorder %v5543_v57, 2 }
 0x3b5   : > { %v5571_v53 = vadd.s32 %v2722_v14, %v2713_v1  ;;  %v5575_v9 = vsub.s32 32, %v2822_v46  ;;  %v2746_v58 = vmul.u32 %v5504_v19, %v5553_v3  ;;  %v5580_v13 = vshrl.u32 %v2820_v33, 5 }
 0x3b6   : > { %v2630_v20 = vadd.f32 -0.4999988, %v2629_v38  ;;  %v2637_v11 = vadd.f32 -0.16666654, %v2636_v63  ;;  %v2749_v47 = vadd.s32 1, %v2745_v48  ;;  %v2825_v5 = vshll.u32 %v3870_v34, %v2822_v46 }
 0x3b7   : > { %vm2748_vm0 = vc.u32 %v5571_v53, %v5573_v39  ;;  %v2828_v23 = vshll.u32 %v3871_v44, %v2822_v46  ;;  %v2826_v51 = vshrl.u32 %v3871_v44, %v5575_v9  ;;  %v2829_v19 = vshrl.u32 %v3872_v56, %v5575_v9 }
 0x3b8   : > { %v2631_v54 = vmul.f32 %v2630_v20, %v2626_v37  ;;  %v2638_v18 = vmul.f32 %v2637_v11, %v2626_v37  ;;  %v2750_v3 = vsel %vm2748_vm0, %v2749_v47, %v2745_v48  ;;  %v2832_v37 = vshrl.u32 %v3873_v62, %v5575_v9 }
 0x3b9   : > { %v2834_v50 = vshll.u32 %v3873_v62, %v2822_v46  ;;  %v2835_v42 = vshrl.u32 %v3874_v36, %v5575_v9  ;;  %v2751_v16 = vadd.s32 %v2750_v3, %v2746_v58  ;;  %v2816_v40 = vor.u32 8388608, %v5549_v12 }
 0x3ba   : > { %v2632_v28 = vadd.f32 1.0, %v2631_v54  ;;  %v2639_v35 = vadd.f32 1.0, %v2638_v18  ;;  %v2827_v17 = vor.u32 %v2826_v51, %v2825_v5  ;;  %v2830_v60 = vor.u32 %v2829_v19, %v2828_v23  ;;  %v619_v23 = vpop.f32.mrf.mxu2 }
 0x3bb   : > { %v2831_v7 = vshll.u32 %v3872_v56, %v2822_v46  ;;  %v2836_v21 = vor.u32 %v2835_v42, %v2834_v50  ;;  %v2752_v4 = vadd.s32 536870912, %v2751_v16  ;;  %v2837_v43 = vshll.u32 %v3874_v36, %v2822_v46 }
 0x3bc   : > { %v2640_v15 = vmul.f32 %v2639_v35, %v2624_v0  ;;  %v2649_v27 = vxor.u32 2147483648, %v2632_v28  ;;  %v2838_v41 = vshrl.u32 %v6012_v61, %v5575_v9  ;;  %vm2645_vm1 = vcmp.eq.s32.totalorder %v5543_v57, 0 }
 0x3bd   : > { %v2833_v59 = vor.u32 %v2832_v37, %v2831_v7  ;;  %vm2840_vm2 = vcmp.lt.s32.totalorder %v5580_v13, 1  ;;  %v5605_v32 = vshrl.u32 %v2752_v4, 30  ;;  %vm2843_vm3 = vcmp.lt.s32.totalorder %v5580_v13, 4  ;;  %v731_v7 = vpop.f32.mrf.mxu3 }
 0x3be   : > { %v2646_v29 = vxor.u32 2147483648, %v2640_v15  ;;  %v2650_v0 = vsel %vm2648_vm13, %v2649_v27, %v2640_v15  ;;  %v2839_v10 = vor.u32 %v2838_v41, %v2837_v43  ;;  %v2848_v38 = vsel %vm2840_vm2, %v2827_v17, %v2830_v60 }
 0x3bf   : > { %v2849_v63 = vsel %vm2843_vm3, %v2836_v21, 920167782  ;;  %v5614_v1 = vshll.u32 %v2816_v40, 8  ;;  %v2754_v14 = vshll.u32 %v5605_v32, 30  ;;  %vm2842_vm4 = vcmp.lt.s32.totalorder %v5580_v13, 3 }
 0x3c0   : > { %v2647_v12 = vsel %vm2645_vm1, %v2632_v28, %v2646_v29  ;;  %vm2841_vm5 = vcmp.lt.s32.totalorder %v5580_v13, 2  ;;  %v2850_v57 = vsel %vm2842_vm4, %v2833_v59, %v2849_v63  ;;  %v2852_v24 = vsel %vm2840_vm2, %v2830_v60, %v2833_v59  ;;  %v5658_v13 = vld [vmem:[#allocation7] ss:$0 sm:$0xff] }
 0x3c1   : > { %v2651_v6 = vsel %vm2644_vm14, %v2647_v12, %v2650_v0  ;;  %v2853_v30 = vsel %vm2843_vm3, %v2839_v10, 1326507024  ;;  %v2755_v46 = vsub.s32 %v2751_v16, %v2754_v14  ;;  %v2851_v52 = vsel %vm2841_vm5, %v2848_v38, %v2850_v57 }
 0x3c2   : > { %v2652_v33 = vsel %vm2641_vm15, nan, %v2651_v6  ;;  %v2854_v20 = vsel %vm2842_vm4, %v2836_v21, %v2853_v30  ;;  %v2857_v48 = vand.u32 65535, %v5614_v1  ;;  %v2881_v54 = vand.u32 65535, %v2851_v52  ;;  %v624_v30 = vpop.f32.mrf.mxu2 }
 0x3c3   : > { %3438 = vst [vmem:[%s4567_s23 + $0x50] sm:$0xff] %v2652_v33  ;;  %v2855_v11 = vsel %vm2841_vm5, %v2852_v24, %v2854_v20  ;;  %v2882_v18 = vshrl.u32 %v2851_v52, 16  ;;  %vm2756_vm6 = vcmp.lt.s32.totalorder %v2755_v46, 0  ;;  %v2757_v58 = vsub.s32 0, %v2755_v46 }
 0x3c4   : > { %v2858_v47 = vshrl.u32 %v5614_v1, 16  ;;  %v2859_v5 = vand.u32 65535, %v2855_v11  ;;  %v2845_v28 = vsel %vm2843_vm3, %v2833_v59, 2102212464  ;;  %v2860_v35 = vshrl.u32 %v2855_v11, 16 }
 0x3c5   : > { %v2758_v51 = vsel %vm2756_vm6, %v2757_v58, %v2755_v46  ;;  %v2824_v19 = vshrl.u32 %v3870_v34, %v5575_v9  ;;  %v2884_v37 = vmul.u32 %v2882_v18, %v2857_v48  ;;  %v2747_v27 = vadd.s32 %v5573_v39, %v5571_v53  ;;  %v819_v9 = vpop.f32.mrf.mxu0 }
 0x3c6   : > { %v2863_v3 = vmul.u32 %v2859_v5, %v2858_v47  ;;  %v2759_v50 = vclz %v2758_v51  ;;  %v2862_v42 = vmul.u32 %v2860_v35, %v2857_v48  ;;  %v2885_v15 = vmul.u32 %v2881_v54, %v2858_v47 }
 0x3c7   : > { %v2844_v16 = vsel %vm2840_vm2, %v2824_v19, %v2827_v17  ;;  %v2846_v40 = vsel %vm2842_vm4, %v2830_v60, %v2845_v28  ;;  %v2861_v29 = vmul.u32 %v2859_v5, %v2857_v48  ;;  %v2883_v43 = vmul.u32 %v2881_v54, %v2857_v48  ;;  %v901_v60 = vpop.f32.mrf.mxu1 }
 0x3c8   : > { %v3598_v21 = vadd.s32 4294967294, %v2759_v50  ;;  %v2865_v4 = vshll.u32 %v2862_v42, 16  ;;  %v2864_v41 = vmul.u32 %v2860_v35, %v2858_v47  ;;  %v2867_v0 = vshll.u32 %v2863_v3, 16 }
 0x3c9   : > { %v2886_v59 = vmul.u32 %v2882_v18, %v2858_v47  ;;  %v2887_v12 = vshll.u32 %v2884_v37, 16  ;;  %v2889_v53 = vshll.u32 %v2885_v15, 16  ;;  %v2866_v33 = vshrl.u32 %v2862_v42, 16 }
 0x3ca   : > { %vm3599_vm7 = vcmp.lt.s32.totalorder %v3598_v21, 0  ;;  %vm2869_vm10 = vc.u32 %v2861_v29, %v2865_v4  ;;  %v2871_v10 = vadd.s32 %v2865_v4, %v2861_v29  ;;  %v2888_v18 = vshrl.u32 %v2884_v37, 16 }
 0x3cb   : > { %v2762_v39 = vsel %vm3599_vm7, 0, %v3598_v21  ;;  %v2870_v17 = vsel %vm2869_vm10, 1, %v3876_v25  ;;  %vm2891_vm8 = vc.u32 %v2883_v43, %v2887_v12  ;;  %v2893_v6 = vadd.s32 %v2887_v12, %v2883_v43 }
 0x3cc   : > { %v2763_v38 = vsub.s32 32, %v2762_v39  ;;  %v2767_v63 = vsub.s32 4294967266, %v2762_v39  ;;  %v2872_v14 = vadd.s32 %v2870_v17, %v2864_v41  ;;  %v2764_v57 = vshll.u32 %v2755_v46, %v2762_v39 }
 0x3cd   : > { %vm2873_vm9 = vc.u32 %v2871_v10, %v2867_v0  ;;  %v2892_v24 = vsel %vm2891_vm8, 1, %v3876_v25  ;;  %vm2895_vm11 = vc.u32 %v2893_v6, %v2889_v53  ;;  %v620_v47 = vadd.f32 %v619_v23, %v4287_v22  ;;  %v823_v37 = vpop.f32.mrf.mxu0 }
 0x3ce   : > { %v2765_v52 = vshrl.u32 %v2747_v27, %v2763_v38  ;;  %v2768_v20 = vadd.s32 127, %v2767_v63  ;;  %v2874_v11 = vsel %vm2873_vm9, 1, %v3876_v25  ;;  %v2894_v48 = vadd.s32 %v2892_v24, %v2886_v59  ;;  %v737_v27 = vpop.f32.mrf.mxu3 }
 0x3cf   : > { %v2876_v54 = vadd.s32 %v2874_v11, %v2872_v14  ;;  %v2896_v58 = vsel %vm2895_vm11, 1, %v3876_v25  ;;  %v625_v46 = vadd.f32 %v624_v30, %v4292_v49  ;;  %v2777_v51 = vsub.s32 4, %v5605_v32  ;;  %v905_v39 = vpop.f32.mrf.mxu1 }
 0x3d0   : > { %v2766_v5 = vor.u32 %v2765_v52, %v2764_v57  ;;  %v2769_v28 = vshll.u32 %v2768_v20, 23  ;;  %v2898_v35 = vadd.s32 %v2896_v58, %v2894_v48  ;;  %v2868_v19 = vshrl.u32 %v2863_v3, 16 }
 0x3d1   : > { %v2877_v50 = vadd.s32 %v2876_v54, %v2866_v33  ;;  %v732_v42 = vadd.f32 %v731_v7, %v620_v47  ;;  %v2890_v29 = vshrl.u32 %v2885_v15, 16  ;;  %v738_v43 = vadd.f32 %v737_v27, %v625_v46 }
 0x3d2   : > { %v2770_v21 = vor.u32 4788187, %v2769_v28  ;;  %v2899_v4 = vadd.s32 %v2898_v35, %v2888_v18  ;;  %v2847_v41 = vsel %vm2841_vm5, %v2844_v16, %v2846_v40  ;;  %v2897_v23 = vadd.s32 %v2893_v6, %v2889_v53 }
 0x3d3   : > { %v2878_v22 = vadd.s32 %v2877_v50, %v2868_v19  ;;  %v820_v0 = vadd.f32 %v819_v9, %v732_v42  ;;  %v2773_v12 = vcvt.s32.f32 %v2766_v5  ;;  %v824_v10 = vadd.f32 %v823_v37, %v738_v43 }
 0x3d4   : > { %v2771_v59 = vand.u32 2147483647, %v2770_v21  ;;  %v2900_v49 = vadd.s32 %v2899_v4, %v2890_v29  ;;  %vm2655_vm13 = vcmp.lt.s32.totalorder %v5482_v8, 0  ;;  %v2901_v38 = vmul.u32 %v5614_v1, %v2847_v41 }
 0x3d5   : > { %vm2903_vm12 = vc.u32 %v2878_v22, %v2897_v23  ;;  %v902_v3 = vadd.f32 %v901_v60, %v820_v0  ;;  %v2778_v17 = vsel %vm2655_vm13, %v2777_v51, %v5605_v32  ;;  %v906_v40 = vadd.f32 %v905_v39, %v824_v10 }
 0x3d6   : > { %v2774_v7 = vmul.f32 %v2773_v12, %v2771_v59  ;;  %v2904_v15 = vadd.s32 1, %v2900_v49  ;;  %vm2654_vm14 = vcmp.le.f32.partialorder %v2653_v2, 0.7853982  ;;  %vm2810_vm15 = vcmp.lt.s32.totalorder %v5490_v26, 0 }
 0x3d7   : > { %v928_v16 = vmul.f32 %v5658_v13, %v902_v3  ;;  %v2780_v33 = vsel %vm2654_vm14, 0, %v2778_v17  ;;  %v929_v57 = vmul.f32 %v5658_v13, %v906_v40  ;;  %vm5682_vm0 = vcmp.le.f32.partialorder %v2808_v45, 0.7853982 }
 0x3d8   : > { %v2775_v9 = vxor.u32 2147483648, %v2774_v7  ;;  %v2905_v53 = vsel %vm2903_vm12, %v2904_v15, %v2900_v49  ;;  %v2797_v52 = vadd.s32 3, %v2780_v33  ;;  %v2902_v45 = vadd.s32 %v2897_v23, %v2878_v22 }
 0x3d9   : > { %v2906_v6 = vadd.s32 %v2905_v53, %v2901_v38  ;;  %v5664_v60 = vadd.f32 %v5479_v31, %v928_v16  ;;  %v5673_v5 = vadd.f32 %v5479_v31, %v929_v57  ;;  %vm2796_vm6 = vweird.f32 %v5482_v8 }
 0x3da   : > { %v2776_v63 = vsel %vm2655_vm13, %v2775_v9, %v2774_v7  ;;  %v2798_v51 = vand.u32 3, %v2797_v52 }
 0x3db   : > { %v2779_v32 = vsel %vm2654_vm14, %v5482_v8, %v2776_v63  ;;  %v2907_v14 = vadd.s32 536870912, %v2906_v6  ;;  %v2963_v1 = vand.u32 2147483647, %v5664_v60  ;;  %v2966_v30 = vand.u32 2139095040, %v5664_v60 }
 0x3dc   : > { %v2781_v24 = vmul.f32 %v2779_v32, %v2779_v32  ;;  %v3121_v43 = vand.u32 2139095040, %v5673_v5  ;;  %vm2800_vm3 = vcmp.eq.s32.totalorder %v2798_v51, 0  ;;  %vm2803_vm4 = vcmp.eq.s32.totalorder %v2798_v51, 2 }
 0x3dd   : > { %v2908_v20 = vshrl.u32 %v2907_v14, 30  ;;  %v2970_v2 = vand.u32 8388607, %v2963_v1  ;;  %v2967_v54 = vshrl.u32 %v2966_v30, 23  ;;  %vm2799_vm5 = vcmp.lt.s32.totalorder %v2798_v51, 2 }
 0x3de   : > { %v2782_v11 = vmul.f32 -0.001358992, %v2781_v24  ;;  %v2789_v48 = vmul.f32 -0.00019511016, %v2781_v24  ;;  %v3118_v39 = vand.u32 2147483647, %v5673_v5 }
 0x3df   : > { %v2909_v18 = vshll.u32 %v2908_v20, 30  ;;  %v2932_v58 = vsub.s32 4, %v2908_v20  ;;  %v2971_v47 = vor.u32 8388608, %v2970_v2  ;;  %v3603_v46 = vadd.s32 4294967169, %v2967_v54 }
 0x3e0   : > { %v2783_v28 = vadd.f32 0.041655596, %v2782_v11  ;;  %v2790_v35 = vadd.f32 0.008332121, %v2789_v48  ;;  %v3122_v38 = vshrl.u32 %v3121_v43, 23 }
 0x3e1   : > { %v5676_v19 = vsub.s32 %v2906_v6, %v2909_v18  ;;  %v2933_v50 = vsel %vm2810_vm15, %v2932_v58, %v2908_v20  ;;  %v2973_v31 = vadd.s32 1, %v3603_v46  ;;  %v5688_v4 = vshll.u32 %v2971_v47, 8 }
 0x3e2   : > { %v2784_v42 = vmul.f32 %v2783_v28, %v2781_v24  ;;  %v2791_v27 = vmul.f32 %v2790_v35, %v2781_v24  ;;  %v2935_v0 = vsel %vm5682_vm0, 0, %v2933_v50 }
 0x3e3   : > { %vm2911_vm1 = vcmp.lt.s32.totalorder %v5676_v19, 0  ;;  %v2912_v29 = vsub.s32 0, %v5676_v19  ;;  %vm2974_vm2 = vcmp.gt.s32.totalorder %v2973_v31, 0  ;;  %v5696_v7 = vadd.s32 3, %v2935_v0 }
 0x3e4   : > { %v2785_v37 = vadd.f32 -0.4999988, %v2784_v42  ;;  %v2792_v41 = vadd.f32 -0.16666654, %v2791_v27  ;;  %v2975_v12 = vsel %vm2974_vm2, %v2973_v31, 0  ;;  %v5699_v17 = vand.u32 65535, %v5688_v4 }
 0x3e5   : > { %v2913_v59 = vsel %vm2911_vm1, %v2912_v29, %v5676_v19  ;;  %v2977_v15 = vand.u32 31, %v2975_v12  ;;  %v5702_v40 = vshrl.u32 %v5688_v4, 16  ;;  %v2976_v9 = vshrl.u32 %v2975_v12, 5 }
 0x3e6   : > { %v2786_v49 = vmul.f32 %v2785_v37, %v2781_v24  ;;  %v2793_v10 = vmul.f32 %v2792_v41, %v2781_v24  ;;  %v2914_v3 = vclz %v2913_v59 }
 0x3e7   : > { %v2978_v53 = vsub.s32 32, %v2977_v15  ;;  %v2980_v6 = vshll.u32 %v3870_v34, %v2977_v15  ;;  %v2983_v63 = vshll.u32 %v3871_v44, %v2977_v15  ;;  %v2986_v57 = vshll.u32 %v3872_v56, %v2977_v15 }
 0x3e8   : > { %v2787_v16 = vadd.f32 1.0, %v2786_v49  ;;  %v2794_v22 = vadd.f32 1.0, %v2793_v10  ;;  %v3601_v23 = vadd.s32 4294967294, %v2914_v3  ;;  %v2989_v20 = vshll.u32 %v3873_v62, %v2977_v15 }
 0x3e9   : > { %v2981_v30 = vshrl.u32 %v3871_v44, %v2978_v53  ;;  %v2984_v52 = vshrl.u32 %v3872_v56, %v2978_v53  ;;  %v2987_v47 = vshrl.u32 %v3873_v62, %v2978_v53  ;;  %v2990_v46 = vshrl.u32 %v3874_v36, %v2978_v53 }
 0x3ea   : > { %v2795_v33 = vmul.f32 %v2794_v22, %v2779_v32  ;;  %v2804_v14 = vxor.u32 2147483648, %v2787_v16  ;;  %vm3602_vm7 = vcmp.lt.s32.totalorder %v3601_v23, 0  ;;  %v2992_v50 = vshll.u32 %v3874_v36, %v2977_v15 }
 0x3eb   : > { %v2917_v24 = vsel %vm3602_vm7, 0, %v3601_v23  ;;  %v2982_v32 = vor.u32 %v2981_v30, %v2980_v6  ;;  %v2985_v58 = vor.u32 %v2984_v52, %v2983_v63  ;;  %v2988_v31 = vor.u32 %v2987_v47, %v2986_v57 }
 0x3ec   : > { %v2801_v2 = vxor.u32 2147483648, %v2795_v33  ;;  %v2805_v11 = vsel %vm2803_vm4, %v2804_v14, %v2795_v33  ;;  %v2918_v48 = vsub.s32 32, %v2917_v24  ;;  %v2919_v54 = vshll.u32 %v5676_v19, %v2917_v24 }
 0x3ed   : > { %v2922_v18 = vsub.s32 4294967266, %v2917_v24  ;;  %v2993_v29 = vshrl.u32 %v6012_v61, %v2978_v53  ;;  %v2979_v43 = vshrl.u32 %v3870_v34, %v2978_v53  ;;  %v2991_v37 = vor.u32 %v2990_v46, %v2989_v20 }
 0x3ee   : > { %v2802_v28 = vsel %vm2800_vm3, %v2787_v16, %v2801_v2  ;;  %v2920_v35 = vshrl.u32 %v2902_v45, %v2918_v48  ;;  %vm2995_vm10 = vcmp.lt.s32.totalorder %v2976_v9, 1  ;;  %vm2998_vm8 = vcmp.lt.s32.totalorder %v2976_v9, 4 }
 0x3ef   : > { %v2806_v42 = vsel %vm2799_vm5, %v2802_v28, %v2805_v11  ;;  %v2923_v27 = vadd.s32 127, %v2922_v18  ;;  %v2994_v45 = vor.u32 %v2993_v29, %v2992_v50  ;;  %vm2997_vm9 = vcmp.lt.s32.totalorder %v2976_v9, 3 }
 0x3f0   : > { %v2807_v19 = vsel %vm2796_vm6, nan, %v2806_v42  ;;  %v2921_v41 = vor.u32 %v2920_v35, %v2919_v54  ;;  %v2999_v59 = vsel %vm2995_vm10, %v2979_v43, %v2982_v32  ;;  %v3000_v51 = vsel %vm2998_vm8, %v2988_v31, 2102212464 }
 0x3f1   : > { %3439 = vst [vmem:[%s4567_s23 + $0x58] sm:$0xff] %v2807_v19  ;;  %v2924_v0 = vshll.u32 %v2923_v27, 23  ;;  %v3003_v12 = vsel %vm2995_vm10, %v2982_v32, %v2985_v58  ;;  %v3001_v10 = vsel %vm2997_vm9, %v2985_v58, %v3000_v51  ;;  %v3004_v3 = vsel %vm2998_vm8, %v2991_v37, 920167782 }
 0x3f2   : > { %v3007_v15 = vsel %vm2995_vm10, %v2985_v58, %v2988_v31  ;;  %vm2996_vm11 = vcmp.lt.s32.totalorder %v2976_v9, 2  ;;  %v3005_v8 = vsel %vm2997_vm9, %v2988_v31, %v3004_v3  ;;  %v3008_v16 = vsel %vm2998_vm8, %v2994_v45, 1326507024 }
 0x3f3   : > { %v2925_v49 = vor.u32 4788187, %v2924_v0  ;;  %v3606_v22 = vadd.s32 4294967169, %v3122_v38  ;;  %v2928_v53 = vcvt.s32.f32 %v2921_v41  ;;  %v3006_v6 = vsel %vm2996_vm11, %v3003_v12, %v3005_v8 }
 0x3f4   : > { %v3009_v63 = vsel %vm2997_vm9, %v2991_v37, %v3008_v16  ;;  %v5722_v33 = vsel %vm2996_vm11, %v2999_v59, %v3001_v10  ;;  %v3036_v57 = vand.u32 65535, %v3006_v6  ;;  %v3037_v24 = vshrl.u32 %v3006_v6, 16 }
 0x3f5   : > { %v2926_v23 = vand.u32 2147483647, %v2925_v49  ;;  %v3010_v14 = vsel %vm2996_vm11, %v3007_v15, %v3009_v63  ;;  %v5725_v2 = vand.u32 3, %v5696_v7  ;;  %v5731_v38 = vand.u32 8388607, %v3118_v39 }
 0x3f6   : > { %v3014_v52 = vand.u32 65535, %v3010_v14  ;;  %v3015_v20 = vshrl.u32 %v3010_v14, 16  ;;  %v3039_v9 = vmul.u32 %v3037_v24, %v5699_v17  ;;  %v3040_v11 = vmul.u32 %v3036_v57, %v5702_v40 }
 0x3f7   : > { %v2929_v30 = vmul.f32 %v2928_v53, %v2926_v23  ;;  %v3056_v32 = vmul.u32 %v5688_v4, %v5722_v33  ;;  %v3038_v58 = vmul.u32 %v3036_v57, %v5699_v17  ;;  %v3041_v7 = vmul.u32 %v3037_v24, %v5702_v40 }
 0x3f8   : > { %v3017_v54 = vmul.u32 %v3015_v20, %v5699_v17  ;;  %v3018_v18 = vmul.u32 %v3014_v52, %v5702_v40  ;;  %v3042_v47 = vshll.u32 %v3039_v9, 16  ;;  %v3128_v28 = vadd.s32 1, %v3606_v22 }
 0x3f9   : > { %v2930_v48 = vxor.u32 2147483648, %v2929_v30  ;;  %v3016_v46 = vmul.u32 %v3014_v52, %v5699_v17  ;;  %v3019_v50 = vmul.u32 %v3015_v20, %v5702_v40  ;;  %v3044_v29 = vshll.u32 %v3040_v11, 16 }
 0x3fa   : > { %v3020_v42 = vshll.u32 %v3017_v54, 16  ;;  %v3022_v31 = vshll.u32 %v3018_v18, 16  ;;  %vm3046_vm12 = vc.u32 %v3038_v58, %v3042_v47  ;;  %v3048_v0 = vadd.s32 %v3042_v47, %v3038_v58 }
 0x3fb   : > { %v2931_v35 = vsel %vm2810_vm15, %v2930_v48, %v2929_v30  ;;  %v3047_v37 = vsel %vm3046_vm12, 1, %v3876_v25  ;;  %vm3129_vm14 = vcmp.gt.s32.totalorder %v3128_v28, 0  ;;  %v3021_v51 = vshrl.u32 %v3017_v54, 16 }
 0x3fc   : > { %v2934_v27 = vsel %vm5682_vm0, %v5490_v26, %v2931_v35  ;;  %vm3024_vm13 = vc.u32 %v3016_v46, %v3020_v42  ;;  %v3026_v43 = vadd.s32 %v3020_v42, %v3016_v46  ;;  %v3049_v45 = vadd.s32 %v3047_v37, %v3041_v7 }
 0x3fd   : > { %v2936_v19 = vmul.f32 %v2934_v27, %v2934_v27  ;;  %v3025_v41 = vsel %vm3024_vm13, 1, %v3876_v25  ;;  %vm3050_vm0 = vc.u32 %v3048_v0, %v3044_v29  ;;  %v3130_v12 = vsel %vm3129_vm14, %v3128_v28, 0 }
 0x3fe   : > { %v3027_v59 = vadd.s32 %v3025_v41, %v3019_v50  ;;  %vm3028_vm15 = vc.u32 %v3026_v43, %v3022_v31  ;;  %v3051_v15 = vsel %vm3050_vm0, 1, %v3876_v25  ;;  %v3023_v8 = vshrl.u32 %v3018_v18, 16 }
 0x3ff   : > { %v2937_v17 = vmul.f32 -0.001358992, %v2936_v19  ;;  %v2944_v40 = vmul.f32 -0.00019511016, %v2936_v19  ;;  %v3029_v21 = vsel %vm3028_vm15, 1, %v3876_v25  ;;  %v3043_v16 = vshrl.u32 %v3039_v9, 16 }
 0x400   : > { %v3031_v3 = vadd.s32 %v3029_v21, %v3027_v59  ;;  %v3053_v22 = vadd.s32 %v3051_v15, %v3049_v45  ;;  %v3132_v23 = vand.u32 31, %v3130_v12  ;;  %v3045_v14 = vshrl.u32 %v3040_v11, 16 }
 0x401   : > { %v2938_v49 = vadd.f32 0.041655596, %v2937_v17  ;;  %v2945_v10 = vadd.f32 0.008332121, %v2944_v40  ;;  %v5750_v57 = vadd.s32 %v3048_v0, %v3044_v29  ;;  %v5752_v30 = vshrl.u32 %v3130_v12, 5 }
 0x402   : > { %v3032_v63 = vadd.s32 %v3031_v3, %v3021_v51  ;;  %v3054_v24 = vadd.s32 %v3053_v22, %v3043_v16  ;;  %v5754_v52 = vsub.s32 32, %v3132_v23  ;;  %v3135_v18 = vshll.u32 %v3870_v34, %v3132_v23 }
 0x403   : > { %v2939_v53 = vmul.f32 %v2938_v49, %v2936_v19  ;;  %v2946_v6 = vmul.f32 %v2945_v10, %v2936_v19  ;;  %v3138_v7 = vshll.u32 %v3871_v44, %v3132_v23  ;;  %vm2954_vm1 = vcmp.lt.s32.totalorder %v5725_v2, 2 }
 0x404   : > { %v5756_v54 = vadd.s32 %v3032_v63, %v3023_v8  ;;  %v3055_v9 = vadd.s32 %v3054_v24, %v3045_v14  ;;  %v3136_v58 = vshrl.u32 %v3871_v44, %v5754_v52  ;;  %v3139_v11 = vshrl.u32 %v3872_v56, %v5754_v52 }
 0x405   : > { %v2940_v20 = vadd.f32 -0.4999988, %v2939_v53  ;;  %v2947_v48 = vadd.f32 -0.16666654, %v2946_v6  ;;  %v3141_v35 = vshll.u32 %v3872_v56, %v3132_v23  ;;  %vm2951_vm3 = vweird.f32 %v5490_v26 }
 0x406   : > { %vm3058_vm2 = vc.u32 %v5756_v54, %v5750_v57  ;;  %v3059_v46 = vadd.s32 1, %v3055_v9  ;;  %v5769_v50 = vor.u32 %v3136_v58, %v3135_v18  ;;  %v5771_v42 = vor.u32 %v3139_v11, %v3138_v7 }
 0x407   : > { %v2941_v47 = vmul.f32 %v2940_v20, %v2936_v19  ;;  %v2948_v28 = vmul.f32 %v2947_v48, %v2936_v19  ;;  %v3142_v31 = vshrl.u32 %v3873_v62, %v5754_v52  ;;  %v3144_v19 = vshll.u32 %v3873_v62, %v3132_v23 }
 0x408   : > { %v3145_v37 = vshrl.u32 %v3874_v36, %v5754_v52  ;;  %v3060_v41 = vsel %vm3058_vm2, %v3059_v46, %v3055_v9  ;;  %v3147_v45 = vshll.u32 %v3874_v36, %v3132_v23  ;;  %v3148_v17 = vshrl.u32 %v6012_v61, %v5754_v52 }
 0x409   : > { %v2942_v29 = vadd.f32 1.0, %v2941_v47  ;;  %v2949_v43 = vadd.f32 1.0, %v2948_v28  ;;  %v3143_v0 = vor.u32 %v3142_v31, %v3141_v35  ;;  %v3061_v51 = vadd.s32 %v3060_v41, %v3056_v32 }
 0x40a   : > { %v3146_v21 = vor.u32 %v3145_v37, %v3144_v19  ;;  %vm2955_vm4 = vcmp.eq.s32.totalorder %v5725_v2, 0  ;;  %vm2958_vm5 = vcmp.eq.s32.totalorder %v5725_v2, 2  ;;  %v3126_v12 = vor.u32 8388608, %v5731_v38 }
 0x40b   : > { %v2950_v40 = vmul.f32 %v2949_v43, %v2934_v27  ;;  %v2959_v59 = vxor.u32 2147483648, %v2942_v29  ;;  %v3149_v49 = vor.u32 %v3148_v17, %v3147_v45  ;;  %v3062_v3 = vadd.s32 536870912, %v3061_v51 }
 0x40c   : > { %vm3150_vm6 = vcmp.lt.s32.totalorder %v5752_v30, 1  ;;  %vm3153_vm7 = vcmp.lt.s32.totalorder %v5752_v30, 4  ;;  %vm3151_vm10 = vcmp.lt.s32.totalorder %v5752_v30, 2  ;;  %vm3152_vm8 = vcmp.lt.s32.totalorder %v5752_v30, 3 }
 0x40d   : > { %v2956_v10 = vxor.u32 2147483648, %v2950_v40  ;;  %v3158_v4 = vsel %vm3150_vm6, %v5769_v50, %v5771_v42  ;;  %v3159_v33 = vsel %vm3153_vm7, %v3146_v21, 920167782  ;;  %v2960_v32 = vsel %vm2958_vm5, %v2959_v59, %v2950_v40 }
 0x40e   : > { %v5797_v27 = vshrl.u32 %v3062_v3, 30  ;;  %v3160_v15 = vsel %vm3152_vm8, %v3143_v0, %v3159_v33  ;;  %v3162_v22 = vsel %vm3150_vm6, %v5771_v42, %v3143_v0  ;;  %v5808_v23 = vshll.u32 %v3126_v12, 8 }
 0x40f   : > { %v2957_v38 = vsel %vm2955_vm4, %v2942_v29, %v2956_v10  ;;  %v3161_v16 = vsel %vm3151_vm10, %v3158_v4, %v3160_v15  ;;  %v3163_v63 = vsel %vm3153_vm7, %v3149_v49, 1326507024  ;;  %v3134_v46 = vshrl.u32 %v3870_v34, %v5754_v52 }
 0x410   : > { %v2961_v8 = vsel %vm2954_vm1, %v2957_v38, %v2960_v32  ;;  %v3064_v6 = vshll.u32 %v5797_v27, 30  ;;  %v3164_v2 = vsel %vm3152_vm8, %v3146_v21, %v3163_v63  ;;  %v3192_v14 = vshrl.u32 %v3161_v16, 16 }
 0x411   : > { %v2962_v53 = vsel %vm2951_vm3, nan, %v2961_v8  ;;  %v3165_v20 = vsel %vm3151_vm10, %v3162_v22, %v3164_v2  ;;  %v3191_v48 = vand.u32 65535, %v3161_v16  ;;  %v3167_v18 = vand.u32 65535, %v5808_v23 }
 0x412   : > { %3440 = vst [vmem:[%s4567_s23 + $0x60] sm:$0xff] %v2962_v53  ;;  %v3065_v24 = vsub.s32 %v3061_v51, %v3064_v6  ;;  %v3168_v26 = vshrl.u32 %v5808_v23, 16  ;;  %v3169_v9 = vand.u32 65535, %v3165_v20  ;;  %v3170_v58 = vshrl.u32 %v3165_v20, 16  ;;  %v743_v20 = vpop.f32.mrf.mxu3 }
 0x413   : > { %v3194_v28 = vmul.u32 %v3192_v14, %v3167_v18  ;;  %v3057_v29 = vadd.s32 %v5750_v57, %v5756_v54  ;;  %v3155_v41 = vsel %vm3153_vm7, %v3143_v0, 2102212464  ;;  %v3193_v40 = vmul.u32 %v3191_v48, %v3167_v18  ;;  %v629_v54 = vpop.f32.mrf.mxu2 }
 0x414   : > { %vm3066_vm9 = vcmp.lt.s32.totalorder %v3065_v24, 0  ;;  %v3067_v7 = vsub.s32 0, %v3065_v24  ;;  %v3172_v11 = vmul.u32 %v3170_v58, %v3167_v18  ;;  %v3173_v47 = vmul.u32 %v3169_v9, %v3168_v26 }
 0x415   : > { %v3195_v31 = vmul.u32 %v3191_v48, %v3168_v26  ;;  %v3171_v19 = vmul.u32 %v3169_v9, %v3167_v18  ;;  %v3174_v45 = vmul.u32 %v3170_v58, %v3168_v26  ;;  %v3197_v21 = vshll.u32 %v3194_v28, 16  ;;  %v827_v58 = vpop.f32.mrf.mxu0 }
 0x416   : > { %v3068_v35 = vsel %vm3066_vm9, %v3067_v7, %v3065_v24  ;;  %v3175_v37 = vshll.u32 %v3172_v11, 16  ;;  %v3177_v17 = vshll.u32 %v3173_v47, 16  ;;  %v3176_v12 = vshrl.u32 %v3172_v11, 16 }
 0x417   : > { %v3069_v43 = vclz %v3068_v35  ;;  %v3196_v49 = vmul.u32 %v3192_v14, %v3168_v26  ;;  %v3199_v10 = vshll.u32 %v3195_v31, 16  ;;  %vm3201_vm14 = vc.u32 %v3193_v40, %v3197_v21 }
 0x418   : > { %vm3179_vm11 = vc.u32 %v3171_v19, %v3175_v37  ;;  %v3181_v51 = vadd.s32 %v3175_v37, %v3171_v19  ;;  %v3202_v4 = vsel %vm3201_vm14, 1, %v3876_v25  ;;  %v3203_v33 = vadd.s32 %v3197_v21, %v3193_v40 }
 0x419   : > { %v3604_v59 = vadd.s32 4294967294, %v3069_v43  ;;  %v3180_v52 = vsel %vm3179_vm11, 1, %v3876_v25  ;;  %v3178_v15 = vshrl.u32 %v3173_v47, 16  ;;  %v3204_v22 = vadd.s32 %v3202_v4, %v3196_v49  ;;  %v909_v43 = vpop.f32.mrf.mxu1 }
 0x41a   : > { %v3182_v57 = vadd.s32 %v3180_v52, %v3174_v45  ;;  %vm3183_vm13 = vc.u32 %v3181_v51, %v3177_v17  ;;  %vm3205_vm15 = vc.u32 %v3203_v33, %v3199_v10  ;;  %v630_v53 = vadd.f32 %v629_v54, %v4295_v55 }
 0x41b   : > { %vm3605_vm12 = vcmp.lt.s32.totalorder %v3604_v59, 0  ;;  %v3184_v0 = vsel %vm3183_vm13, 1, %v3876_v25  ;;  %v3206_v14 = vsel %vm3205_vm15, 1, %v3876_v25  ;;  %v3154_v48 = vsel %vm3150_vm6, %v3134_v46, %v5769_v50 }
 0x41c   : > { %v3072_v3 = vsel %vm3605_vm12, 0, %v3604_v59  ;;  %v3186_v8 = vadd.s32 %v3184_v0, %v3182_v57  ;;  %v3198_v18 = vshrl.u32 %v3194_v28, 16  ;;  %v3208_v26 = vadd.s32 %v3206_v14, %v3204_v22 }
 0x41d   : > { %v3073_v38 = vsub.s32 32, %v3072_v3  ;;  %v3077_v32 = vsub.s32 4294967266, %v3072_v3  ;;  %v3074_v16 = vshll.u32 %v3065_v24, %v3072_v3  ;;  %v744_v9 = vadd.f32 %v743_v20, %v630_v53 }
 0x41e   : > { %v3187_v2 = vadd.s32 %v3186_v8, %v3176_v12  ;;  %v3156_v55 = vsel %vm3152_vm8, %v5771_v42, %v3155_v41  ;;  %v3200_v47 = vshrl.u32 %v3195_v31, 16  ;;  %v3209_v35 = vadd.s32 %v3208_v26, %v3198_v18  ;;  %v3705_v12 = vld [vmem:[#allocation7 + $0x1] ss:$0 sm:$0xff] }
 0x41f   : > { %v3075_v6 = vshrl.u32 %v3057_v29, %v3073_v38  ;;  %v3078_v63 = vadd.s32 127, %v3077_v32  ;;  %v828_v29 = vadd.f32 %v827_v58, %v744_v9  ;;  %v3207_v37 = vadd.s32 %v3203_v33, %v3199_v10 }
 0x420   : > { %v5839_v11 = vadd.s32 %v3187_v2, %v3178_v15  ;;  %v3087_v50 = vsub.s32 4, %v5797_v27  ;;  %v3157_v28 = vsel %vm3151_vm10, %v3154_v48, %v3156_v55  ;;  %v3210_v46 = vadd.s32 %v3209_v35, %v3200_v47 }
 0x421   : > { %v3076_v7 = vor.u32 %v3075_v6, %v3074_v16  ;;  %v3079_v24 = vshll.u32 %v3078_v63, 23  ;;  %v910_v45 = vadd.f32 %v909_v43, %v828_v29  ;;  %vm2965_vm1 = vcmp.lt.s32.totalorder %v5664_v60, 0 }
 0x422   : > { %vm3213_vm0 = vc.u32 %v5839_v11, %v3207_v37  ;;  %v3214_v42 = vadd.s32 1, %v3210_v46  ;;  %v3211_v59 = vmul.u32 %v5808_v23, %v3157_v28  ;;  %v3088_v51 = vsel %vm2965_vm1, %v3087_v50, %v5797_v27 }
 0x423   : > { %v3080_v19 = vor.u32 4788187, %v3079_v24  ;;  %v3083_v40 = vcvt.s32.f32 %v3076_v7  ;;  %v930_v41 = vmul.f32 %v5658_v13, %v910_v45  ;;  %vm2964_vm2 = vcmp.le.f32.partialorder %v2963_v1, 0.7853982 }
 0x424   : > { %v3215_v21 = vsel %vm3213_vm0, %v3214_v42, %v3210_v46  ;;  %v3090_v13 = vsel %vm2964_vm2, 0, %v3088_v51  ;;  %vm3106_vm7 = vweird.f32 %v5664_v60  ;;  %v3212_v47 = vadd.s32 %v3207_v37, %v5839_v11 }
 0x425   : > { %v3081_v17 = vand.u32 2147483647, %v3080_v19  ;;  %v5849_v30 = vadd.f32 %v3705_v12, %v930_v41  ;;  %v3216_v49 = vadd.s32 %v3215_v21, %v3211_v59  ;;  %v3107_v27 = vadd.s32 3, %v3090_v13 }
 0x426   : > { %vm3120_vm14 = vcmp.lt.s32.totalorder %v5673_v5, 0  ;;  %vm5922_vm15 = vcmp.le.f32.partialorder %v3118_v39, 0.7853982 }
 0x427   : > { %v3084_v31 = vmul.f32 %v3083_v40, %v3081_v17  ;;  %v3276_v10 = vand.u32 2139095040, %v5849_v30  ;;  %v3217_v54 = vadd.s32 536870912, %v3216_v49  ;;  %v3273_v8 = vand.u32 2147483647, %v5849_v30 }
 0x428   : > { %v3108_v6 = vand.u32 3, %v3107_v27 }
 0x429   : > { %v3085_v52 = vxor.u32 2147483648, %v3084_v31  ;;  %v3277_v0 = vshrl.u32 %v3276_v10, 23  ;;  %v5855_v4 = vshrl.u32 %v3217_v54, 30  ;;  %v3280_v20 = vand.u32 8388607, %v3273_v8 }
 0x42a   : > { %vm3109_vm5 = vcmp.lt.s32.totalorder %v3108_v6, 2  ;;  %vm3110_vm6 = vcmp.eq.s32.totalorder %v3108_v6, 0  ;;  %vm3113_vm10 = vcmp.eq.s32.totalorder %v3108_v6, 2 }
 0x42b   : > { %v3086_v57 = vsel %vm2965_vm1, %v3085_v52, %v3084_v31  ;;  %v3609_v33 = vadd.s32 4294967169, %v3277_v0  ;;  %v3219_v15 = vshll.u32 %v5855_v4, 30  ;;  %v3281_v29 = vor.u32 8388608, %v3280_v20 }
 0x42c   : > { %v3089_v3 = vsel %vm2964_vm2, %v5664_v60, %v3086_v57  ;;  %v3242_v50 = vsub.s32 4, %v5855_v4 }
 0x42d   : > { %v3091_v23 = vmul.f32 %v3089_v3, %v3089_v3  ;;  %v3283_v1 = vadd.s32 1, %v3609_v33  ;;  %v3220_v53 = vsub.s32 %v3216_v49, %v3219_v15 }
 0x42f   : > { %v3092_v38 = vmul.f32 -0.001358992, %v3091_v23  ;;  %v3099_v32 = vmul.f32 -0.00019511016, %v3091_v23  ;;  %vm3284_vm3 = vcmp.gt.s32.totalorder %v3283_v1, 0  ;;  %vm3221_vm4 = vcmp.lt.s32.totalorder %v3220_v53, 0 }
 0x430   : > { %v3222_v14 = vsub.s32 0, %v3220_v53  ;;  %v3285_v48 = vsel %vm3284_vm3, %v3283_v1, 0  ;;  %v5892_v1 = vshll.u32 %v3281_v29, 8 }
 0x431   : > { %v3093_v16 = vadd.f32 0.041655596, %v3092_v38  ;;  %v3100_v22 = vadd.f32 0.008332121, %v3099_v32  ;;  %v3287_v7 = vand.u32 31, %v3285_v48  ;;  %v5866_v46 = vshrl.u32 %v3285_v48, 5 }
 0x432   : > { %v3223_v9 = vsel %vm3221_vm4, %v3222_v14, %v3220_v53  ;;  %v3243_v48 = vsel %vm3120_vm14, %v3242_v50, %v5855_v4 }
 0x433   : > { %v3094_v63 = vmul.f32 %v3093_v16, %v3091_v23  ;;  %v3101_v2 = vmul.f32 %v3100_v22, %v3091_v23  ;;  %v3224_v58 = vclz %v3223_v9  ;;  %v5864_v28 = vsub.s32 32, %v3287_v7 }
 0x434   : > { %v3290_v45 = vshll.u32 %v3870_v34, %v3287_v7  ;;  %v3293_v17 = vshll.u32 %v3871_v44, %v3287_v7  ;;  %v3296_v11 = vshll.u32 %v3872_v56, %v3287_v7  ;;  %v3299_v51 = vshll.u32 %v3873_v62, %v3287_v7 }
 0x435   : > { %v3095_v18 = vadd.f32 -0.4999988, %v3094_v63  ;;  %v3102_v26 = vadd.f32 -0.16666654, %v3101_v2  ;;  %v3607_v35 = vadd.s32 4294967294, %v3224_v58  ;;  %v3291_v59 = vshrl.u32 %v3871_v44, %v5864_v28 }
 0x436   : > { %v3294_v52 = vshrl.u32 %v3872_v56, %v5864_v28  ;;  %v3297_v49 = vshrl.u32 %v3873_v62, %v5864_v28  ;;  %v3300_v54 = vshrl.u32 %v3874_v36, %v5864_v28  ;;  %v3302_v32 = vshll.u32 %v3874_v36, %v3287_v7 }
 0x437   : > { %v3096_v24 = vmul.f32 %v3095_v18, %v3091_v23  ;;  %v3103_v55 = vmul.f32 %v3102_v26, %v3091_v23  ;;  %vm3608_vm8 = vcmp.lt.s32.totalorder %v3607_v35, 0  ;;  %v3303_v15 = vshrl.u32 %v6012_v61, %v5864_v28 }
 0x438   : > { %v3227_v41 = vsel %vm3608_vm8, 0, %v3607_v35  ;;  %v5884_v0 = vor.u32 %v3294_v52, %v3293_v17  ;;  %v3298_v23 = vor.u32 %v3297_v49, %v3296_v11  ;;  %v3301_v62 = vor.u32 %v3300_v54, %v3299_v51 }
 0x439   : > { %v3097_v43 = vadd.f32 1.0, %v3096_v24  ;;  %v3104_v19 = vadd.f32 1.0, %v3103_v55  ;;  %v3228_v37 = vsub.s32 32, %v3227_v41  ;;  %v3232_v31 = vsub.s32 4294967266, %v3227_v41 }
 0x43a   : > { %v3229_v12 = vshll.u32 %v3220_v53, %v3227_v41  ;;  %vm3305_vm9 = vcmp.lt.s32.totalorder %v5866_v46, 1  ;;  %vm3306_vm11 = vcmp.lt.s32.totalorder %v5866_v46, 2  ;;  %vm3308_vm12 = vcmp.lt.s32.totalorder %v5866_v46, 4 }
 0x43b   : > { %v3105_v40 = vmul.f32 %v3104_v19, %v3089_v3  ;;  %v3114_v42 = vxor.u32 2147483648, %v3097_v43  ;;  %v3230_v57 = vshrl.u32 %v3212_v47, %v3228_v37  ;;  %v3233_v13 = vadd.s32 127, %v3232_v31 }
 0x43c   : > { %v5882_v3 = vor.u32 %v3291_v59, %v3290_v45  ;;  %v3304_v22 = vor.u32 %v3303_v15, %v3302_v32  ;;  %vm3307_vm13 = vcmp.lt.s32.totalorder %v5866_v46, 3  ;;  %v3314_v61 = vsel %vm3308_vm12, %v3301_v62, 920167782 }
 0x43d   : > { %v3111_v21 = vxor.u32 2147483648, %v3105_v40  ;;  %v3115_v10 = vsel %vm3113_vm10, %v3114_v42, %v3105_v40  ;;  %v3231_v27 = vor.u32 %v3230_v57, %v3229_v12  ;;  %v3234_v33 = vshll.u32 %v3233_v13, 23 }
 0x43e   : > { %v3313_v36 = vsel %vm3305_vm9, %v5882_v3, %v5884_v0  ;;  %v3315_v6 = vsel %vm3307_vm13, %v3298_v23, %v3314_v61  ;;  %v3317_v63 = vsel %vm3305_vm9, %v5884_v0, %v3298_v23  ;;  %v3318_v14 = vsel %vm3308_vm12, %v3304_v22, 1326507024 }
 0x43f   : > { %v3112_v44 = vsel %vm3110_vm6, %v3097_v43, %v3111_v21  ;;  %v3235_v16 = vor.u32 4788187, %v3234_v33  ;;  %v3238_v53 = vcvt.s32.f32 %v3231_v27  ;;  %v3316_v2 = vsel %vm3306_vm11, %v3313_v36, %v3315_v6 }
 0x440   : > { %v3116_v56 = vsel %vm3109_vm5, %v3112_v44, %v3115_v10  ;;  %v3319_v18 = vsel %vm3307_vm13, %v3301_v62, %v3318_v14  ;;  %v3347_v26 = vshrl.u32 %v3316_v2, 16  ;;  %v3322_v7 = vand.u32 65535, %v5892_v1 }
 0x441   : > { %v3117_v38 = vsel %vm3106_vm7, nan, %v3116_v56  ;;  %v3236_v60 = vand.u32 2147483647, %v3235_v16  ;;  %v3320_v58 = vsel %vm3306_vm11, %v3317_v63, %v3319_v18  ;;  %v3346_v24 = vand.u32 65535, %v3316_v2 }
 0x442   : > { %3441 = vst [vmem:[%s4567_s23 + $0x68] sm:$0xff] %v3117_v38  ;;  %v3323_v47 = vshrl.u32 %v5892_v1, 16  ;;  %v3324_v4 = vand.u32 65535, %v3320_v58  ;;  %v3325_v35 = vshrl.u32 %v3320_v58, 16  ;;  %v3245_v29 = vsel %vm5922_vm15, 0, %v3243_v48 }
 0x443   : > { %v3239_v20 = vmul.f32 %v3238_v53, %v3236_v60  ;;  %v3349_v43 = vmul.u32 %v3347_v26, %v3322_v7  ;;  %v3289_v19 = vshrl.u32 %v3870_v34, %v5864_v28  ;;  %v3348_v40 = vmul.u32 %v3346_v24, %v3322_v7 }
 0x444   : > { %v3327_v50 = vmul.u32 %v3325_v35, %v3322_v7  ;;  %v3328_v45 = vmul.u32 %v3324_v4, %v3323_v47  ;;  %v3350_v42 = vmul.u32 %v3346_v24, %v3323_v47  ;;  %v3310_v37 = vsel %vm3308_vm12, %v3298_v23, 2102212464 }
 0x445   : > { %v3240_v55 = vxor.u32 2147483648, %v3239_v20  ;;  %v3352_v41 = vshll.u32 %v3349_v43, 16  ;;  %v3326_v31 = vmul.u32 %v3324_v4, %v3322_v7  ;;  %v3329_v51 = vmul.u32 %v3325_v35, %v3323_v47 }
 0x446   : > { %v3330_v59 = vshll.u32 %v3327_v50, 16  ;;  %v3332_v21 = vshll.u32 %v3328_v45, 16  ;;  %v3351_v12 = vmul.u32 %v3347_v26, %v3323_v47  ;;  %v3354_v10 = vshll.u32 %v3350_v42, 16 }
 0x447   : > { %v3241_v39 = vsel %vm3120_vm14, %v3240_v55, %v3239_v20  ;;  %vm3356_vm0 = vc.u32 %v3348_v40, %v3352_v41  ;;  %v3358_v13 = vadd.s32 %v3352_v41, %v3348_v40  ;;  %v3331_v23 = vshrl.u32 %v3327_v50, 16 }
 0x448   : > { %v3244_v17 = vsel %vm5922_vm15, %v5673_v5, %v3241_v39  ;;  %vm3334_vm1 = vc.u32 %v3326_v31, %v3330_v59  ;;  %v3336_v52 = vadd.s32 %v3330_v59, %v3326_v31  ;;  %v3357_v57 = vsel %vm3356_vm0, 1, %v3876_v25 }
 0x449   : > { %v3246_v11 = vmul.f32 %v3244_v17, %v3244_v17  ;;  %v3335_v49 = vsel %vm3334_vm1, 1, %v3876_v25  ;;  %v3359_v33 = vadd.s32 %v3357_v57, %v3351_v12  ;;  %vm3360_vm3 = vc.u32 %v3358_v13, %v3354_v10 }
 0x44a   : > { %v3337_v56 = vadd.s32 %v3335_v49, %v3329_v51  ;;  %vm3338_vm2 = vc.u32 %v3336_v52, %v3332_v21  ;;  %v3361_v15 = vsel %vm3360_vm3, 1, %v3876_v25  ;;  %v3309_v16 = vsel %vm3305_vm9, %v3289_v19, %v5882_v3 }
 0x44b   : > { %v3247_v34 = vmul.f32 -0.001358992, %v3246_v11  ;;  %v3254_v28 = vmul.f32 -0.00019511016, %v3246_v11  ;;  %v3339_v27 = vsel %vm3338_vm2, 1, %v3876_v25  ;;  %v3311_v22 = vsel %vm3307_vm13, %v5884_v0, %v3310_v37 }
 0x44c   : > { %v3341_v32 = vadd.s32 %v3339_v27, %v3337_v56  ;;  %v3353_v36 = vshrl.u32 %v3349_v43, 16  ;;  %v3363_v61 = vadd.s32 %v3361_v15, %v3359_v33  ;;  %v3333_v6 = vshrl.u32 %v3328_v45, 16 }
 0x44d   : > { %v3248_v54 = vadd.f32 0.041655596, %v3247_v34  ;;  %v3255_v44 = vadd.f32 0.008332121, %v3254_v28  ;;  %v3262_v2 = vadd.s32 3, %v3245_v29  ;;  %v3355_v14 = vshrl.u32 %v3350_v42, 16 }
 0x44e   : > { %v3342_v63 = vadd.s32 %v3341_v32, %v3331_v23  ;;  %v3364_v20 = vadd.s32 %v3363_v61, %v3353_v36  ;;  %v3362_v26 = vadd.s32 %v3358_v13, %v3354_v10  ;;  %v3312_v3 = vsel %vm3306_vm11, %v3309_v16, %v3311_v22 }
 0x44f   : > { %v3249_v62 = vmul.f32 %v3248_v54, %v3246_v11  ;;  %v3256_v38 = vmul.f32 %v3255_v44, %v3246_v11  ;;  %v3263_v0 = vand.u32 3, %v3262_v2  ;;  %v3366_v4 = vmul.u32 %v5892_v1, %v3312_v3 }
 0x450   : > { %v3343_v25 = vadd.s32 %v3342_v63, %v3333_v6  ;;  %v3365_v9 = vadd.s32 %v3364_v20, %v3355_v14  ;;  %vm3261_vm10 = vweird.f32 %v5673_v5  ;;  %vm3275_vm11 = vcmp.lt.s32.totalorder %v5849_v30, 0 }
 0x451   : > { %v3250_v60 = vadd.f32 -0.4999988, %v3249_v62  ;;  %v3257_v53 = vadd.f32 -0.16666654, %v3256_v38  ;;  %vm3265_vm5 = vcmp.eq.s32.totalorder %v3263_v0, 0  ;;  %vm3268_vm6 = vcmp.eq.s32.totalorder %v3263_v0, 2 }
 0x452   : > { %vm3368_vm4 = vc.u32 %v3343_v25, %v3362_v26  ;;  %v3369_v24 = vadd.s32 1, %v3365_v9  ;;  %vm3264_vm7 = vcmp.lt.s32.totalorder %v3263_v0, 2  ;;  %v3367_v59 = vadd.s32 %v3362_v26, %v3343_v25 }
 0x453   : > { %v3251_v48 = vmul.f32 %v3250_v60, %v3246_v11  ;;  %v3258_v18 = vmul.f32 %v3257_v53, %v3246_v11  ;;  %vm3274_vm12 = vcmp.le.f32.partialorder %v3273_v8, 0.7853982  ;;  %vm3416_vm0 = vweird.f32 %v5849_v30 }
 0x454   : > { %v3370_v35 = vsel %vm3368_vm4, %v3369_v24, %v3365_v9 }
 0x455   : > { %v3252_v58 = vadd.f32 1.0, %v3251_v48  ;;  %v3259_v7 = vadd.f32 1.0, %v3258_v18  ;;  %v3371_v43 = vadd.s32 %v3370_v35, %v3366_v4 }
 0x457   : > { %v3260_v55 = vmul.f32 %v3259_v7, %v3244_v17  ;;  %v3269_v47 = vxor.u32 2147483648, %v3252_v58  ;;  %v3372_v19 = vadd.s32 536870912, %v3371_v43 }
 0x459   : > { %v3266_v29 = vxor.u32 2147483648, %v3260_v55  ;;  %v3270_v46 = vsel %vm3268_vm6, %v3269_v47, %v3260_v55  ;;  %v3373_v40 = vshrl.u32 %v3372_v19, 30 }
 0x45b   : > { %v3267_v39 = vsel %vm3265_vm5, %v3252_v58, %v3266_v29  ;;  %v3374_v17 = vshll.u32 %v3373_v40, 30  ;;  %v3397_v56 = vsub.s32 4, %v3373_v40 }
 0x45c   : > { %v3271_v50 = vsel %vm3264_vm7, %v3267_v39, %v3270_v46 }
 0x45d   : > { %v3272_v45 = vsel %vm3261_vm10, nan, %v3271_v50  ;;  %v3375_v42 = vsub.s32 %v3371_v43, %v3374_v17  ;;  %v3398_v38 = vsel %vm3275_vm11, %v3397_v56, %v3373_v40 }
 0x45e   : > { %3442 = vst [vmem:[%s4567_s23 + $0x70] sm:$0xff] %v3272_v45  ;;  %v3400_v16 = vsel %vm3274_vm12, 0, %v3398_v38 }
 0x45f   : > { %vm3376_vm8 = vcmp.lt.s32.totalorder %v3375_v42, 0  ;;  %v3377_v41 = vsub.s32 0, %v3375_v42  ;;  %v3417_v53 = vadd.s32 3, %v3400_v16 }
 0x461   : > { %v3378_v1 = vsel %vm3376_vm8, %v3377_v41, %v3375_v42  ;;  %v3418_v14 = vand.u32 3, %v3417_v53 }
 0x462   : > { %v3379_v11 = vclz %v3378_v1 }
 0x463   : > { %vm3420_vm13 = vcmp.eq.s32.totalorder %v3418_v14, 0  ;;  %vm3423_vm14 = vcmp.eq.s32.totalorder %v3418_v14, 2  ;;  %vm3419_vm15 = vcmp.lt.s32.totalorder %v3418_v14, 2 }
 0x464   : > { %v3610_v37 = vadd.s32 4294967294, %v3379_v11 }
 0x466   : > { %vm3611_vm9 = vcmp.lt.s32.totalorder %v3610_v37, 0 }
 0x467   : > { %v3382_v31 = vsel %vm3611_vm9, 0, %v3610_v37 }
 0x468   : > { %v3383_v51 = vsub.s32 32, %v3382_v31  ;;  %v3387_v21 = vsub.s32 4294967266, %v3382_v31  ;;  %v3384_v12 = vshll.u32 %v3375_v42, %v3382_v31 }
 0x46a   : > { %v3385_v34 = vshrl.u32 %v3367_v59, %v3383_v51  ;;  %v3388_v28 = vadd.s32 127, %v3387_v21 }
 0x46c   : > { %v3386_v5 = vor.u32 %v3385_v34, %v3384_v12  ;;  %v3389_v52 = vshll.u32 %v3388_v28, 23 }
 0x46e   : > { %v3390_v49 = vor.u32 4788187, %v3389_v52  ;;  %v3393_v57 = vcvt.s32.f32 %v3386_v5 }
 0x470   : > { %v3391_v10 = vand.u32 2147483647, %v3390_v49 }
 0x472   : > { %v3394_v13 = vmul.f32 %v3393_v57, %v3391_v10 }
 0x474   : > { %v3395_v54 = vxor.u32 2147483648, %v3394_v13 }
 0x476   : > { %v3396_v44 = vsel %vm3275_vm11, %v3395_v54, %v3394_v13 }
 0x477   : > { %v3399_v23 = vsel %vm3274_vm12, %v5849_v30, %v3396_v44 }
 0x478   : > { %v3401_v27 = vmul.f32 %v3399_v23, %v3399_v23 }
 0x47a   : > { %v3402_v33 = vmul.f32 -0.001358992, %v3401_v27  ;;  %v3409_v62 = vmul.f32 -0.00019511016, %v3401_v27 }
 0x47c   : > { %v3403_v32 = vadd.f32 0.041655596, %v3402_v33  ;;  %v3410_v15 = vadd.f32 0.008332121, %v3409_v62 }
 0x47e   : > { %v3404_v22 = vmul.f32 %v3403_v32, %v3401_v27  ;;  %v3411_v36 = vmul.f32 %v3410_v15, %v3401_v27 }
 0x480   : > { %v3405_v61 = vadd.f32 -0.4999988, %v3404_v22  ;;  %v3412_v60 = vadd.f32 -0.16666654, %v3411_v36 }
 0x482   : > { %v3406_v8 = vmul.f32 %v3405_v61, %v3401_v27  ;;  %v3413_v6 = vmul.f32 %v3412_v60, %v3401_v27 }
 0x484   : > { %v3407_v63 = vadd.f32 1.0, %v3406_v8  ;;  %v3414_v2 = vadd.f32 1.0, %v3413_v6 }
 0x486   : > { %v3415_v20 = vmul.f32 %v3414_v2, %v3399_v23  ;;  %v3424_v48 = vxor.u32 2147483648, %v3407_v63 }
 0x488   : > { %v3421_v18 = vxor.u32 2147483648, %v3415_v20  ;;  %v3425_v26 = vsel %vm3423_vm14, %v3424_v48, %v3415_v20 }
 0x48a   : > { %v3422_v25 = vsel %vm3420_vm13, %v3407_v63, %v3421_v18 }
 0x48b   : > { %v3426_v3 = vsel %vm3419_vm15, %v3422_v25, %v3425_v26 }
 0x48c   : > { %v3427_v9 = vsel %vm3416_vm0, nan, %v3426_v3 }
 0x48d   : > { %3443 = vst [vmem:[%s4567_s23 + $0x78] sm:$0xff] %v3427_v9 }
 0x48e   : > { %3823 = shalt.err (!%p3820_p11)
}
 0x48f   : > { %s3877_s9 = smov 128   ;;  %s3878_s20 = smov 8  }
 0x490   : > { %3630 = dma.vmem_to_hbm [thread:$0]  (%p3965_p3), %s3458_s27, 2048, %s3460_s28, %s3445_s16, %s3877_s9, %s3877_s9, %s3878_s20  }
 0x491 PF: > { %s3474_s21 = sand.u32 1, %s3854_s12   ;;  %p6034_p12 = scmp.ge.s32.totalorder %s3866_s15, 2 }
 0x492   : > { %s3475_s18 = scalar_lea.sflag [#allocation4], %s3474_s21 }
 0x493   : > { %p3644_p13 = pnand %p6034_p12, %p3934_p6 }
 0x495   : > { %p3645_p0 = pneg %p3644_p13 }
 0x497   : > { %3849 = dma.done.wait (%p3645_p0), %s3475_s18, 2048  }
 0x498   : > { %3851 = vsyncadd (%p3645_p0), %s3475_s18, 4294965248  ;;  %p17_p5 = scmp.ge.s32.totalorder %s3955_s4, 4   ;;  %s6035_s12 = smov %s3858_s13 }
 0x499   : > { %s6036_s13 = smov %s3862_s14  ;;  %s6037_s14 = smov %s3971_s8 }
 0x49a   : > { %s6038_s15 = smov %s3955_s4  ;;  %19 = sbr.rel (!%p17_p5) target bundleno = 6 (0x6), region = 85 }
 0x49f   :  { %3481 = vsyncpa [#allocation3], 1 }
 0x4a0   :  { %3483 = vsyncpa [#allocation3 + $0x1], 1 }
 0x4a1   :  { %3484 = vsyncpa [#allocation6], 1 }
 0x4a2   :  { %3485 = vsyncpa [#allocation4], 1 }
 0x4a3   :  { %3487 = vsyncpa [#allocation4 + $0x1], 1 }

</bundles_post_ra>
